<compile_context>
chip_gen: v5e
topology: v5e:2x2
jax: 0.10.0
libtpu: 0.0.40
codegen_flags: <defaults>
</compile_context>

<pallas_src>
import math
import jax
import jax.numpy as jnp
from jax.experimental import pallas as pl
from jax.experimental.pallas import tpu as pltpu

INPUT_NEURON = 405
LAYER_DIMS = [
    (INPUT_NEURON, 160),
    (160, 480),
    (480, 480),
    (480, 480),
    (480, 256),
    (256, 1),
]

# ---- packed / padded layout constants --------------------------------------
IN_PAD = 416                       # 405 -> 416 (multiple of 16 for bf16 tiles)
SLAB_A_ROWS = 256 + 512 + 512      # 1280 rows, 512 lanes: L2, L3, L4
SLAB_B_ROWS = 416 + 512 + 256      # 1184 rows, 256 lanes: L1, L5, L6
BIAS_TOTAL = 2176                  # 256+512+512+512+256+128 padded bias lanes


def _mlp_kernel(x_ref, wa_ref, wb_ref, bias_ref, o_ref, xpad_ref):
    """Fused 6-layer MLP on one batch tile.

    Weights/bias are VMEM-resident across the batch grid (constant index_map).
    The f32->bf16 cast and the 405->416 zero-pad of the activations happen in
    VMEM here (so the wrapper never touches HBM for padding).  bf16 operands
    feed the MXU; accumulation and bias add are f32.
    """
    # Zero-pad + cast the activations in VMEM.  Lanes [405:416) are zero, and
    # the matching weight rows are zero too, so results are exact.
    xpad_ref[...] = jnp.zeros_like(xpad_ref)
    xpad_ref[:, 0:INPUT_NEURON] = x_ref[...].astype(jnp.bfloat16)

    def layer(h, w, b_lo, b_hi, relu=True):
        y = jnp.dot(h, w, preferred_element_type=jnp.float32)
        y = y + bias_ref[:, b_lo:b_hi]
        if relu:
            y = jnp.maximum(y, 0.0).astype(jnp.bfloat16)
        return y

    h = xpad_ref[...]                                              # (TB, 416) bf16
    h = layer(h, wb_ref[0:416, :],        0,    256)               # L1 -> (TB, 256)
    h = layer(h, wa_ref[0:256, :],        256,  768)               # L2 -> (TB, 512)
    h = layer(h, wa_ref[256:768, :],      768,  1280)              # L3 -> (TB, 512)
    h = layer(h, wa_ref[768:1280, :],     1280, 1792)              # L4 -> (TB, 512)
    h = layer(h, wb_ref[416:928, :],      1792, 2048)              # L5 -> (TB, 256)
    y = layer(h, wb_ref[928:1184, 0:128], 2048, 2176, relu=False)  # L6 -> (TB, 128)
    o_ref[...] = y  # lane-dense f32 store; column 0 holds the prediction


def pack_params(params):
    """Pack the 6 (W(in,out), b(out,)) pairs into two bf16 weight slabs and one
    f32 bias slab.  All padding regions are zero, so results are exact."""
    (w1, b1), (w2, b2), (w3, b3), (w4, b4), (w5, b5), (w6, b6) = params
    wa = jnp.zeros((SLAB_A_ROWS, 512), jnp.float32)
    wb = jnp.zeros((SLAB_B_ROWS, 256), jnp.float32)
    bias = jnp.zeros((1, BIAS_TOTAL), jnp.float32)

    wb = wb.at[0:405, 0:160].set(w1)        # L1 (405,160) -> (416,256) pad
    wa = wa.at[0:160, 0:480].set(w2)        # L2 (160,480) -> (256,512) pad
    wa = wa.at[256:736, 0:480].set(w3)      # L3 (480,480) -> (512,512) pad
    wa = wa.at[768:1248, 0:480].set(w4)     # L4 (480,480) -> (512,512) pad
    wb = wb.at[416:896, 0:256].set(w5)      # L5 (480,256) -> (512,256) pad
    wb = wb.at[928:1184, 0:1].set(w6)       # L6 (256,1)   -> (256,128) pad

    bias = bias.at[0, 0:160].set(b1)
    bias = bias.at[0, 256:736].set(b2)
    bias = bias.at[0, 768:1248].set(b3)
    bias = bias.at[0, 1280:1760].set(b4)
    bias = bias.at[0, 1792:2048].set(b5)
    bias = bias.at[0, 2048:2049].set(b6)
    return wa.astype(jnp.bfloat16), wb.astype(jnp.bfloat16), bias


def _round_up(n, m):
    return ((n + m - 1) // m) * m


def latency_predictor_forward(x, packed, *, tb=512):
    """x: (B, 405) f32 (or bf16); packed: output of pack_params.
    Returns (B, 1) f32."""
    wa, wb, bias = packed
    B = x.shape[0]

    # Batch tile: as large as tb (VMEM use is tiny even at tb=1024), but
    # clamped for tiny batches and capped so that whenever there is real work
    # (B > 16) the grid has >= 2 steps -> both v7x TensorCores are used.
    TB = min(tb, _round_up(B, 8))
    if B > 16:
        TB = min(TB, _round_up((B + 1) // 2, 8))
    num_steps = (B + TB - 1) // TB

    out = pl.pallas_call(
        _mlp_kernel,
        out_shape=jax.ShapeDtypeStruct((B, 128), jnp.float32),
        grid=(num_steps,),
        in_specs=[
            pl.BlockSpec((TB, INPUT_NEURON), lambda i: (i, 0)),    # batch-tiled x
            pl.BlockSpec((SLAB_A_ROWS, 512), lambda i: (0, 0)),    # resident weights
            pl.BlockSpec((SLAB_B_ROWS, 256), lambda i: (0, 0)),    # resident weights
            pl.BlockSpec((1, BIAS_TOTAL), lambda i: (0, 0)),       # resident bias
        ],
        out_specs=pl.BlockSpec((TB, 128), lambda i: (i, 0)),
        scratch_shapes=[pltpu.VMEM((TB, IN_PAD), jnp.bfloat16)],   # in-kernel pad buf
        compiler_params=pltpu.CompilerParams(
            dimension_semantics=("parallel",),                     # shard batch on v7x
            vmem_limit_bytes=32 * 1024 * 1024),                    # v5e default is 16 MiB
    )(x, wa, wb, bias)
    return out[:, :1]


def init_params(key):
    """PyTorch nn.Linear default init: U(-1/sqrt(fan_in), 1/sqrt(fan_in))."""
    params = []
    for (fan_in, fan_out) in LAYER_DIMS:
        key, kw, kb = jax.random.split(key, 3)
        bound = 1.0 / math.sqrt(fan_in)
        w = jax.random.uniform(kw, (fan_in, fan_out), jnp.float32, -bound, bound)
        b = jax.random.uniform(kb, (fan_out,), jnp.float32, -bound, bound)
        params.append((w, b))
    return params


def reference_forward(x, params):
    """Plain-JAX reference with the same bf16-weight / f32-accumulate numerics."""
    h = x.astype(jnp.bfloat16)
    for i, (w, b) in enumerate(params):
        y = jnp.dot(h, w.astype(jnp.bfloat16),
                    preferred_element_type=jnp.float32) + b
        if i < len(params) - 1:
            h = jnp.maximum(y, 0.0).astype(jnp.bfloat16)
        else:
            h = y
    return h


if __name__ == "__main__":
    key = jax.random.PRNGKey(0)
    key, kx = jax.random.split(key)
    batch = 32   # small, and large enough to exercise the >=2-step grid path
    x = jax.random.normal(kx, (batch, INPUT_NEURON), jnp.float32)
    params = init_params(key)
    packed = pack_params(params)

    out = latency_predictor_forward(x, packed)
    out = jax.block_until_ready(out)

    ref = reference_forward(x, params)
    assert out.shape == (batch, 1), out.shape
    max_err = jnp.max(jnp.abs(out - ref))
    assert jnp.allclose(out, ref, atol=2e-3, rtol=2e-3), f"max abs err {max_err}"
    print("KERNEL_OK")
</pallas_src>

<mosaic_0001>
module attributes {stable_mosaic.version = 11 : i64} {
  func.func @_mlp_kernel(%arg0: i32, %arg1: memref<16x405xf32, #tpu.memory_space<vmem>>, %arg2: memref<1280x512xbf16, #tpu.memory_space<vmem>>, %arg3: memref<1184x256xbf16, #tpu.memory_space<vmem>>, %arg4: memref<1x2176xf32, #tpu.memory_space<vmem>>, %arg5: memref<16x128xf32, #tpu.memory_space<vmem>>, %arg6: memref<16x416xbf16, #tpu.memory_space<vmem>>) attributes {dimension_semantics = [#tpu.dimension_semantics<parallel>], iteration_bounds = array<i64: 2>, scalar_prefetch = 0 : i64, scratch_operands = 1 : i64, tpu.core_type = #tpu.core_type<tc>, window_params = [{transform_indices = @transform_0, window_bounds = array<i64: 16, 405>}, {pipeline_mode = #tpu.pipeline_mode<synchronous>, transform_indices = @transform_1, window_bounds = array<i64: 1280, 512>}, {pipeline_mode = #tpu.pipeline_mode<synchronous>, transform_indices = @transform_2, window_bounds = array<i64: 1184, 256>}, {pipeline_mode = #tpu.pipeline_mode<synchronous>, transform_indices = @transform_3, window_bounds = array<i64: 1, 2176>}, {transform_indices = @transform_4, window_bounds = array<i64: 16, 128>}]} {
    %cst = arith.constant 0.000000e+00 : bf16
    %0 = vector.broadcast %cst : bf16 to vector<16x416xbf16>
    %c0 = arith.constant 0 : index
    %c0_0 = arith.constant 0 : index
    %1 = vector.load %arg6[%c0, %c0_0] : memref<16x416xbf16, #tpu.memory_space<vmem>>, vector<16x416xbf16>
    tpu.vector_store %arg6[%c0, %c0_0], %0 {strides = array<i32>} : memref<16x416xbf16, #tpu.memory_space<vmem>>, vector<16x416xbf16>,
    %c0_1 = arith.constant 0 : index
    %c0_2 = arith.constant 0 : index
    %2 = vector.load %arg1[%c0_1, %c0_2] : memref<16x405xf32, #tpu.memory_space<vmem>>, vector<16x405xf32>
    %3 = arith.truncf %2 : vector<16x405xf32> to vector<16x405xbf16>
    %c0_3 = arith.constant 0 : index
    %c0_4 = arith.constant 0 : index
    %4 = vector.load %arg6[%c0_3, %c0_4] : memref<16x416xbf16, #tpu.memory_space<vmem>>, vector<16x405xbf16>
    tpu.vector_store %arg6[%c0_3, %c0_4], %3 {strides = array<i32>} : memref<16x416xbf16, #tpu.memory_space<vmem>>, vector<16x405xbf16>,
    %c0_5 = arith.constant 0 : index
    %c0_6 = arith.constant 0 : index
    %5 = vector.load %arg6[%c0_5, %c0_6] : memref<16x416xbf16, #tpu.memory_space<vmem>>, vector<16x416xbf16>
    %c0_7 = arith.constant 0 : index
    %c0_8 = arith.constant 0 : index
    %6 = vector.load %arg3[%c0_7, %c0_8] : memref<1184x256xbf16, #tpu.memory_space<vmem>>, vector<416x256xbf16>
    %cst_9 = arith.constant dense<0.000000e+00> : vector<16x256xf32>
    %7 = tpu.matmul %5, %6, %cst_9 {dimension_numbers = #tpu.dot_dimension_numbers<[1], [0], [0], [1], [0, 0, 1, 1], [], []>} : vector<16x416xbf16>, vector<416x256xbf16>, vector<16x256xf32> -> vector<16x256xf32>
    %c0_10 = arith.constant 0 : index
    %c0_11 = arith.constant 0 : index
    %8 = vector.load %arg4[%c0_10, %c0_11] : memref<1x2176xf32, #tpu.memory_space<vmem>>, vector<1x256xf32>
    %9 = vector.broadcast %8 : vector<1x256xf32> to vector<16x256xf32>
    %10 = arith.addf %7, %9 : vector<16x256xf32>
    %cst_12 = arith.constant 0.000000e+00 : f32
    %11 = vector.broadcast %cst_12 : f32 to vector<16x256xf32>
    %12 = arith.maximumf %10, %11 : vector<16x256xf32>
    %13 = arith.truncf %12 : vector<16x256xf32> to vector<16x256xbf16>
    %c0_13 = arith.constant 0 : index
    %c0_14 = arith.constant 0 : index
    %14 = vector.load %arg2[%c0_13, %c0_14] : memref<1280x512xbf16, #tpu.memory_space<vmem>>, vector<256x512xbf16>
    %cst_15 = arith.constant dense<0.000000e+00> : vector<16x512xf32>
    %15 = tpu.matmul %13, %14, %cst_15 {dimension_numbers = #tpu.dot_dimension_numbers<[1], [0], [0], [1], [0, 0, 1, 1], [], []>} : vector<16x256xbf16>, vector<256x512xbf16>, vector<16x512xf32> -> vector<16x512xf32>
    %c0_16 = arith.constant 0 : index
    %c256 = arith.constant 256 : index
    %16 = vector.load %arg4[%c0_16, %c256] : memref<1x2176xf32, #tpu.memory_space<vmem>>, vector<1x512xf32>
    %17 = vector.broadcast %16 : vector<1x512xf32> to vector<16x512xf32>
    %18 = arith.addf %15, %17 : vector<16x512xf32>
    %cst_17 = arith.constant 0.000000e+00 : f32
    %19 = vector.broadcast %cst_17 : f32 to vector<16x512xf32>
    %20 = arith.maximumf %18, %19 : vector<16x512xf32>
    %21 = arith.truncf %20 : vector<16x512xf32> to vector<16x512xbf16>
    %c256_18 = arith.constant 256 : index
    %c0_19 = arith.constant 0 : index
    %22 = vector.load %arg2[%c256_18, %c0_19] : memref<1280x512xbf16, #tpu.memory_space<vmem>>, vector<512x512xbf16>
    %cst_20 = arith.constant dense<0.000000e+00> : vector<16x512xf32>
    %23 = tpu.matmul %21, %22, %cst_20 {dimension_numbers = #tpu.dot_dimension_numbers<[1], [0], [0], [1], [0, 0, 1, 1], [], []>} : vector<16x512xbf16>, vector<512x512xbf16>, vector<16x512xf32> -> vector<16x512xf32>
    %c0_21 = arith.constant 0 : index
    %c768 = arith.constant 768 : index
    %24 = vector.load %arg4[%c0_21, %c768] : memref<1x2176xf32, #tpu.memory_space<vmem>>, vector<1x512xf32>
    %25 = vector.broadcast %24 : vector<1x512xf32> to vector<16x512xf32>
    %26 = arith.addf %23, %25 : vector<16x512xf32>
    %cst_22 = arith.constant 0.000000e+00 : f32
    %27 = vector.broadcast %cst_22 : f32 to vector<16x512xf32>
    %28 = arith.maximumf %26, %27 : vector<16x512xf32>
    %29 = arith.truncf %28 : vector<16x512xf32> to vector<16x512xbf16>
    %c768_23 = arith.constant 768 : index
    %c0_24 = arith.constant 0 : index
    %30 = vector.load %arg2[%c768_23, %c0_24] : memref<1280x512xbf16, #tpu.memory_space<vmem>>, vector<512x512xbf16>
    %cst_25 = arith.constant dense<0.000000e+00> : vector<16x512xf32>
    %31 = tpu.matmul %29, %30, %cst_25 {dimension_numbers = #tpu.dot_dimension_numbers<[1], [0], [0], [1], [0, 0, 1, 1], [], []>} : vector<16x512xbf16>, vector<512x512xbf16>, vector<16x512xf32> -> vector<16x512xf32>
    %c0_26 = arith.constant 0 : index
    %c1280 = arith.constant 1280 : index
    %32 = vector.load %arg4[%c0_26, %c1280] : memref<1x2176xf32, #tpu.memory_space<vmem>>, vector<1x512xf32>
    %33 = vector.broadcast %32 : vector<1x512xf32> to vector<16x512xf32>
    %34 = arith.addf %31, %33 : vector<16x512xf32>
    %cst_27 = arith.constant 0.000000e+00 : f32
    %35 = vector.broadcast %cst_27 : f32 to vector<16x512xf32>
    %36 = arith.maximumf %34, %35 : vector<16x512xf32>
    %37 = arith.truncf %36 : vector<16x512xf32> to vector<16x512xbf16>
    %c416 = arith.constant 416 : index
    %c0_28 = arith.constant 0 : index
    %38 = vector.load %arg3[%c416, %c0_28] : memref<1184x256xbf16, #tpu.memory_space<vmem>>, vector<512x256xbf16>
    %cst_29 = arith.constant dense<0.000000e+00> : vector<16x256xf32>
    %39 = tpu.matmul %37, %38, %cst_29 {dimension_numbers = #tpu.dot_dimension_numbers<[1], [0], [0], [1], [0, 0, 1, 1], [], []>} : vector<16x512xbf16>, vector<512x256xbf16>, vector<16x256xf32> -> vector<16x256xf32>
    %c0_30 = arith.constant 0 : index
    %c1792 = arith.constant 1792 : index
    %40 = vector.load %arg4[%c0_30, %c1792] : memref<1x2176xf32, #tpu.memory_space<vmem>>, vector<1x256xf32>
    %41 = vector.broadcast %40 : vector<1x256xf32> to vector<16x256xf32>
    %42 = arith.addf %39, %41 : vector<16x256xf32>
    %cst_31 = arith.constant 0.000000e+00 : f32
    %43 = vector.broadcast %cst_31 : f32 to vector<16x256xf32>
    %44 = arith.maximumf %42, %43 : vector<16x256xf32>
    %45 = arith.truncf %44 : vector<16x256xf32> to vector<16x256xbf16>
    %c928 = arith.constant 928 : index
    %c0_32 = arith.constant 0 : index
    %46 = vector.load %arg3[%c928, %c0_32] : memref<1184x256xbf16, #tpu.memory_space<vmem>>, vector<256x128xbf16>
    %cst_33 = arith.constant dense<0.000000e+00> : vector<16x128xf32>
    %47 = tpu.matmul %45, %46, %cst_33 {dimension_numbers = #tpu.dot_dimension_numbers<[1], [0], [0], [1], [0, 0, 1, 1], [], []>} : vector<16x256xbf16>, vector<256x128xbf16>, vector<16x128xf32> -> vector<16x128xf32>
    %c0_34 = arith.constant 0 : index
    %c2048 = arith.constant 2048 : index
    %48 = vector.load %arg4[%c0_34, %c2048] : memref<1x2176xf32, #tpu.memory_space<vmem>>, vector<1x128xf32>
    %49 = vector.broadcast %48 : vector<1x128xf32> to vector<16x128xf32>
    %50 = arith.addf %47, %49 : vector<16x128xf32>
    %c0_35 = arith.constant 0 : index
    %c0_36 = arith.constant 0 : index
    %51 = vector.load %arg5[%c0_35, %c0_36] : memref<16x128xf32, #tpu.memory_space<vmem>>, vector<16x128xf32>
    tpu.vector_store %arg5[%c0_35, %c0_36], %50 {strides = array<i32>} : memref<16x128xf32, #tpu.memory_space<vmem>>, vector<16x128xf32>,
    return
  }
  func.func @transform_0(%arg0: i32) -> (i32, i32) {
    %c0_i32 = arith.constant 0 : i32
    %c0_i32_0 = arith.constant 0 : i32
    return %arg0, %c0_i32 : i32, i32
  }
  func.func @transform_1(%arg0: i32) -> (i32, i32) {
    %c0_i32 = arith.constant 0 : i32
    %c0_i32_0 = arith.constant 0 : i32
    %c0_i32_1 = arith.constant 0 : i32
    return %c0_i32, %c0_i32_0 : i32, i32
  }
  func.func @transform_2(%arg0: i32) -> (i32, i32) {
    %c0_i32 = arith.constant 0 : i32
    %c0_i32_0 = arith.constant 0 : i32
    %c0_i32_1 = arith.constant 0 : i32
    return %c0_i32, %c0_i32_0 : i32, i32
  }
  func.func @transform_3(%arg0: i32) -> (i32, i32) {
    %c0_i32 = arith.constant 0 : i32
    %c0_i32_0 = arith.constant 0 : i32
    %c0_i32_1 = arith.constant 0 : i32
    return %c0_i32, %c0_i32_0 : i32, i32
  }
  func.func @transform_4(%arg0: i32) -> (i32, i32) {
    %c0_i32 = arith.constant 0 : i32
    %c0_i32_0 = arith.constant 0 : i32
    return %arg0, %c0_i32 : i32, i32
  }
}

</mosaic_0001>

<bundles_post_ra>
// kernel: tpu_custom_call.1
= control target key start
LH: loop header
LB: loop body
LE: loop exit
PB: predicated region body
PF: predicated region fallthrough
CT: control target
= control target key end

     0   :  { %9 = vsyncpa [#allocation4], 0  ;;  %s6996_s0 = inlined_call_operand.hbm [shape: f32[32,405], index: 0, kind: input, shape index: {}]   ;;  %s6997_s1 = inlined_call_operand.hbm [shape: bf16[1280,512], index: 1, kind: input, shape index: {}]   ;;  %s6998_s2 = inlined_call_operand.hbm [shape: bf16[1184,256], index: 2, kind: input, shape index: {}]   ;;  %s6999_s3 = inlined_call_operand.hbm [shape: f32[1,2176], index: 3, kind: input, shape index: {}]   ;;  %s7000_s4 = inlined_call_operand.hbm [shape: f32[32,128], index: 4, kind: output, shape index: {}]  }
   0x1   :  { %11 = vsyncpa [#allocation4 + $0x1], 0 }
   0x2   :  { %12 = vsyncpa [#allocation7], 0 }
   0x3   :  { %13 = vsyncpa [#allocation10], 0 }
   0x4   :  { %14 = vsyncpa [#allocation5], 0 }
   0x5   :  { %16 = vsyncpa [#allocation5 + $0x1], 0  ;;  %s6718_s15 = smov 0   ;;  %s6720_s16 = smov 0  }
   0x6   :  { %s6722_s17 = smov 0   ;;  %s6724_s18 = smov 0  }
   0x7 LB: > { %s6739_s19 = sadd.s32 4294967295, %s6679_s18   ;;  %s4092_s20 = sadd.s32 4294967294, %s6679_s18   ;;  %s6679_s18 = sphi %s6724_s18, %s7013_s18   ;;  %s6675_s17 = sphi %s6722_s17, %s7012_s17   ;;  %s6671_s16 = sphi %s6720_s16, %s7011_s16   ;;  %s6667_s15 = sphi %s6718_s15, %s7010_s15  }
   0x8   : > { %p42_p0 = scmp.ne.s32.totalorder %s6671_s16, %s6667_s15  ;;  %p43_p1 = scmp.eq.s32.totalorder %s6739_s19, 0 }
   0x9   : > { %p129_p2 = scmp.eq.s32.totalorder %s6739_s19, 1  ;;  %p135_p3 = scmp.eq.s32.totalorder %s4092_s20, 1 }
   0xa   : > { %p6748_p4 = por %p43_p1, %p42_p0  ;;  %p4093_p5 = scmp.ge.s32.totalorder %s6679_s18, 1 }
   0xb   : > { %p6753_p6 = por %p135_p3, %p42_p0  ;;  %p142_p7 = scmp.lt.s32.totalorder %s6679_s18, 3 }
   0xc   : > { %s153_s25 = sshll.u32 %s6997_s1, 4  ;;  %s6681_s27 = smov [#allocation6]   ;;  %s154_s25 = int_to_ptr.hbm [resolvable:$true] %s153_s25 }
   0xd   : > { %p6761_p8 = pnand %p4093_p5, %p142_p7  ;;  %s155_s28 = sshll.u32 %s6681_s27, 4  ;;  %s156_s28 = int_to_ptr.vmem [resolvable:$true] %s155_s28 }
   0xe   : > { %s167_s6 = sshll.u32 %s6998_s2, 4  ;;  %s6682_s7 = smov 256   ;;  %s168_s6 = int_to_ptr.hbm [resolvable:$true] %s167_s6 }
   0xf   : > { %p6414_p9 = pneg %p6761_p8  ;;  %s6683_s8 = smov 16  }
  0x10   : > { %s6684_s9 = smov [#allocation8]   ;;  %s6685_s11 = smov 128  }
  0x11   : > { %p6769_p10 = pnand %p6414_p9, %p43_p1  ;;  %s169_s10 = sshll.u32 %s6684_s9, 4  ;;  %s170_s10 = int_to_ptr.vmem [resolvable:$true] %s169_s10 }
  0x12   : > { %s6686_s12 = smov 8   ;;  %s182_s20 = sshll.u32 %s6999_s3, 4  ;;  %s183_s20 = int_to_ptr.hbm [resolvable:$true] %s182_s20 }
  0x13   : > { %6417 = dma.hbm_to_vmem [thread:$0]  (!%p6769_p10), %s154_s25, 40960, %s156_s28, [#allocation7], %s6682_s7, %s6682_s7, %s6683_s8  }
  0x14   : > { %6420 = dma.hbm_to_vmem [thread:$0]  (!%p6769_p10), %s168_s6, 18944, %s170_s10, [#allocation7], %s6685_s11, %s6685_s11, %s6686_s12  }
  0x15   : > { %s6687_s23 = smov [#allocation9]   ;;  %s6787_s25 = sadd.s32 1, %s6679_s18  }
  0x16   : > { %s184_s24 = sshll.u32 %s6687_s23, 4  ;;  %s26_s27 = ssub.s32 %s6679_s18, %s6787_s25  ;;  %s185_s24 = int_to_ptr.vmem [resolvable:$true] %s184_s24 }
  0x17   : > { %6423 = dma.hbm_to_vmem [thread:$0]  (!%p6769_p10), %s183_s20, 272, %s185_s24, [#allocation10]  }
  0x18   : > { %s29_s28 = sadd.s32 1, %s6675_s17  ;;  %p27_p12 = scmp.eq.s32.totalorder %s26_s27, 0 }
  0x19   : > { %p36_p13 = scmp.ne.s32.totalorder %s6675_s17, %s6671_s16  ;;  %p37_p0 = scmp.eq.s32.totalorder %s6679_s18, 0 }
  0x1a   : > { %p6435_p3 = scmp.lt.s32.totalorder %s6679_s18, 2  ;;  %s195_s29 = sand.u32 1, %s6675_s17  }
  0x1b   : > { %s6797_s30 = scalar_select %p27_p12, %s6675_s17, %s29_s28  }
  0x1c   : > { %p38_p5 = por %p37_p0, %p36_p13  ;;  %p6801_p7 = por %p129_p2, %p36_p13 }
  0x1d   : > { %s5940_s6 = sshll.u32 %s6679_s18, 6  ;;  %s4098_s7 = sshll.u32 %s195_s29, 6 }
  0x1e   : > { %s205_s10 = scalar_lea.hbm %s6996_s0, %s5940_s6  ;;  %s199_s12 = scalar_lea.vmem [#allocation3], %s4098_s7 }
  0x1f   : > { %s206_s11 = sshll.u32 %s205_s10, 4  ;;  %s208_s13 = sshll.u32 %s199_s12, 4  ;;  %s207_s11 = int_to_ptr.hbm [resolvable:$true] %s206_s11  ;;  %s209_s13 = int_to_ptr.vmem [resolvable:$true] %s208_s13 }
  0x20   : > { %p6812_p9 = pnand %p6435_p3, %p38_p5  ;;  %s196_s20 = scalar_lea.sflag [#allocation4], %s195_s29 }
  0x21   : > { %s6575_s23 = sshra.s32 %s207_s11, 4  ;;  %s6582_s6 = scalar_lea.hbm %s6996_s0, 128  ;;  %s6576_s23 = int_to_ptr.hbm [resolvable:$true] %s6575_s23 }
  0x22   : > { %s6577_s24 = scalar_lea.hbm %s6576_s23, 64  ;;  %p6579_p10 = pneg %p6812_p9 }
  0x23   : > { %p6578_p2 = scmp.ne.s32.totalorder %s6576_s23, %s6577_s24  ;;  %p6583_p0 = scmp.lt.s32.totalorder %s6576_s23, %s6996_s0 }
  0x24   : > { %p6584_p3 = scmp.lt.s32.totalorder %s6582_s6, %s6577_s24 }
  0x25   : > { %p6580_p12 = pnand %p6579_p10, %p6578_p2 }
  0x26   : > { %p6585_p5 = por %p6584_p3, %p6583_p0 }
  0x27   : > { %p6581_p13 = pneg %p6580_p12 }
  0x29   : > { %p6586_p11 = pnand %p6585_p5, %p6581_p13 }
  0x2b   : > { %6589 = shalt.err (!%p6586_p11)
}
  0x2c   : > { %s6688_s29 = smov 512   ;;  %s6689_s9 = smov 32  }
  0x2d   : > { %6427 = dma.hbm_to_vmem [thread:$0]  (!%p6812_p9), %s207_s11, 1024, %s209_s13, %s196_s20, %s6688_s29, %s6688_s29, %s6689_s9  }
  0x2e   : > { %220 = sbr.rel (%p6761_p8) target bundleno = 1141 (0x475), region = 36  ;;  %s6829_s10 = sand.u32 (!%p6761_p8), 1, %s6671_s16  }
  0x2f   : > { %s4103_s12 = sshll.u32 (!%p6761_p8), %s6829_s10, 6  ;;  %s223_s23 = scalar_lea.sflag (!%p6761_p8), [#allocation4], %s6829_s10 }
  0x30   : > { %s6833_s24 = scalar_lea.vmem (!%p6761_p8), [#allocation3], %s4103_s12 }
  0x33   : > { %6650 = dma.done.wait (%p6748_p4), %s223_s23, 1024  }
  0x34   : > { %6652 = vsyncadd (%p6748_p4), %s223_s23, 4294966272 }
  0x35   : > { %6654 = dma.done.wait (%p43_p1), [#allocation7], 59904  }
  0x36   : > { %6656 = vsyncadd (%p43_p1), [#allocation7], 4294907392 }
  0x37   : > { %6658 = dma.done.wait (%p43_p1), [#allocation10], 272  }
  0x38   : > { %6660 = vsyncadd (%p43_p1), [#allocation10], 4294967024  ;;  %vm271_vm0 = vcmask 1043456   ;;  %vm272_vm1 = vcmask 261124   ;;  %v6690_v0 = vmov 0   ;;  %vm290_vm3 = vcmask 171012  }
  0x39   : > { %vm273_vm2 = vmor %vm272_vm1, %vm271_vm0  ;;  %v4182_v1 = vld [vmem:[#allocation8 + $0x70] sm:$0xf]  ;;  %v5960_v2 = vld [vmem:[#allocation8 + $0x74] sm:$0xf0]  ;;  %vm636_vm5 = vcmask 261120   ;;  %s4107_s21 = sshll.u32 %s6829_s10, 4 }
  0x3a   : > { %274 = vst.msk [vmem:[#allocation2 + $0x8] sm:$0xff] %vm273_vm2, %v6690_v0  ;;  %v4246_v3 = vld [vmem:[#allocation8 + $0xf0] sm:$0xf]  ;;  %v4183_v4 = vor.u32 %v5960_v2, %v4182_v1  ;;  %v5976_v5 = vld [vmem:[#allocation8 + $0xf4] sm:$0xf0]  ;;  %vm6850_vm4 = vmor %vm290_vm3, %vm271_vm0  ;;  %s6397_s26 = sshll.u32 %s6739_s19, 4 }
  0x3b   : > { %276 = vst.msk [vmem:[#allocation2 + $0x18] sm:$0xff] %vm273_vm2, %v6690_v0  ;;  %v4310_v6 = vld [vmem:[#allocation8 + $0x170] sm:$0xf]  ;;  %v5992_v7 = vld [vmem:[#allocation8 + $0x174] sm:$0xf0]  ;;  %v4247_v8 = vor.u32 %v5976_v5, %v4246_v3  ;;  %s3986_s14 = scalar_lea.hbm %s7000_s4, %s6397_s26  ;;  %s266_s20 = scalar_lea.vmem [#allocation11], %s4107_s21 }
  0x3c   : > { %v4311_v9 = vor.u32 %v5992_v7, %v4310_v6  ;;  %v4174_v10 = vld [vmem:[#allocation8 + $0x60] sm:$0xf]  ;;  %v5958_v11 = vld [vmem:[#allocation8 + $0x64] sm:$0xf0]  ;;  %640 = vmatpush.bf16.msra.mxu0 %v4183_v4  ;;  %v4166_v19 = vld [vmem:[#allocation8 + $0x50] sm:$0xf] }
  0x3d   : > { %v4238_v12 = vld [vmem:[#allocation8 + $0xe0] sm:$0xf]  ;;  %v4175_v13 = vor.u32 %v5958_v11, %v4174_v10  ;;  %v5974_v14 = vld [vmem:[#allocation8 + $0xe4] sm:$0xf0]  ;;  %654 = vmatpush.bf16.msra.mxu1 %v4247_v8  ;;  %v5956_v20 = vld [vmem:[#allocation8 + $0x54] sm:$0xf0] }
  0x3e   : > { %v4302_v15 = vld [vmem:[#allocation8 + $0x160] sm:$0xf]  ;;  %v5990_v16 = vld [vmem:[#allocation8 + $0x164] sm:$0xf0]  ;;  %668 = vmatpush.bf16.msra.mxu2 %v4311_v9  ;;  %v4239_v17 = vor.u32 %v5974_v14, %v4238_v12  ;;  %v4230_v21 = vld [vmem:[#allocation8 + $0xd0] sm:$0xf]  ;;  %v4167_v28 = vor.u32 %v5956_v20, %v4166_v19 }
  0x3f   : > { %v4303_v18 = vor.u32 %v5990_v16, %v4302_v15  ;;  %v5972_v22 = vld [vmem:[#allocation8 + $0xd4] sm:$0xf0]  ;;  %v4294_v23 = vld [vmem:[#allocation8 + $0x150] sm:$0xf]  ;;  %v4158_v27 = vld [vmem:[#allocation8 + $0x40] sm:$0xf] }
  0x40   : > { %v5988_v24 = vld [vmem:[#allocation8 + $0x154] sm:$0xf0]  ;;  %v4326_v25 = vld [vmem:[#allocation8 + $0x190] sm:$0xf]  ;;  %641 = vmatpush.bf16.msra.mxu0 %v4175_v13  ;;  %v5954_v30 = vld [vmem:[#allocation8 + $0x44] sm:$0xf0]  ;;  %v4231_v33 = vor.u32 %v5972_v22, %v4230_v21 }
  0x41   : > { %v5996_v26 = vld [vmem:[#allocation8 + $0x194] sm:$0xf0]  ;;  %v4222_v31 = vld [vmem:[#allocation8 + $0xc0] sm:$0xf]  ;;  %v5970_v32 = vld [vmem:[#allocation8 + $0xc4] sm:$0xf0]  ;;  %655 = vmatpush.bf16.msra.mxu1 %v4239_v17  ;;  %v4295_v34 = vor.u32 %v5988_v24, %v4294_v23  ;;  %v4159_v43 = vor.u32 %v5954_v30, %v4158_v27 }
  0x42   : > { %v4327_v29 = vor.u32 %v5996_v26, %v4326_v25  ;;  %669 = vmatpush.bf16.msra.mxu2 %v4303_v18  ;;  %v4286_v35 = vld [vmem:[#allocation8 + $0x140] sm:$0xf]  ;;  %v5986_v36 = vld [vmem:[#allocation8 + $0x144] sm:$0xf0]  ;;  %v5959_v39 = vld [vmem:[#allocation8 + $0x74] sm:$0xf]  ;;  %v4223_v46 = vor.u32 %v5970_v32, %v4222_v31 }
  0x43   : > { %v4318_v37 = vld [vmem:[#allocation8 + $0x180] sm:$0xf]  ;;  %v5994_v38 = vld [vmem:[#allocation8 + $0x184] sm:$0xf0]  ;;  %v4184_v40 = vld [vmem:[#allocation8 + $0x78] sm:$0xf0]  ;;  %v4287_v47 = vor.u32 %v5986_v36, %v4286_v35 }
  0x44   : > { %688 = vmatpush.bf16.msra.mxu3 %v4327_v29  ;;  %v4319_v41 = vor.u32 %v5994_v38, %v4318_v37  ;;  %v4187_v42 = vor.u32 %v5959_v39, %v4184_v40  ;;  %642 = vmatpush.bf16.msra.mxu0 %v4167_v28  ;;  %v4150_v44 = vld [vmem:[#allocation8 + $0x30] sm:$0xf]  ;;  %v5952_v45 = vld [vmem:[#allocation8 + $0x34] sm:$0xf0]  ;;  %v5957_v49 = vld [vmem:[#allocation8 + $0x64] sm:$0xf] }
  0x45   : > { %656 = vmatpush.bf16.msra.mxu1 %v4231_v33  ;;  %v4214_v48 = vld [vmem:[#allocation8 + $0xb0] sm:$0xf]  ;;  %v4176_v50 = vld [vmem:[#allocation8 + $0x68] sm:$0xf0]  ;;  %v5968_v51 = vld [vmem:[#allocation8 + $0xb4] sm:$0xf0]  ;;  %v4151_v55 = vor.u32 %v5952_v45, %v4150_v44 }
  0x46   : > { %670 = vmatpush.bf16.msra.mxu2 %v4295_v34  ;;  %v4278_v52 = vld [vmem:[#allocation8 + $0x130] sm:$0xf]  ;;  %v5984_v53 = vld [vmem:[#allocation8 + $0x134] sm:$0xf0]  ;;  %v4179_v54 = vor.u32 %v5957_v49, %v4176_v50  ;;  %v5955_v56 = vld [vmem:[#allocation8 + $0x54] sm:$0xf]  ;;  %v4215_v58 = vor.u32 %v5968_v51, %v4214_v48 }
  0x47   : > { %v4168_v57 = vld [vmem:[#allocation8 + $0x58] sm:$0xf0]  ;;  %v4279_v59 = vor.u32 %v5984_v53, %v4278_v52  ;;  %v4142_v60 = vld [vmem:[#allocation8 + $0x20] sm:$0xf]  ;;  %v5950_v61 = vld [vmem:[#allocation8 + $0x24] sm:$0xf0] }
  0x48   : > { %689 = vmatpush.bf16.msra.mxu3 %v4319_v41  ;;  %643 = vmatpush.bf16.msra.mxu0 %v4159_v43  ;;  %v4206_v62 = vld [vmem:[#allocation8 + $0xa0] sm:$0xf]  ;;  %v5966_v63 = vld [vmem:[#allocation8 + $0xa4] sm:$0xf0]  ;;  %v4171_v2 = vor.u32 %v5955_v56, %v4168_v57  ;;  %v4134_v3 = vld [vmem:[#allocation8 + $0x10] sm:$0xf]  ;;  %v4143_v6 = vor.u32 %v5950_v61, %v4142_v60 }
  0x49   : > { %657 = vmatpush.bf16.msra.mxu1 %v4223_v46  ;;  %v4270_v0 = vld [vmem:[#allocation8 + $0x120] sm:$0xf]  ;;  %v5982_v1 = vld [vmem:[#allocation8 + $0x124] sm:$0xf0]  ;;  %v5948_v4 = vld [vmem:[#allocation8 + $0x14] sm:$0xf0]  ;;  %v4207_v11 = vor.u32 %v5966_v63, %v4206_v62 }
  0x4a   : > { %671 = vmatpush.bf16.msra.mxu2 %v4287_v47  ;;  %v4198_v7 = vld [vmem:[#allocation8 + $0x90] sm:$0xf]  ;;  %v5964_v8 = vld [vmem:[#allocation8 + $0x94] sm:$0xf0]  ;;  %v5953_v9 = vld [vmem:[#allocation8 + $0x44] sm:$0xf]  ;;  %v4271_v12 = vor.u32 %v5982_v1, %v4270_v0  ;;  %v4135_v25 = vor.u32 %v5948_v4, %v4134_v3 }
  0x4b   : > { %v4160_v10 = vld [vmem:[#allocation8 + $0x48] sm:$0xf0]  ;;  %v279_v13 = vld [vmem:[%s6833_s24 + $0x10] sm:$0xff]  ;;  %v280_v14 = vld [vmem:[%s6833_s24 + $0x18] sm:$0xff]  ;;  %v4199_v31 = vor.u32 %v5964_v8, %v4198_v7  ;;  %s3987_s27 = sshll.u32 %s266_s20, 4  ;;  %s3989_s28 = sshll.u32 %s3986_s14, 4  ;;  %s3988_s27 = int_to_ptr.vmem [resolvable:$true] %s3987_s27  ;;  %s3990_s28 = int_to_ptr.hbm [resolvable:$true] %s3989_s28 }
  0x4c   : > { %696 = vmatpush.bf16.msrb.mxu3 %v4187_v42  ;;  %644 = vmatpush.bf16.msra.mxu0 %v4151_v55  ;;  %v283_v15 = vld [vmem:[%s6833_s24 + $0x30] sm:$0xff]  ;;  %v5980_v17 = vld [vmem:[#allocation8 + $0x114] sm:$0xf0]  ;;  %v286_v19 = vpack.c.bf16 %v280_v14, %v279_v13  ;;  %v4163_v20 = vor.u32 %v5953_v9, %v4160_v10  ;;  %v4126_v21 = vld [vmem:[#allocation8] sm:$0xf]  ;;  %s3975_s6 = scalar_lea.sflag [#allocation5], %s6829_s10 }
  0x4d   : > { %658 = vmatpush.bf16.msra.mxu1 %v4215_v58  ;;  %v4262_v16 = vld [vmem:[#allocation8 + $0x110] sm:$0xf]  ;;  %v284_v18 = vld [vmem:[%s6833_s24 + $0x38] sm:$0xff]  ;;  %v5946_v22 = vld [vmem:[#allocation8 + $0x4] sm:$0xf0]  ;;  %s6619_s19 = sshra.s32 %s3990_s28, 4  ;;  %s6620_s19 = int_to_ptr.hbm [resolvable:$true] %s6619_s19 }
  0x4e   : > { %672 = vmatpush.bf16.msra.mxu2 %v4279_v59  ;;  %v288_v23 = vpack.c.bf16 %v284_v18, %v283_v15  ;;  %v5951_v24 = vld [vmem:[#allocation8 + $0x34] sm:$0xf]  ;;  %v4190_v26 = vld [vmem:[#allocation8 + $0x80] sm:$0xf]  ;;  %v5962_v27 = vld [vmem:[#allocation8 + $0x84] sm:$0xf0]  ;;  %v4263_v32 = vor.u32 %v5980_v17, %v4262_v16  ;;  %v4127_v44 = vor.u32 %v5946_v22, %v4126_v21  ;;  %p6626_p11 = scmp.lt.s32.totalorder %s6620_s19, %s7000_s4 }
  0x4f   : > { %292 = vst.msk [vmem:[#allocation2 + $0x8] sm:$0xff] %vm6850_vm4, %v286_v19  ;;  %v4152_v28 = vld [vmem:[#allocation8 + $0x38] sm:$0xf0]  ;;  %v277_v29 = vld [vmem:[%s6833_s24] sm:$0xff]  ;;  %v278_v30 = vld [vmem:[%s6833_s24 + $0x8] sm:$0xff]  ;;  %v4191_v45 = vor.u32 %v5962_v27, %v4190_v26  ;;  %s6621_s7 = scalar_lea.hbm %s6620_s19, 16 }
  0x50   : > { %697 = vmatpush.bf16.msrb.mxu3 %v4179_v54  ;;  %645 = vmatpush.bf16.msra.mxu0 %v4143_v6  ;;  %v4254_v33 = vld [vmem:[#allocation8 + $0x100] sm:$0xf]  ;;  %294 = vst.msk [vmem:[#allocation2 + $0x18] sm:$0xff] %vm6850_vm4, %v288_v23  ;;  %v282_v35 = vld [vmem:[%s6833_s24 + $0x28] sm:$0xff]  ;;  %v285_v36 = vpack.c.bf16 %v278_v30, %v277_v29  ;;  %v5975_v38 = vld [vmem:[#allocation8 + $0xf4] sm:$0xf]  ;;  %v4155_v41 = vor.u32 %v5951_v24, %v4152_v28  ;;  %p6622_p1 = scmp.ne.s32.totalorder %s6620_s19, %s6621_s7 }
  0x51   : > { %659 = vmatpush.bf16.msra.mxu1 %v4207_v11  ;;  %v281_v34 = vld [vmem:[%s6833_s24 + $0x20] sm:$0xff]  ;;  %v5978_v37 = vld [vmem:[#allocation8 + $0x104] sm:$0xf0]  ;;  %v4248_v39 = vld [vmem:[#allocation8 + $0xf8] sm:$0xf0]  ;;  %s6625_s9 = scalar_lea.hbm %s7000_s4, 32 }
  0x52   : > { %673 = vmatpush.bf16.msra.mxu2 %v4271_v12  ;;  %v287_v40 = vpack.c.bf16 %v282_v35, %v281_v34  ;;  %v5991_v42 = vld [vmem:[#allocation8 + $0x174] sm:$0xf]  ;;  %v4312_v43 = vld [vmem:[#allocation8 + $0x178] sm:$0xf0]  ;;  %289 = vst [vmem:[#allocation2] sm:$0xff] %v285_v36  ;;  %v4255_v46 = vor.u32 %v5978_v37, %v4254_v33  ;;  %v4251_v49 = vor.u32 %v5975_v38, %v4248_v39  ;;  %p6623_p4 = pnand %p6622_p1, %p6801_p7  ;;  %p6627_p9 = scmp.lt.s32.totalorder %s6625_s9, %s6621_s7 }
  0x53   : > { %v5949_v47 = vld [vmem:[#allocation8 + $0x24] sm:$0xf]  ;;  %v4144_v48 = vld [vmem:[#allocation8 + $0x28] sm:$0xf0]  ;;  %v4315_v50 = vor.u32 %v5991_v42, %v4312_v43  ;;  %v5947_v60 = vld [vmem:[#allocation8 + $0x14] sm:$0xf] }
  0x54   : > { %698 = vmatpush.bf16.msrb.mxu3 %v4171_v2  ;;  %646 = vmatpush.bf16.msra.mxu0 %v4135_v25  ;;  %293 = vst [vmem:[#allocation2 + $0x10] sm:$0xff] %v287_v40  ;;  %v5973_v51 = vld [vmem:[#allocation8 + $0xe4] sm:$0xf]  ;;  %v4240_v52 = vld [vmem:[#allocation8 + $0xe8] sm:$0xf0]  ;;  %v4147_v59 = vor.u32 %v5949_v47, %v4144_v48  ;;  %p6624_p8 = pneg %p6623_p4  ;;  %p6628_p2 = por %p6627_p9, %p6626_p11 }
  0x55   : > { %660 = vmatpush.bf16.msra.mxu1 %v4199_v31  ;;  %v5989_v53 = vld [vmem:[#allocation8 + $0x164] sm:$0xf]  ;;  %v4304_v56 = vld [vmem:[#allocation8 + $0x168] sm:$0xf0]  ;;  %v4136_v63 = vld [vmem:[#allocation8 + $0x18] sm:$0xf0]  ;;  %v4243_v7 = vor.u32 %v5973_v51, %v4240_v52 }
  0x56   : > { %674 = vmatpush.bf16.msra.mxu2 %v4263_v32  ;;  %v5942_v54 = vld [vmem:[#allocation2 + $0xc] sm:$0xf]  ;;  %v4118_v55 = vld [vmem:[#allocation2 + $0x8] sm:$0xf]  ;;  %v5987_v0 = vld [vmem:[#allocation8 + $0x154] sm:$0xf]  ;;  %v4307_v3 = vor.u32 %v5989_v53, %v4304_v56  ;;  %v4139_v13 = vor.u32 %v5947_v60, %v4136_v63  ;;  %p6629_p10 = pnand %p6628_p2, %p6624_p8 }
  0x57   : > { %v4120_v57 = vld [vmem:[#allocation2 + $0x18] sm:$0xf0]  ;;  %v5944_v58 = vld [vmem:[#allocation2 + $0x14] sm:$0xf0]  ;;  %v5995_v1 = vld [vmem:[#allocation8 + $0x194] sm:$0xf] }
  0x58   : > { %699 = vmatpush.bf16.msrb.mxu3 %v4163_v20  ;;  %647 = vmatpush.bf16.msra.mxu0 %v4127_v44  ;;  %v6866_v61 = vor.u32 %v5942_v54, %v4120_v57  ;;  %v6868_v62 = vor.u32 %v5944_v58, %v4118_v55  ;;  %v4328_v5 = vld [vmem:[#allocation8 + $0x198] sm:$0xf0]  ;;  %v5971_v14 = vld [vmem:[#allocation8 + $0xd4] sm:$0xf]  ;;  %v5945_v16 = vld [vmem:[#allocation8 + $0x4] sm:$0xf] }
  0x59   : > { %661 = vmatpush.bf16.msra.mxu1 %v4191_v45  ;;  %v4110_v2 = vld [vmem:[#allocation2] sm:$0xf]  ;;  %v5941_v4 = vld [vmem:[#allocation2 + $0x4] sm:$0xf]  ;;  %v4296_v9 = vld [vmem:[#allocation8 + $0x158] sm:$0xf0]  ;;  %v4331_v10 = vor.u32 %v5995_v1, %v4328_v5 }
  0x5a   : > { %675 = vmatpush.bf16.msra.mxu2 %v4255_v46  ;;  %4332 = vmatmul.msk.bf16.vlgmr.msra.gmra.mxu3 %vm636_vm5, %v6866_v61  ;;  %v4232_v15 = vld [vmem:[#allocation8 + $0xd8] sm:$0xf0]  ;;  %v4128_v17 = vld [vmem:[#allocation8 + $0x8] sm:$0xf0]  ;;  %v5993_v18 = vld [vmem:[#allocation8 + $0x184] sm:$0xf]  ;;  %v4299_v20 = vor.u32 %v5987_v0, %v4296_v9 }
  0x5b   : > { %v5943_v6 = vld [vmem:[#allocation2 + $0xc] sm:$0xf0]  ;;  %v4112_v8 = vld [vmem:[#allocation2 + $0x10] sm:$0xf0]  ;;  %v4320_v19 = vld [vmem:[#allocation8 + $0x188] sm:$0xf0]  ;;  %v4235_v22 = vor.u32 %v5971_v14, %v4232_v15  ;;  %v4131_v25 = vor.u32 %v5945_v16, %v4128_v17 }
  0x5c   : > { %700 = vmatpush.bf16.msrb.mxu3 %v4155_v41  ;;  %710 = vmatpush.bf16.msrb.mxu0 %v4251_v49  ;;  %v4111_v11 = vor.u32 %v5943_v6, %v4110_v2  ;;  %v6873_v12 = vor.u32 %v5941_v4, %v4112_v8  ;;  %v4323_v21 = vor.u32 %v5993_v18, %v4320_v19  ;;  %v5985_v23 = vld [vmem:[#allocation8 + $0x144] sm:$0xf]  ;;  %v4288_v24 = vld [vmem:[#allocation8 + $0x148] sm:$0xf0]  ;;  %v4448_v28 = vld [vmem:[#allocation6 + $0xe0] sm:$0xf] }
  0x5d   : > { %724 = vmatpush.bf16.msrb.mxu1 %v4315_v50  ;;  %676 = vmatmul.bf16.vlgmr.msra.gmra.mxu2 %v6868_v62  ;;  %v5969_v26 = vld [vmem:[#allocation8 + $0xc4] sm:$0xf]  ;;  %v4224_v27 = vld [vmem:[#allocation8 + $0xc8] sm:$0xf0]  ;;  %v4291_v29 = vor.u32 %v5985_v23, %v4288_v24  ;;  %v5983_v30 = vld [vmem:[#allocation8 + $0x134] sm:$0xf] }
  0x5e   : > { %744 = vmatpush.bf16.msrb.mxu2 %v4331_v10  ;;  %648 = vmatmul.bf16.vlgmr.msra.gmra.mxu0 %v4111_v11  ;;  %v6027_v31 = vld [vmem:[#allocation6 + $0xec] sm:$0xf0]  ;;  %v4227_v32 = vor.u32 %v5969_v26, %v4224_v27  ;;  %v4280_v33 = vld [vmem:[#allocation8 + $0x138] sm:$0xf0]  ;;  %v4432_v35 = vld [vmem:[#allocation6 + $0xc0] sm:$0xf] }
  0x5f   : > { %662 = vmatmul.bf16.vlgmr.msra.gmra.mxu1 %v6873_v12  ;;  %v4449_v34 = vor.u32 %v6027_v31, %v4448_v28  ;;  %v6023_v36 = vld [vmem:[#allocation6 + $0xcc] sm:$0xf0]  ;;  %v5967_v37 = vld [vmem:[#allocation8 + $0xb4] sm:$0xf]  ;;  %v4216_v38 = vld [vmem:[#allocation8 + $0xb8] sm:$0xf0]  ;;  %v4283_v40 = vor.u32 %v5983_v30, %v4280_v33 }
  0x60   : > { %701 = vmatpush.bf16.msrb.mxu3 %v4147_v59  ;;  %711 = vmatpush.bf16.msrb.mxu0 %v4243_v7  ;;  %v4433_v39 = vor.u32 %v6023_v36, %v4432_v35  ;;  %v4416_v41 = vld [vmem:[#allocation6 + $0xa0] sm:$0xf]  ;;  %v6019_v42 = vld [vmem:[#allocation6 + $0xac] sm:$0xf0]  ;;  %v4219_v43 = vor.u32 %v5967_v37, %v4216_v38  ;;  %v5981_v44 = vld [vmem:[#allocation8 + $0x124] sm:$0xf] }
  0x61   : > { %725 = vmatpush.bf16.msrb.mxu1 %v4307_v3  ;;  %v4272_v45 = vld [vmem:[#allocation8 + $0x128] sm:$0xf0]  ;;  %v5965_v46 = vld [vmem:[#allocation8 + $0xa4] sm:$0xf]  ;;  %v4417_v48 = vor.u32 %v6019_v42, %v4416_v41  ;;  %v4400_v50 = vld [vmem:[#allocation6 + $0x80] sm:$0xf] }
  0x62   : > { %745 = vmatpush.bf16.msrb.mxu2 %v4323_v21  ;;  %v4208_v47 = vld [vmem:[#allocation8 + $0xa8] sm:$0xf0]  ;;  %v4275_v49 = vor.u32 %v5981_v44, %v4272_v45  ;;  %v6015_v51 = vld [vmem:[#allocation6 + $0x8c] sm:$0xf0]  ;;  %v5979_v53 = vld [vmem:[#allocation8 + $0x114] sm:$0xf] }
  0x63   : > { %v4211_v52 = vor.u32 %v5965_v46, %v4208_v47  ;;  %v4264_v54 = vld [vmem:[#allocation8 + $0x118] sm:$0xf0]  ;;  %v5963_v55 = vld [vmem:[#allocation8 + $0x94] sm:$0xf]  ;;  %v4401_v57 = vor.u32 %v6015_v51, %v4400_v50  ;;  %v4384_v59 = vld [vmem:[#allocation6 + $0x60] sm:$0xf] }
  0x64   : > { %702 = vmatpush.bf16.msrb.mxu3 %v4139_v13  ;;  %712 = vmatpush.bf16.msrb.mxu0 %v4235_v22  ;;  %v4200_v56 = vld [vmem:[#allocation8 + $0x98] sm:$0xf0]  ;;  %v4267_v58 = vor.u32 %v5979_v53, %v4264_v54  ;;  %v6011_v60 = vld [vmem:[#allocation6 + $0x6c] sm:$0xf0]  ;;  %v5977_v0 = vld [vmem:[#allocation8 + $0x104] sm:$0xf] }
  0x65   : > { %726 = vmatpush.bf16.msrb.mxu1 %v4299_v20  ;;  %v4203_v63 = vor.u32 %v5963_v55, %v4200_v56  ;;  %v4256_v1 = vld [vmem:[#allocation8 + $0x108] sm:$0xf0]  ;;  %v5961_v2 = vld [vmem:[#allocation8 + $0x84] sm:$0xf]  ;;  %v4450_v5 = vld [vmem:[#allocation6 + $0xf0] sm:$0xf0]  ;;  %v4385_v6 = vor.u32 %v6011_v60, %v4384_v59 }
  0x66   : > { %v4192_v3 = vld [vmem:[#allocation8 + $0x88] sm:$0xf0]  ;;  %v6025_v4 = vld [vmem:[#allocation6 + $0xe4] sm:$0xf]  ;;  %v4368_v7 = vld [vmem:[#allocation6 + $0x40] sm:$0xf] }
  0x67   : > { %v6007_v8 = vld [vmem:[#allocation6 + $0x4c] sm:$0xf0]  ;;  %v4195_v9 = vor.u32 %v5961_v2, %v4192_v3  ;;  %v4453_v10 = vor.u32 %v6025_v4, %v4450_v5  ;;  %v4434_v13 = vld [vmem:[#allocation6 + $0xd0] sm:$0xf0]  ;;  %v6017_v16 = vld [vmem:[#allocation6 + $0xa4] sm:$0xf] }
  0x68   : > { %703 = vmatpush.bf16.msrb.mxu3 %v4131_v25  ;;  %713 = vmatpush.bf16.msrb.mxu0 %v4227_v32  ;;  %v4369_v14 = vor.u32 %v6007_v8, %v4368_v7  ;;  %v4418_v17 = vld [vmem:[#allocation6 + $0xb0] sm:$0xf0]  ;;  %v6013_v19 = vld [vmem:[#allocation6 + $0x84] sm:$0xf]  ;;  %v6003_v28 = vld [vmem:[#allocation6 + $0x2c] sm:$0xf0] }
  0x69   : > { %727 = vmatpush.bf16.msrb.mxu1 %v4291_v29  ;;  %v4421_v18 = vor.u32 %v6017_v16, %v4418_v17  ;;  %v4402_v20 = vld [vmem:[#allocation6 + $0x90] sm:$0xf0]  ;;  %v6009_v22 = vld [vmem:[#allocation6 + $0x64] sm:$0xf]  ;;  %v4576_v31 = vld [vmem:[#allocation6 + $0x1e0] sm:$0xf] }
  0x6a   : > { %v4405_v21 = vor.u32 %v6013_v19, %v4402_v20  ;;  %v4386_v23 = vld [vmem:[#allocation6 + $0x70] sm:$0xf0]  ;;  %v6005_v25 = vld [vmem:[#allocation6 + $0x44] sm:$0xf]  ;;  %v6059_v32 = vld [vmem:[#allocation6 + $0x1ec] sm:$0xf0] }
  0x6b   : > { %704 = vmatmul.bf16.vlgmr.msrb.gmra.mxu3 %v4111_v11  ;;  %v6021_v11 = vld [vmem:[#allocation6 + $0xc4] sm:$0xf]  ;;  %v4389_v24 = vor.u32 %v6009_v22, %v4386_v23  ;;  %v4370_v26 = vld [vmem:[#allocation6 + $0x50] sm:$0xf0]  ;;  %v4336_v38 = vld [vmem:[#allocation6] sm:$0xf] }
  0x6c   : > { %1152 = vmatpush.bf16.msra.mxu3 %v4449_v34  ;;  %714 = vmatpush.bf16.msrb.mxu0 %v4219_v43  ;;  %v4437_v15 = vor.u32 %v6021_v11, %v4434_v13  ;;  %v4373_v27 = vor.u32 %v6005_v25, %v4370_v26  ;;  %v6001_v29 = vld [vmem:[#allocation6 + $0x24] sm:$0xf]  ;;  %v4577_v34 = vor.u32 %v6059_v32, %v4576_v31  ;;  %v4578_v36 = vld [vmem:[#allocation6 + $0x1f0] sm:$0xf0]  ;;  %v4560_v43 = vld [vmem:[#allocation6 + $0x1c0] sm:$0xf] }
  0x6d   : > { %728 = vmatpush.bf16.msrb.mxu1 %v4283_v40  ;;  %4333 = vmatmul.msk.bf16.vlgmr.msrb.gmra.mxu2 %vm636_vm5, %v6866_v61  ;;  %v4259_v61 = vor.u32 %v5977_v0, %v4256_v1  ;;  %v6057_v35 = vld [vmem:[#allocation6 + $0x1e4] sm:$0xf]  ;;  %v4338_v42 = vld [vmem:[#allocation6 + $0x10] sm:$0xf0]  ;;  %v6055_v44 = vld [vmem:[#allocation6 + $0x1cc] sm:$0xf0] }
  0x6e   : > { %v4581_v37 = vor.u32 %v6057_v35, %v4578_v36  ;;  %1166 = vmatpush.bf16.msra.mxu2 %v4577_v34  ;;  %v5997_v40 = vld [vmem:[#allocation6 + $0x4] sm:$0xf]  ;;  %v4561_v46 = vor.u32 %v6055_v44, %v4560_v43  ;;  %v6028_v51 = vld [vmem:[#allocation6 + $0xf4] sm:$0xf0]  ;;  %v4458_v53 = vld [vmem:[#allocation6 + $0xf8] sm:$0xf0] }
  0x6f   : > { %v4341_v45 = vor.u32 %v5997_v40, %v4338_v42  ;;  %v6053_v47 = vld [vmem:[#allocation6 + $0x1c4] sm:$0xf]  ;;  %v4544_v56 = vld [vmem:[#allocation6 + $0x1a0] sm:$0xf]  ;;  %v4546_v60 = vld [vmem:[#allocation6 + $0x1b0] sm:$0xf0] }
  0x70   : > { %1153 = vmatpush.bf16.msra.mxu3 %v4433_v39  ;;  %715 = vmatpush.bf16.msrb.mxu0 %v4211_v52  ;;  %v5999_v39 = vld [vmem:[#allocation6 + $0xc] sm:$0xf0]  ;;  %v6026_v52 = vld [vmem:[#allocation6 + $0xec] sm:$0xf]  ;;  %v6024_v0 = vld [vmem:[#allocation6 + $0xd4] sm:$0xf0] }
  0x71   : > { %729 = vmatpush.bf16.msrb.mxu1 %v4275_v49  ;;  %v4337_v41 = vor.u32 %v5999_v39, %v4336_v38  ;;  %v4456_v49 = vld [vmem:[#allocation6 + $0xe8] sm:$0xf]  ;;  %v4461_v55 = vor.u32 %v6026_v52, %v4458_v53  ;;  %v6022_v3 = vld [vmem:[#allocation6 + $0xcc] sm:$0xf]  ;;  %v4442_v4 = vld [vmem:[#allocation6 + $0xd8] sm:$0xf0] }
  0x72   : > { %1167 = vmatpush.bf16.msra.mxu2 %v4561_v46  ;;  %v4457_v54 = vor.u32 %v6028_v51, %v4456_v49  ;;  %v4445_v5 = vor.u32 %v6022_v3, %v4442_v4  ;;  %v6045_v7 = vld [vmem:[#allocation6 + $0x184] sm:$0xf]  ;;  %v6020_v11 = vld [vmem:[#allocation6 + $0xb4] sm:$0xf0]  ;;  %v4426_v16 = vld [vmem:[#allocation6 + $0xb8] sm:$0xf0] }
  0x73   : > { %v6043_v19 = vld [vmem:[#allocation6 + $0x16c] sm:$0xf0]  ;;  %v6041_v20 = vld [vmem:[#allocation6 + $0x164] sm:$0xf]  ;;  %v4514_v22 = vld [vmem:[#allocation6 + $0x170] sm:$0xf0] }
  0x74   : > { %1154 = vmatpush.bf16.msra.mxu3 %v4417_v48  ;;  %716 = vmatpush.bf16.msrb.mxu0 %v4203_v63  ;;  %v4562_v48 = vld [vmem:[#allocation6 + $0x1d0] sm:$0xf0]  ;;  %v4440_v63 = vld [vmem:[#allocation6 + $0xc8] sm:$0xf]  ;;  %v4517_v25 = vor.u32 %v6041_v20, %v4514_v22  ;;  %v6012_v34 = vld [vmem:[#allocation6 + $0x74] sm:$0xf0] }
  0x75   : > { %730 = vmatpush.bf16.msrb.mxu1 %v4267_v58  ;;  %v4565_v50 = vor.u32 %v6053_v47, %v4562_v48  ;;  %v6049_v58 = vld [vmem:[#allocation6 + $0x1a4] sm:$0xf]  ;;  %v4441_v2 = vor.u32 %v6024_v0, %v4440_v63  ;;  %v4408_v23 = vld [vmem:[#allocation6 + $0x88] sm:$0xf]  ;;  %v4498_v32 = vld [vmem:[#allocation6 + $0x150] sm:$0xf0] }
  0x76   : > { %v4549_v1 = vor.u32 %v6049_v58, %v4546_v60  ;;  %v4394_v38 = vld [vmem:[#allocation6 + $0x78] sm:$0xf0]  ;;  %v6880_v39 = vld [vmem:[#allocation9] sm:$0x3]  ;;  %v6035_v42 = vld [vmem:[#allocation6 + $0x12c] sm:$0xf0] }
  0x77   : > { %v6033_v43 = vld [vmem:[#allocation6 + $0x124] sm:$0xf]  ;;  %v4376_v46 = vld [vmem:[#allocation6 + $0x48] sm:$0xf]  ;;  %v6008_v47 = vld [vmem:[#allocation6 + $0x54] sm:$0xf0] }
  0x78   : > { %1155 = vmatpush.bf16.msra.mxu3 %v4401_v57  ;;  %717 = vmatpush.bf16.msrb.mxu0 %v4195_v9  ;;  %v6051_v57 = vld [vmem:[#allocation6 + $0x1ac] sm:$0xf0]  ;;  %v4530_v9 = vld [vmem:[#allocation6 + $0x190] sm:$0xf0]  ;;  %v4377_v49 = vor.u32 %v6008_v47, %v4376_v46  ;;  %v4378_v51 = vld [vmem:[#allocation6 + $0x58] sm:$0xf0] }
  0x79   : > { %731 = vmatpush.bf16.msrb.mxu1 %v4259_v61  ;;  %v4545_v59 = vor.u32 %v6051_v57, %v4544_v56  ;;  %v6047_v61 = vld [vmem:[#allocation6 + $0x18c] sm:$0xf0]  ;;  %v4533_v13 = vor.u32 %v6045_v7, %v4530_v9  ;;  %v353_v52 = vperm.slane %v6880_v39, 0  ;;  %v6029_v56 = vld [vmem:[#allocation6 + $0x104] sm:$0xf] }
  0x7a   : > { %v4466_v58 = vld [vmem:[#allocation6 + $0x110] sm:$0xf0]  ;;  %v6004_v60 = vld [vmem:[#allocation6 + $0x34] sm:$0xf0]  ;;  %v4584_v3 = vld [vmem:[#allocation6 + $0x1e8] sm:$0xf] }
  0x7b   : > { %718 = vmatmul.bf16.vlgmr.msrb.gmra.mxu0 %v6873_v12  ;;  %v4354_v12 = vld [vmem:[#allocation6 + $0x30] sm:$0xf0]  ;;  %1168 = vmatpush.bf16.msra.mxu2 %v4545_v59  ;;  %v4360_v59 = vld [vmem:[#allocation6 + $0x28] sm:$0xf]  ;;  %v4469_v63 = vor.u32 %v6029_v56, %v4466_v58  ;;  %v4586_v7 = vld [vmem:[#allocation6 + $0x1f8] sm:$0xf0] }
  0x7c   : > { %1156 = vmatpush.bf16.msra.mxu3 %v4385_v6  ;;  %1180 = vmatpush.bf16.msra.mxu0 %v4453_v10  ;;  %v4357_v33 = vor.u32 %v6001_v29, %v4354_v12  ;;  %v4528_v6 = vld [vmem:[#allocation6 + $0x180] sm:$0xf]  ;;  %v4424_v10 = vld [vmem:[#allocation6 + $0xa8] sm:$0xf]  ;;  %v6037_v12 = vld [vmem:[#allocation6 + $0x144] sm:$0xf]  ;;  %v4361_v0 = vor.u32 %v6004_v60, %v4360_v59 }
  0x7d   : > { %732 = vmatmul.bf16.vlgmr.msrb.gmra.mxu1 %v6868_v62  ;;  %v4352_v62 = vld [vmem:[#allocation6 + $0x20] sm:$0xf]  ;;  %v4529_v8 = vor.u32 %v6047_v61, %v4528_v6  ;;  %v4501_v35 = vor.u32 %v6037_v12, %v4498_v32  ;;  %v6060_v6 = vld [vmem:[#allocation6 + $0x1f4] sm:$0xf0]  ;;  %v6058_v61 = vld [vmem:[#allocation6 + $0x1ec] sm:$0xf] }
  0x7e   : > { %v4353_v30 = vor.u32 %v6003_v28, %v4352_v62  ;;  %1194 = vmatpush.bf16.msra.mxu1 %v4581_v37  ;;  %v4410_v62 = vld [vmem:[#allocation6 + $0x98] sm:$0xf0]  ;;  %v4496_v29 = vld [vmem:[#allocation6 + $0x140] sm:$0xf]  ;;  %v6010_v37 = vld [vmem:[#allocation6 + $0x6c] sm:$0xf] }
  0x7f   : > { %1169 = vmatpush.bf16.msra.mxu2 %v4529_v8  ;;  %v4397_v40 = vor.u32 %v6010_v37, %v4394_v38  ;;  %v4554_v12 = vld [vmem:[#allocation6 + $0x1b8] sm:$0xf0]  ;;  %v6048_v37 = vld [vmem:[#allocation6 + $0x194] sm:$0xf0]  ;;  %v6046_v38 = vld [vmem:[#allocation6 + $0x18c] sm:$0xf] }
  0x80   : > { %1157 = vmatpush.bf16.msra.mxu3 %v4369_v14  ;;  %1181 = vmatpush.bf16.msra.mxu0 %v4437_v15  ;;  %v4425_v14 = vor.u32 %v6020_v11, %v4424_v10  ;;  %v6018_v15 = vld [vmem:[#allocation6 + $0xac] sm:$0xf]  ;;  %v4585_v10 = vor.u32 %v6060_v6, %v4584_v3  ;;  %v4589_v11 = vor.u32 %v6058_v61, %v4586_v7  ;;  %v6040_v56 = vld [vmem:[#allocation6 + $0x154] sm:$0xf0]  ;;  %v4506_v58 = vld [vmem:[#allocation6 + $0x158] sm:$0xf0] }
  0x81   : > { %v4429_v17 = vor.u32 %v6018_v15, %v4426_v16  ;;  %v5998_v15 = vld [vmem:[#allocation6 + $0xc] sm:$0xf]  ;;  %v6036_v3 = vld [vmem:[#allocation6 + $0x134] sm:$0xf0]  ;;  %v354_v61 = vperm.slane %v6880_v39, 1 }
  0x82   : > { %1195 = vmatpush.bf16.msra.mxu1 %v4565_v50  ;;  %v6006_v50 = vld [vmem:[#allocation6 + $0x4c] sm:$0xf] }
  0x83   : > { %v4381_v53 = vor.u32 %v6006_v50, %v4378_v51  ;;  %v6042_v50 = vld [vmem:[#allocation6 + $0x16c] sm:$0xf] }
  0x84   : > { %1182 = vmatpush.bf16.msra.mxu0 %v4421_v18  ;;  %1158 = vmatpush.bf16.msra.mxu3 %v4353_v30  ;;  %v4512_v18 = vld [vmem:[#allocation6 + $0x160] sm:$0xf]  ;;  %v6039_v30 = vld [vmem:[#allocation6 + $0x14c] sm:$0xf0] }
  0x85   : > { %v4497_v31 = vor.u32 %v6039_v30, %v4496_v29  ;;  %v6050_v29 = vld [vmem:[#allocation6 + $0x1ac] sm:$0xf] }
  0x86   : > { %1196 = vmatpush.bf16.msra.mxu1 %v4549_v1  ;;  %v6002_v1 = vld [vmem:[#allocation6 + $0x2c] sm:$0xf]  ;;  %v4557_v32 = vor.u32 %v6050_v29, %v4554_v12  ;;  %v4672_v29 = vld [vmem:[#allocation6 + $0x2a0] sm:$0xf] }
  0x88   : > { %1183 = vmatpush.bf16.msra.mxu0 %v4405_v21  ;;  %1159 = vmatpush.bf16.msra.mxu3 %v4337_v41  ;;  %v4513_v21 = vor.u32 %v6043_v19, %v4512_v18  ;;  %v4480_v41 = vld [vmem:[#allocation6 + $0x120] sm:$0xf]  ;;  %v4568_v18 = vld [vmem:[#allocation6 + $0x1c8] sm:$0xf]  ;;  %v6056_v19 = vld [vmem:[#allocation6 + $0x1d4] sm:$0xf0] }
  0x89   : > { %v4481_v44 = vor.u32 %v6035_v42, %v4480_v41  ;;  %v4569_v22 = vor.u32 %v6056_v19, %v4568_v18  ;;  %v4538_v42 = vld [vmem:[#allocation6 + $0x198] sm:$0xf0] }
  0x8a   : > { %1197 = vmatpush.bf16.msra.mxu1 %v4533_v13  ;;  %1170 = vmatpush.bf16.msra.mxu2 %v4513_v21  ;;  %v4344_v13 = vld [vmem:[#allocation6 + $0x8] sm:$0xf] }
  0x8c   : > { %1184 = vmatpush.bf16.msra.mxu0 %v4389_v24  ;;  %1208 = vmatpush.bf16.msrb.mxu3 %v4457_v54  ;;  %v6016_v24 = vld [vmem:[#allocation6 + $0x94] sm:$0xf0]  ;;  %v4464_v54 = vld [vmem:[#allocation6 + $0x100] sm:$0xf] }
  0x8d   : > { %v4409_v26 = vor.u32 %v6016_v24, %v4408_v23  ;;  %v6054_v23 = vld [vmem:[#allocation6 + $0x1cc] sm:$0xf]  ;;  %v4570_v24 = vld [vmem:[#allocation6 + $0x1d8] sm:$0xf0] }
  0x8e   : > { %1198 = vmatpush.bf16.msra.mxu1 %v4517_v25  ;;  %1171 = vmatpush.bf16.msra.mxu2 %v4497_v31 }
  0x90   : > { %1185 = vmatpush.bf16.msra.mxu0 %v4373_v27  ;;  %1209 = vmatpush.bf16.msrb.mxu3 %v4441_v2  ;;  %v6014_v27 = vld [vmem:[#allocation6 + $0x8c] sm:$0xf]  ;;  %v4362_v2 = vld [vmem:[#allocation6 + $0x38] sm:$0xf0] }
  0x91   : > { %v4413_v28 = vor.u32 %v6014_v27, %v4410_v62  ;;  %v4552_v62 = vld [vmem:[#allocation6 + $0x1a8] sm:$0xf] }
  0x92   : > { %1199 = vmatpush.bf16.msra.mxu1 %v4501_v35  ;;  %1172 = vmatpush.bf16.msra.mxu2 %v4481_v44 }
  0x94   : > { %1186 = vmatpush.bf16.msra.mxu0 %v4357_v33  ;;  %1210 = vmatpush.bf16.msrb.mxu3 %v4425_v14  ;;  %v4392_v33 = vld [vmem:[#allocation6 + $0x68] sm:$0xf]  ;;  %v6000_v14 = vld [vmem:[#allocation6 + $0x14] sm:$0xf0] }
  0x95   : > { %v4393_v36 = vor.u32 %v6012_v34, %v4392_v33  ;;  %v4345_v16 = vor.u32 %v6000_v14, %v4344_v13  ;;  %v4474_v13 = vld [vmem:[#allocation6 + $0x118] sm:$0xf0] }
  0x98   : > { %1187 = vmatpush.bf16.msra.mxu0 %v4341_v45  ;;  %1211 = vmatpush.bf16.msrb.mxu3 %v4409_v26  ;;  %v4482_v45 = vld [vmem:[#allocation6 + $0x130] sm:$0xf0]  ;;  %v4573_v26 = vor.u32 %v6054_v23, %v4570_v24  ;;  %v4688_v24 = vld [vmem:[#allocation6 + $0x2c0] sm:$0xf] }
  0x99   : > { %v4485_v48 = vor.u32 %v6033_v43, %v4482_v45  ;;  %v4541_v45 = vor.u32 %v6046_v38, %v4538_v42  ;;  %v6123_v38 = vld [vmem:[#allocation6 + $0x3ec] sm:$0xf0] }
  0x9b   : > { %1200 = vmatpush.bf16.msra.mxu1 %v4485_v48  ;;  %v4520_v48 = vld [vmem:[#allocation6 + $0x168] sm:$0xf] }
  0x9c   : > { %1236 = vmatpush.bf16.msrb.mxu0 %v4461_v55  ;;  %1212 = vmatpush.bf16.msrb.mxu3 %v4393_v36  ;;  %v6031_v55 = vld [vmem:[#allocation6 + $0x10c] sm:$0xf0]  ;;  %v4536_v36 = vld [vmem:[#allocation6 + $0x188] sm:$0xf] }
  0x9d   : > { %v4465_v57 = vor.u32 %v6031_v55, %v4464_v54  ;;  %v4537_v41 = vor.u32 %v6048_v37, %v4536_v36  ;;  %v4504_v54 = vld [vmem:[#allocation6 + $0x148] sm:$0xf]  ;;  %v4832_v36 = vld [vmem:[#allocation6 + $0x3e0] sm:$0xf] }
  0x9f   : > { %1173 = vmatpush.bf16.msra.mxu2 %v4465_v57  ;;  %1201 = vmatpush.bf16.msra.mxu1 %v4469_v63  ;;  %v6038_v57 = vld [vmem:[#allocation6 + $0x14c] sm:$0xf] }
  0xa0   : > { %1237 = vmatpush.bf16.msrb.mxu0 %v4445_v5  ;;  %1213 = vmatpush.bf16.msrb.mxu3 %v4377_v49  ;;  %v4365_v5 = vor.u32 %v6002_v1, %v4362_v2  ;;  %v6044_v49 = vld [vmem:[#allocation6 + $0x174] sm:$0xf0]  ;;  %v4509_v1 = vor.u32 %v6038_v57, %v4506_v58  ;;  %v4488_v2 = vld [vmem:[#allocation6 + $0x128] sm:$0xf]  ;;  %v6107_v57 = vld [vmem:[#allocation6 + $0x36c] sm:$0xf0] }
  0xa1   : > { %v4489_v7 = vor.u32 %v6036_v3, %v4488_v2  ;;  %v5072_v2 = vld [vmem:[#allocation6 + $0x5c0] sm:$0xf] }
  0xa3   : > { %1222 = vmatpush.bf16.msrb.mxu2 %v4585_v10  ;;  %1250 = vmatpush.bf16.msrb.mxu1 %v4589_v11  ;;  %v6032_v10 = vld [vmem:[#allocation6 + $0x114] sm:$0xf0]  ;;  %v6030_v11 = vld [vmem:[#allocation6 + $0x10c] sm:$0xf] }
  0xa4   : > { %1238 = vmatpush.bf16.msrb.mxu0 %v4429_v17  ;;  %1214 = vmatpush.bf16.msrb.mxu3 %v4361_v0  ;;  %v4346_v17 = vld [vmem:[#allocation6 + $0x18] sm:$0xf0]  ;;  %v4505_v0 = vor.u32 %v6040_v56, %v4504_v54  ;;  %v6111_v54 = vld [vmem:[#allocation6 + $0x38c] sm:$0xf0]  ;;  %v4768_v56 = vld [vmem:[#allocation6 + $0x360] sm:$0xf] }
  0xa5   : > { %v4349_v21 = vor.u32 %v5998_v15, %v4346_v17  ;;  %v4769_v58 = vor.u32 %v6107_v57, %v4768_v56  ;;  %v4802_v56 = vld [vmem:[#allocation6 + $0x3b0] sm:$0xf0]  ;;  %v4896_v57 = vld [vmem:[#allocation6 + $0x460] sm:$0xf] }
  0xa7   : > { %1223 = vmatpush.bf16.msrb.mxu2 %v4569_v22  ;;  %1251 = vmatpush.bf16.msrb.mxu1 %v4573_v26  ;;  %v6091_v22 = vld [vmem:[#allocation6 + $0x2ec] sm:$0xf0] }
  0xa8   : > { %1239 = vmatpush.bf16.msrb.mxu0 %v4413_v28  ;;  %1215 = vmatpush.bf16.msrb.mxu3 %v4345_v16  ;;  %v6052_v28 = vld [vmem:[#allocation6 + $0x1b4] sm:$0xf0]  ;;  %v4477_v16 = vor.u32 %v6030_v11, %v4474_v13  ;;  %v4736_v11 = vld [vmem:[#allocation6 + $0x320] sm:$0xf]  ;;  %v6099_v13 = vld [vmem:[#allocation6 + $0x32c] sm:$0xf0] }
  0xa9   : > { %v4553_v30 = vor.u32 %v6052_v28, %v4552_v62 }
  0xab   : > { %1224 = vmatpush.bf16.msrb.mxu2 %v4553_v30  ;;  %1252 = vmatpush.bf16.msrb.mxu1 %v4557_v32  ;;  %v6083_v30 = vld [vmem:[#allocation6 + $0x2ac] sm:$0xf0] }
  0xac   : > { %1240 = vmatpush.bf16.msrb.mxu0 %v4397_v40 }
  0xaf   : > { %1225 = vmatpush.bf16.msrb.mxu2 %v4537_v41  ;;  %1253 = vmatpush.bf16.msrb.mxu1 %v4541_v45  ;;  %v6187_v41 = vld [vmem:[#allocation6 + $0x5ec] sm:$0xf0] }
  0xb0   : > { %1241 = vmatpush.bf16.msrb.mxu0 %v4381_v53  ;;  %v4522_v53 = vld [vmem:[#allocation6 + $0x178] sm:$0xf0] }
  0xb1   : > { %v4525_v55 = vor.u32 %v6042_v50, %v4522_v53  ;;  %v4800_v50 = vld [vmem:[#allocation6 + $0x3a0] sm:$0xf] }
  0xb2   : > { %v4784_v53 = vld [vmem:[#allocation6 + $0x380] sm:$0xf] }
  0xb3   : > { %1254 = vmatpush.bf16.msrb.mxu1 %v4525_v55  ;;  %v4785_v55 = vor.u32 %v6111_v54, %v4784_v53 }
  0xb4   : > { %1242 = vmatpush.bf16.msrb.mxu0 %v4365_v5  ;;  %v4490_v5 = vld [vmem:[#allocation6 + $0x138] sm:$0xf0] }
  0xb7   : > { %1255 = vmatpush.bf16.msrb.mxu1 %v4509_v1  ;;  %v6103_v1 = vld [vmem:[#allocation6 + $0x34c] sm:$0xf0] }
  0xb8   : > { %1243 = vmatpush.bf16.msrb.mxu0 %v4349_v21  ;;  %v4704_v21 = vld [vmem:[#allocation6 + $0x2e0] sm:$0xf] }
  0xb9   : > { %v4705_v23 = vor.u32 %v6091_v22, %v4704_v21  ;;  %v6151_v21 = vld [vmem:[#allocation6 + $0x4cc] sm:$0xf0] }
  0xdb   : > { %v649_v4 = vpop.f32.mrf.mxu0 }
  0xdc   : > { %v650_v8 = vadd.f32 %v649_v4, %v353_v52  ;;  %v663_v9 = vpop.f32.mrf.mxu1  ;;  %v6034_v4 = vld [vmem:[#allocation6 + $0x12c] sm:$0xf] }
  0xdd   : > { %v691_v20 = vpop.f32.mrf.mxu3 }
  0xde   : > { %v664_v27 = vadd.f32 %v663_v9, %v650_v8  ;;  %v4493_v8 = vor.u32 %v6034_v4, %v4490_v5  ;;  %v4472_v9 = vld [vmem:[#allocation6 + $0x108] sm:$0xf]  ;;  %v6183_v4 = vld [vmem:[#allocation6 + $0x5cc] sm:$0xf0]  ;;  %v4640_v5 = vld [vmem:[#allocation6 + $0x260] sm:$0xf] }
  0xdf   : > { %v4473_v15 = vor.u32 %v6032_v10, %v4472_v9  ;;  %v6155_v9 = vld [vmem:[#allocation6 + $0x4ec] sm:$0xf0] }
  0xe0   : > { %v677_v25 = vpop.f32.mrf.mxu2  ;;  %1256 = vmatpush.bf16.msrb.mxu1 %v4493_v8  ;;  %v4960_v8 = vld [vmem:[#allocation6 + $0x4e0] sm:$0xf] }
  0xe1   : > { %v678_v33 = vadd.f32 %v677_v25, %v664_v27  ;;  %v6087_v25 = vld [vmem:[#allocation6 + $0x2cc] sm:$0xf0]  ;;  %v4961_v10 = vor.u32 %v6155_v9, %v4960_v8 }
  0xe2   : > { %v4689_v62 = vor.u32 %v6087_v25, %v4688_v24  ;;  %v6095_v24 = vld [vmem:[#allocation6 + $0x30c] sm:$0xf0]  ;;  %v5040_v25 = vld [vmem:[#allocation6 + $0x580] sm:$0xf] }
  0xe3   : > { %v651_v31 = vpop.f32.mrf.mxu0  ;;  %v692_v46 = vadd.f32 %v691_v20, %v678_v33  ;;  %v6135_v8 = vld [vmem:[#allocation6 + $0x44c] sm:$0xf0] }
  0xe4   : > { %v652_v34 = vadd.f32 %v651_v31, %v353_v52  ;;  %v665_v35 = vpop.f32.mrf.mxu1  ;;  %v4521_v52 = vor.u32 %v6044_v49, %v4520_v48  ;;  %1257 = vmatpush.bf16.msrb.mxu1 %v4477_v16  ;;  %v6119_v48 = vld [vmem:[#allocation6 + $0x3cc] sm:$0xf0] }
  0xe5   : > { %v693_v43 = vpop.f32.mrf.mxu3  ;;  %v752_v59 = vmax.f32 %v692_v46, 0.0  ;;  %v6179_v16 = vld [vmem:[#allocation6 + $0x5ac] sm:$0xf0] }
  0xe6   : > { %v666_v40 = vadd.f32 %v665_v35, %v652_v34  ;;  %1226 = vmatpush.bf16.msrb.mxu2 %v4521_v52  ;;  %v4673_v34 = vor.u32 %v6083_v30, %v4672_v29 }
  0xe8   : > { %v679_v44 = vpop.f32.mrf.mxu2 }
  0xe9   : > { %v680_v47 = vadd.f32 %v679_v44, %v666_v40  ;;  %v5088_v40 = vld [vmem:[#allocation6 + $0x5e0] sm:$0xf]  ;;  %v4833_v44 = vor.u32 %v6123_v38, %v4832_v36 }
  0xea   : > { %1227 = vmatpush.bf16.msrb.mxu2 %v4505_v0  ;;  %v5089_v45 = vor.u32 %v6187_v41, %v5088_v40  ;;  %v4752_v0 = vld [vmem:[#allocation6 + $0x340] sm:$0xf]  ;;  %v6117_v40 = vld [vmem:[#allocation6 + $0x3c4] sm:$0xf]  ;;  %v4818_v41 = vld [vmem:[#allocation6 + $0x3d0] sm:$0xf0] }
  0xeb   : > { %v694_v51 = vadd.f32 %v693_v43, %v680_v47  ;;  %v4816_v47 = vld [vmem:[#allocation6 + $0x3c0] sm:$0xf]  ;;  %v4753_v3 = vor.u32 %v6103_v1, %v4752_v0 }
  0xec   : > { %v4817_v49 = vor.u32 %v6119_v48, %v4816_v47  ;;  %v5024_v36 = vld [vmem:[#allocation6 + $0x560] sm:$0xf]  ;;  %v6143_v47 = vld [vmem:[#allocation6 + $0x48c] sm:$0xf0]  ;;  %v6089_v48 = vld [vmem:[#allocation6 + $0x2e4] sm:$0xf] }
  0xed   : > { %v754_v60 = vmax.f32 %v694_v51, 0.0  ;;  %v6115_v51 = vld [vmem:[#allocation6 + $0x3ac] sm:$0xf0] }
  0xee   : > { %v705_v6 = vpop.f32.mrf.mxu3  ;;  %1228 = vmatpush.bf16.msrb.mxu2 %v4489_v7  ;;  %v4801_v52 = vor.u32 %v6115_v51, %v4800_v50  ;;  %v4706_v50 = vld [vmem:[#allocation6 + $0x2f0] sm:$0xf0]  ;;  %v5008_v51 = vld [vmem:[#allocation6 + $0x540] sm:$0xf] }
  0xef   : > { %v756_v63 = vpack.c.bf16 %v754_v60, %v752_v59  ;;  %v706_v14 = vadd.f32 %v705_v6, %v354_v61  ;;  %v4656_v59 = vld [vmem:[#allocation6 + $0x280] sm:$0xf]  ;;  %v6079_v60 = vld [vmem:[#allocation6 + $0x28c] sm:$0xf0]  ;;  %v4709_v53 = vor.u32 %v6089_v48, %v4706_v50  ;;  %v6069_v48 = vld [vmem:[#allocation6 + $0x244] sm:$0xf] }
  0xf0   : > { %v747_v19 = vpop.f32.mrf.mxu2  ;;  %v6075_v6 = vld [vmem:[#allocation6 + $0x26c] sm:$0xf0]  ;;  %v6149_v50 = vld [vmem:[#allocation6 + $0x4c4] sm:$0xf] }
  0xf1   : > { %1160 = vmatmul.bf16.vlgmr.msra.gmra.mxu3 %v756_v63  ;;  %1188 = vmatmul.bf16.vlgmr.msra.gmra.mxu0 %v756_v63  ;;  %v4641_v7 = vor.u32 %v6075_v6, %v4640_v5  ;;  %v6109_v5 = vld [vmem:[#allocation6 + $0x384] sm:$0xf]  ;;  %v4786_v6 = vld [vmem:[#allocation6 + $0x390] sm:$0xf0] }
  0xf2   : > { %1229 = vmatpush.bf16.msrb.mxu2 %v4473_v15  ;;  %2054 = vmatpush.bf16.msra.mxu3 %v4705_v23  ;;  %v4737_v15 = vor.u32 %v6099_v13, %v4736_v11  ;;  %v4720_v23 = vld [vmem:[#allocation6 + $0x300] sm:$0xf]  ;;  %v4674_v11 = vld [vmem:[#allocation6 + $0x2b0] sm:$0xf0] }
  0xf3   : > { %2082 = vmatpush.bf16.msra.mxu0 %v4961_v10  ;;  %v6081_v10 = vld [vmem:[#allocation6 + $0x2a4] sm:$0xf] }
  0xf4   : > { %v4677_v13 = vor.u32 %v6081_v10, %v4674_v11  ;;  %v4914_v10 = vld [vmem:[#allocation6 + $0x490] sm:$0xf0] }
  0xf6   : > { %v707_v39 = vpop.f32.mrf.mxu3  ;;  %2055 = vmatpush.bf16.msra.mxu3 %v4689_v62  ;;  %v6121_v62 = vld [vmem:[#allocation6 + $0x3e4] sm:$0xf] }
  0xf7   : > { %v708_v26 = vadd.f32 %v707_v39, %v354_v61  ;;  %v5073_v61 = vor.u32 %v6183_v4, %v5072_v2  ;;  %v4992_v2 = vld [vmem:[#allocation6 + $0x520] sm:$0xf] }
  0xf8   : > { %v719_v17 = vpop.f32.mrf.mxu0  ;;  %v749_v35 = vpop.f32.mrf.mxu2 }
  0xf9   : > { %v720_v20 = vadd.f32 %v719_v17, %v706_v14  ;;  %v5056_v14 = vld [vmem:[#allocation6 + $0x5a0] sm:$0xf] }
  0xfa   : > { %v733_v18 = vpop.f32.mrf.mxu1  ;;  %2056 = vmatpush.bf16.msra.mxu3 %v4673_v34  ;;  %v5057_v17 = vor.u32 %v6179_v16, %v5056_v14  ;;  %v6147_v34 = vld [vmem:[#allocation6 + $0x4ac] sm:$0xf0]  ;;  %v4976_v14 = vld [vmem:[#allocation6 + $0x500] sm:$0xf] }
  0xfb   : > { %v734_v27 = vadd.f32 %v733_v18, %v720_v20  ;;  %v4624_v18 = vld [vmem:[#allocation6 + $0x240] sm:$0xf] }
  0xfc   : > { %v4944_v20 = vld [vmem:[#allocation6 + $0x4c0] sm:$0xf] }
  0xfd   : > { %v748_v32 = vadd.f32 %v747_v19, %v734_v27  ;;  %v6071_v19 = vld [vmem:[#allocation6 + $0x24c] sm:$0xf0]  ;;  %v4945_v22 = vor.u32 %v6151_v21, %v4944_v20  ;;  %v4864_v21 = vld [vmem:[#allocation6 + $0x420] sm:$0xf] }
  0xfe   : > { %v4625_v39 = vor.u32 %v6071_v19, %v4624_v18  ;;  %v6175_v27 = vld [vmem:[#allocation6 + $0x58c] sm:$0xf0]  ;;  %v4770_v18 = vld [vmem:[#allocation6 + $0x370] sm:$0xf0]  ;;  %v6185_v19 = vld [vmem:[#allocation6 + $0x5e4] sm:$0xf] }
  0xff   : > { %v753_v42 = vmax.f32 %v748_v32, 0.0  ;;  %2083 = vmatpush.bf16.msra.mxu0 %v4945_v22  ;;  %v5041_v29 = vor.u32 %v6175_v27, %v5040_v25  ;;  %v4928_v32 = vld [vmem:[#allocation6 + $0x4a0] sm:$0xf]  ;;  %v6131_v22 = vld [vmem:[#allocation6 + $0x42c] sm:$0xf0] }
 0x100   : > { %v721_v28 = vpop.f32.mrf.mxu0  ;;  %v6077_v25 = vld [vmem:[#allocation6 + $0x284] sm:$0xf] }
 0x101   : > { %v722_v12 = vadd.f32 %v721_v28, %v708_v26  ;;  %1216 = vmatmul.bf16.vlgmr.msrb.gmra.mxu3 %v756_v63  ;;  %1244 = vmatmul.bf16.vlgmr.msrb.gmra.mxu0 %v756_v63  ;;  %v4657_v63 = vor.u32 %v6079_v60, %v4656_v59  ;;  %v4721_v26 = vor.u32 %v6095_v24, %v4720_v23  ;;  %v4834_v28 = vld [vmem:[#allocation6 + $0x3f0] sm:$0xf0]  ;;  %v6139_v59 = vld [vmem:[#allocation6 + $0x46c] sm:$0xf0]  ;;  %v6085_v60 = vld [vmem:[#allocation6 + $0x2c4] sm:$0xf] }
 0x102   : > { %v735_v31 = vpop.f32.mrf.mxu1  ;;  %v4837_v30 = vor.u32 %v6121_v62, %v4834_v28  ;;  %v4897_v0 = vor.u32 %v6139_v59, %v4896_v57  ;;  %v4865_v24 = vor.u32 %v6131_v22, %v4864_v21  ;;  %v6101_v62 = vld [vmem:[#allocation6 + $0x344] sm:$0xf]  ;;  %v4754_v28 = vld [vmem:[#allocation6 + $0x350] sm:$0xf0] }
 0x103   : > { %v736_v33 = vadd.f32 %v735_v31, %v722_v12  ;;  %2057 = vmatpush.bf16.msra.mxu3 %v4657_v63  ;;  %v4608_v12 = vld [vmem:[#allocation6 + $0x220] sm:$0xf]  ;;  %v6067_v31 = vld [vmem:[#allocation6 + $0x22c] sm:$0xf0]  ;;  %v4690_v63 = vld [vmem:[#allocation6 + $0x2d0] sm:$0xf0] }
 0x104   : > { %v4693_v1 = vor.u32 %v6085_v60, %v4690_v63  ;;  %v6065_v60 = vld [vmem:[#allocation6 + $0x224] sm:$0xf]  ;;  %v4610_v63 = vld [vmem:[#allocation6 + $0x230] sm:$0xf0] }
 0x105   : > { %v750_v37 = vadd.f32 %v749_v35, %v736_v33  ;;  %v4609_v33 = vor.u32 %v6067_v31, %v4608_v12  ;;  %v4929_v35 = vor.u32 %v6147_v34, %v4928_v32  ;;  %v5074_v12 = vld [vmem:[#allocation6 + $0x5d0] sm:$0xf0]  ;;  %v4848_v31 = vld [vmem:[#allocation6 + $0x400] sm:$0xf]  ;;  %v6127_v32 = vld [vmem:[#allocation6 + $0x40c] sm:$0xf0] }
 0x106   : > { %v4849_v34 = vor.u32 %v6127_v32, %v4848_v31  ;;  %v6133_v22 = vld [vmem:[#allocation6 + $0x444] sm:$0xf] }
 0x107   : > { %v755_v43 = vmax.f32 %v750_v37, 0.0  ;;  %2058 = vmatpush.bf16.msra.mxu3 %v4641_v7  ;;  %v6171_v37 = vld [vmem:[#allocation6 + $0x56c] sm:$0xf0]  ;;  %2084 = vmatpush.bf16.msra.mxu0 %v4929_v35  ;;  %v4880_v7 = vld [vmem:[#allocation6 + $0x440] sm:$0xf] }
 0x108   : > { %v5025_v38 = vor.u32 %v6171_v37, %v5024_v36  ;;  %v4881_v9 = vor.u32 %v6135_v8, %v4880_v7  ;;  %v6073_v35 = vld [vmem:[#allocation6 + $0x264] sm:$0xf]  ;;  %v4642_v36 = vld [vmem:[#allocation6 + $0x270] sm:$0xf0] }
 0x109   : > { %v757_v46 = vpack.c.bf16 %v755_v43, %v753_v42  ;;  %v4821_v42 = vor.u32 %v6117_v40, %v4818_v41  ;;  %v4592_v43 = vld [vmem:[#allocation6 + $0x200] sm:$0xf]  ;;  %v6153_v37 = vld [vmem:[#allocation6 + $0x4e4] sm:$0xf]  ;;  %v4962_v40 = vld [vmem:[#allocation6 + $0x4f0] sm:$0xf0] }
 0x10a   : > { %v4965_v41 = vor.u32 %v6153_v37, %v4962_v40  ;;  %v4594_v7 = vld [vmem:[#allocation6 + $0x210] sm:$0xf0]  ;;  %v6141_v8 = vld [vmem:[#allocation6 + $0x484] sm:$0xf] }
 0x10b   : > { %1174 = vmatmul.bf16.vlgmr.msra.gmra.mxu2 %v757_v46  ;;  %1202 = vmatmul.bf16.vlgmr.msra.gmra.mxu1 %v757_v46  ;;  %v4917_v11 = vor.u32 %v6141_v8, %v4914_v10  ;;  %v6088_v10 = vld [vmem:[#allocation6 + $0x2d4] sm:$0xf0] }
 0x10c   : > { %2068 = vmatpush.bf16.msra.mxu2 %v4833_v44  ;;  %2096 = vmatpush.bf16.msra.mxu1 %v5089_v45  ;;  %v6063_v44 = vld [vmem:[#allocation6 + $0x20c] sm:$0xf0] }
 0x10d   : > { %2059 = vmatpush.bf16.msra.mxu3 %v4625_v39  ;;  %v4593_v45 = vor.u32 %v6063_v44, %v4592_v43  ;;  %v5090_v39 = vld [vmem:[#allocation6 + $0x5f0] sm:$0xf0]  ;;  %v6177_v44 = vld [vmem:[#allocation6 + $0x5a4] sm:$0xf] }
 0x10e   : > { %v5093_v23 = vor.u32 %v6185_v19, %v5090_v39  ;;  %v4738_v43 = vld [vmem:[#allocation6 + $0x330] sm:$0xf0] }
 0x10f   : > { %v4994_v39 = vld [vmem:[#allocation6 + $0x530] sm:$0xf0] }
 0x110   : > { %2069 = vmatpush.bf16.msra.mxu2 %v4817_v49  ;;  %2097 = vmatpush.bf16.msra.mxu1 %v5073_v61  ;;  %v4789_v61 = vor.u32 %v6109_v5, %v4786_v6  ;;  %v5026_v5 = vld [vmem:[#allocation6 + $0x570] sm:$0xf0] }
 0x111   : > { %2060 = vmatpush.bf16.msra.mxu3 %v4609_v33 }
 0x114   : > { %2070 = vmatpush.bf16.msra.mxu2 %v4801_v52  ;;  %2098 = vmatpush.bf16.msra.mxu1 %v5057_v17  ;;  %v6167_v52 = vld [vmem:[#allocation6 + $0x54c] sm:$0xf0]  ;;  %v6105_v17 = vld [vmem:[#allocation6 + $0x364] sm:$0xf] }
 0x115   : > { %2061 = vmatpush.bf16.msra.mxu3 %v4593_v45  ;;  %v5009_v54 = vor.u32 %v6167_v52, %v5008_v51  ;;  %v4773_v20 = vor.u32 %v6105_v17, %v4770_v18  ;;  %v4946_v52 = vld [vmem:[#allocation6 + $0x4d0] sm:$0xf0]  ;;  %v6137_v17 = vld [vmem:[#allocation6 + $0x464] sm:$0xf] }
 0x116   : > { %v4898_v18 = vld [vmem:[#allocation6 + $0x470] sm:$0xf0] }
 0x117   : > { %v4901_v19 = vor.u32 %v6137_v17, %v4898_v18 }
 0x118   : > { %2071 = vmatpush.bf16.msra.mxu2 %v4785_v55  ;;  %2099 = vmatpush.bf16.msra.mxu1 %v5041_v29  ;;  %v6113_v55 = vld [vmem:[#allocation6 + $0x3a4] sm:$0xf] }
 0x119   : > { %2110 = vmatpush.bf16.msrb.mxu3 %v4709_v53  ;;  %v6181_v29 = vld [vmem:[#allocation6 + $0x5c4] sm:$0xf]  ;;  %v4949_v53 = vor.u32 %v6149_v50, %v4946_v52 }
 0x11a   : > { %v5077_v33 = vor.u32 %v6181_v29, %v5074_v12  ;;  %v6129_v29 = vld [vmem:[#allocation6 + $0x424] sm:$0xf] }
 0x11b   : > { %1230 = vmatmul.bf16.vlgmr.msrb.gmra.mxu2 %v757_v46  ;;  %1258 = vmatmul.bf16.vlgmr.msrb.gmra.mxu1 %v757_v46  ;;  %v4912_v46 = vld [vmem:[#allocation6 + $0x480] sm:$0xf] }
 0x11c   : > { %2072 = vmatpush.bf16.msra.mxu2 %v4769_v58  ;;  %2100 = vmatpush.bf16.msra.mxu1 %v5025_v38  ;;  %v4913_v49 = vor.u32 %v6143_v47, %v4912_v46  ;;  %v4805_v58 = vor.u32 %v6113_v55, %v4802_v56  ;;  %v4645_v38 = vor.u32 %v6073_v35, %v4642_v36  ;;  %v5058_v46 = vld [vmem:[#allocation6 + $0x5b0] sm:$0xf0]  ;;  %v6173_v56 = vld [vmem:[#allocation6 + $0x584] sm:$0xf] }
 0x11d   : > { %2111 = vmatpush.bf16.msrb.mxu3 %v4693_v1  ;;  %v5061_v47 = vor.u32 %v6177_v44, %v5058_v46  ;;  %v4722_v55 = vld [vmem:[#allocation6 + $0x310] sm:$0xf0]  ;;  %v4613_v1 = vor.u32 %v6065_v60, %v4610_v63  ;;  %v4840_v46 = vld [vmem:[#allocation6 + $0x3e8] sm:$0xf]  ;;  %v6092_v63 = vld [vmem:[#allocation6 + $0x2f4] sm:$0xf0] }
 0x11e   : > { %2085 = vmatpush.bf16.msra.mxu0 %v4913_v49  ;;  %v4626_v49 = vld [vmem:[#allocation6 + $0x250] sm:$0xf0]  ;;  %v4712_v60 = vld [vmem:[#allocation6 + $0x2e8] sm:$0xf] }
 0x11f   : > { %v4629_v51 = vor.u32 %v6069_v48, %v4626_v49  ;;  %v4850_v35 = vld [vmem:[#allocation6 + $0x410] sm:$0xf0] }
 0x120   : > { %2073 = vmatpush.bf16.msra.mxu2 %v4753_v3  ;;  %2101 = vmatpush.bf16.msra.mxu1 %v5009_v54  ;;  %v6163_v3 = vld [vmem:[#allocation6 + $0x52c] sm:$0xf0]  ;;  %v6093_v54 = vld [vmem:[#allocation6 + $0x304] sm:$0xf] }
 0x121   : > { %v4993_v4 = vor.u32 %v6163_v3, %v4992_v2  ;;  %2112 = vmatpush.bf16.msrb.mxu3 %v4677_v13  ;;  %v4725_v57 = vor.u32 %v6093_v54, %v4722_v55  ;;  %v4930_v2 = vld [vmem:[#allocation6 + $0x4b0] sm:$0xf0]  ;;  %v6165_v13 = vld [vmem:[#allocation6 + $0x544] sm:$0xf] }
 0x122   : > { %2086 = vmatpush.bf16.msra.mxu0 %v4897_v0  ;;  %v6145_v0 = vld [vmem:[#allocation6 + $0x4a4] sm:$0xf] }
 0x123   : > { %v4933_v3 = vor.u32 %v6145_v0, %v4930_v2 }
 0x124   : > { %2074 = vmatpush.bf16.msra.mxu2 %v4737_v15  ;;  %2102 = vmatpush.bf16.msra.mxu1 %v4993_v4  ;;  %v6159_v15 = vld [vmem:[#allocation6 + $0x50c] sm:$0xf0]  ;;  %v6169_v4 = vld [vmem:[#allocation6 + $0x564] sm:$0xf] }
 0x125   : > { %v4977_v16 = vor.u32 %v6159_v15, %v4976_v14  ;;  %v5029_v6 = vor.u32 %v6169_v4, %v5026_v5  ;;  %v5010_v14 = vld [vmem:[#allocation6 + $0x550] sm:$0xf0] }
 0x126   : > { %2087 = vmatpush.bf16.msra.mxu0 %v4881_v9  ;;  %v5013_v15 = vor.u32 %v6165_v13, %v5010_v14 }
 0x128   : > { %2075 = vmatpush.bf16.msra.mxu2 %v4721_v26  ;;  %v4658_v26 = vld [vmem:[#allocation6 + $0x290] sm:$0xf0]  ;;  %2103 = vmatpush.bf16.msra.mxu1 %v4977_v16 }
 0x129   : > { %v4661_v27 = vor.u32 %v6077_v25, %v4658_v26  ;;  %v6157_v26 = vld [vmem:[#allocation6 + $0x504] sm:$0xf] }
 0x12a   : > { %2088 = vmatpush.bf16.msra.mxu0 %v4865_v24 }
 0x12b   : > { %2113 = vmatpush.bf16.msrb.mxu3 %v4661_v27  ;;  %v4978_v27 = vld [vmem:[#allocation6 + $0x510] sm:$0xf0] }
 0x12c   : > { %2124 = vmatpush.bf16.msrb.mxu2 %v4837_v30  ;;  %2152 = vmatpush.bf16.msrb.mxu1 %v5093_v23  ;;  %v4757_v30 = vor.u32 %v6101_v62, %v4754_v28  ;;  %v4882_v23 = vld [vmem:[#allocation6 + $0x450] sm:$0xf0]  ;;  %v4981_v62 = vor.u32 %v6157_v26, %v4978_v27  ;;  %v6884_v28 = vld [vmem:[#allocation9 + $0x2] sm:$0xf]  ;;  %v6108_v27 = vld [vmem:[#allocation6 + $0x374] sm:$0xf0] }
 0x12d   : > { %v4885_v24 = vor.u32 %v6133_v22, %v4882_v23  ;;  %v827_v0 = vperm.slane %v6884_v28, 3  ;;  %v6084_v22 = vld [vmem:[#allocation6 + $0x2b4] sm:$0xf0] }
 0x12e   : > { %2089 = vmatpush.bf16.msra.mxu0 %v4849_v34  ;;  %v6125_v34 = vld [vmem:[#allocation6 + $0x404] sm:$0xf] }
 0x12f   : > { %2114 = vmatpush.bf16.msrb.mxu3 %v4645_v38  ;;  %v4853_v36 = vor.u32 %v6125_v34, %v4850_v35  ;;  %v4664_v34 = vld [vmem:[#allocation6 + $0x288] sm:$0xf] }
 0x130   : > { %2125 = vmatpush.bf16.msrb.mxu2 %v4821_v42  ;;  %2153 = vmatpush.bf16.msrb.mxu1 %v5077_v33  ;;  %v6097_v42 = vld [vmem:[#allocation6 + $0x324] sm:$0xf]  ;;  %v825_v33 = vperm.slane %v6884_v28, 1 }
 0x131   : > { %v4741_v45 = vor.u32 %v6097_v42, %v4738_v43 }
 0x132   : > { %2138 = vmatpush.bf16.msrb.mxu0 %v4965_v41  ;;  %v824_v41 = vperm.slane %v6884_v28, 0 }
 0x133   : > { %2115 = vmatpush.bf16.msrb.mxu3 %v4629_v51 }
 0x134   : > { %2126 = vmatpush.bf16.msrb.mxu2 %v4805_v58  ;;  %2154 = vmatpush.bf16.msrb.mxu1 %v5061_v47  ;;  %v5042_v58 = vld [vmem:[#allocation6 + $0x590] sm:$0xf0]  ;;  %v6124_v47 = vld [vmem:[#allocation6 + $0x3f4] sm:$0xf0] }
 0x135   : > { %v5045_v59 = vor.u32 %v6173_v56, %v5042_v58  ;;  %v4841_v52 = vor.u32 %v6124_v47, %v4840_v46  ;;  %v4824_v56 = vld [vmem:[#allocation6 + $0x3c8] sm:$0xf] }
 0x136   : > { %2139 = vmatpush.bf16.msrb.mxu0 %v4949_v53  ;;  %v4648_v47 = vld [vmem:[#allocation6 + $0x268] sm:$0xf] }
 0x137   : > { %2116 = vmatpush.bf16.msrb.mxu3 %v4613_v1 }
 0x138   : > { %2127 = vmatpush.bf16.msrb.mxu2 %v4789_v61  ;;  %2155 = vmatpush.bf16.msrb.mxu1 %v5045_v59  ;;  %v6061_v61 = vld [vmem:[#allocation6 + $0x204] sm:$0xf] }
 0x139   : > { %v4597_v9 = vor.u32 %v6061_v61, %v4594_v7  ;;  %v6116_v61 = vld [vmem:[#allocation6 + $0x3b4] sm:$0xf0]  ;;  %v4713_v7 = vor.u32 %v6092_v63, %v4712_v60 }
 0x13a   : > { %2140 = vmatpush.bf16.msrb.mxu0 %v4933_v3  ;;  %v6180_v60 = vld [vmem:[#allocation6 + $0x5b4] sm:$0xf0] }
 0x13b   : > { %2117 = vmatpush.bf16.msrb.mxu3 %v4597_v9  ;;  %v4696_v9 = vld [vmem:[#allocation6 + $0x2c8] sm:$0xf] }
 0x13c   : > { %2128 = vmatpush.bf16.msrb.mxu2 %v4773_v20  ;;  %2156 = vmatpush.bf16.msrb.mxu1 %v5029_v6  ;;  %v6161_v20 = vld [vmem:[#allocation6 + $0x524] sm:$0xf]  ;;  %v4808_v6 = vld [vmem:[#allocation6 + $0x3a8] sm:$0xf]  ;;  %v4697_v18 = vor.u32 %v6088_v10, %v4696_v9  ;;  %v6096_v9 = vld [vmem:[#allocation6 + $0x314] sm:$0xf0] }
 0x13d   : > { %v4997_v21 = vor.u32 %v6161_v20, %v4994_v39  ;;  %v4809_v13 = vor.u32 %v6116_v61, %v4808_v6  ;;  %v5048_v10 = vld [vmem:[#allocation6 + $0x588] sm:$0xf] }
 0x13e   : > { %2141 = vmatpush.bf16.msrb.mxu0 %v4917_v11 }
 0x140   : > { %2129 = vmatpush.bf16.msrb.mxu2 %v4757_v30  ;;  %2157 = vmatpush.bf16.msrb.mxu1 %v5013_v15  ;;  %v4866_v30 = vld [vmem:[#allocation6 + $0x430] sm:$0xf0]  ;;  %v4792_v15 = vld [vmem:[#allocation6 + $0x388] sm:$0xf] }
 0x141   : > { %v4869_v12 = vor.u32 %v6129_v29, %v4866_v30  ;;  %v6188_v29 = vld [vmem:[#allocation6 + $0x5f4] sm:$0xf0] }
 0x142   : > { %2142 = vmatpush.bf16.msrb.mxu0 %v4901_v19  ;;  %v826_v19 = vperm.slane %v6884_v28, 2  ;;  %v6080_v28 = vld [vmem:[#allocation6 + $0x294] sm:$0xf0] }
 0x143   : > { %v4665_v46 = vor.u32 %v6080_v28, %v4664_v34  ;;  %v4714_v34 = vld [vmem:[#allocation6 + $0x2f8] sm:$0xf0] }
 0x144   : > { %2130 = vmatpush.bf16.msrb.mxu2 %v4741_v45  ;;  %2158 = vmatpush.bf16.msrb.mxu1 %v4997_v21  ;;  %v4680_v21 = vld [vmem:[#allocation6 + $0x2a8] sm:$0xf] }
 0x146   : > { %2143 = vmatpush.bf16.msrb.mxu0 %v4885_v24 }
 0x148   : > { %2131 = vmatpush.bf16.msrb.mxu2 %v4725_v57  ;;  %2159 = vmatpush.bf16.msrb.mxu1 %v4981_v62  ;;  %v6120_v57 = vld [vmem:[#allocation6 + $0x3d4] sm:$0xf0]  ;;  %v5096_v62 = vld [vmem:[#allocation6 + $0x5e8] sm:$0xf] }
 0x149   : > { %v4825_v3 = vor.u32 %v6120_v57, %v4824_v56  ;;  %v6100_v56 = vld [vmem:[#allocation6 + $0x334] sm:$0xf0] }
 0x14a   : > { %2144 = vmatpush.bf16.msrb.mxu0 %v4869_v12  ;;  %v4681_v12 = vor.u32 %v6084_v22, %v4680_v21 }
 0x14e   : > { %2145 = vmatpush.bf16.msrb.mxu0 %v4853_v36  ;;  %v5097_v36 = vor.u32 %v6188_v29, %v5096_v62  ;;  %v4826_v62 = vld [vmem:[#allocation6 + $0x3d8] sm:$0xf0]  ;;  %v4600_v29 = vld [vmem:[#allocation6 + $0x208] sm:$0xf] }
 0x16e   : > { %v1189_v16 = vpop.f32.mrf.mxu0 }
 0x16f   : > { %v1190_v37 = vadd.f32 %v1189_v16, %v825_v33  ;;  %v6112_v16 = vld [vmem:[#allocation6 + $0x394] sm:$0xf0] }
 0x170   : > { %v4793_v24 = vor.u32 %v6112_v16, %v4792_v15  ;;  %v6122_v15 = vld [vmem:[#allocation6 + $0x3ec] sm:$0xf]  ;;  %v4842_v16 = vld [vmem:[#allocation6 + $0x3f8] sm:$0xf0] }
 0x171   : > { %v4845_v22 = vor.u32 %v6122_v15, %v4842_v16  ;;  %v4666_v15 = vld [vmem:[#allocation6 + $0x298] sm:$0xf0] }
 0x174   : > { %v1161_v25 = vpop.f32.mrf.mxu3 }
 0x175   : > { %v1162_v49 = vadd.f32 %v1161_v25, %v824_v41  ;;  %v4776_v25 = vld [vmem:[#allocation6 + $0x368] sm:$0xf] }
 0x176   : > { %v1191_v31 = vpop.f32.mrf.mxu0  ;;  %v4777_v35 = vor.u32 %v6108_v27, %v4776_v25  ;;  %v6118_v27 = vld [vmem:[#allocation6 + $0x3cc] sm:$0xf] }
 0x177   : > { %v1192_v42 = vadd.f32 %v1191_v31, %v825_v33  ;;  %v4829_v28 = vor.u32 %v6118_v27, %v4826_v62  ;;  %v6154_v27 = vld [vmem:[#allocation6 + $0x4ec] sm:$0xf]  ;;  %v4970_v62 = vld [vmem:[#allocation6 + $0x4f8] sm:$0xf0] }
 0x17c   : > { %v1163_v38 = vpop.f32.mrf.mxu3 }
 0x17d   : > { %v1164_v53 = vadd.f32 %v1163_v38, %v824_v41 }
 0x17e   : > { %v1245_v48 = vpop.f32.mrf.mxu0 }
 0x17f   : > { %v1246_v14 = vadd.f32 %v1245_v48, %v827_v0 }
 0x184   : > { %v1217_v1 = vpop.f32.mrf.mxu3 }
 0x185   : > { %v1218_v31 = vadd.f32 %v1217_v1, %v826_v19  ;;  %v4632_v1 = vld [vmem:[#allocation6 + $0x248] sm:$0xf] }
 0x186   : > { %v1247_v11 = vpop.f32.mrf.mxu0 }
 0x187   : > { %v1248_v20 = vadd.f32 %v1247_v11, %v827_v0  ;;  %v6176_v11 = vld [vmem:[#allocation6 + $0x594] sm:$0xf0] }
 0x188   : > { %v1203_v32 = vpop.f32.mrf.mxu1  ;;  %v5049_v21 = vor.u32 %v6176_v11, %v5048_v10  ;;  %v4872_v10 = vld [vmem:[#allocation6 + $0x428] sm:$0xf]  ;;  %v6132_v11 = vld [vmem:[#allocation6 + $0x434] sm:$0xf0] }
 0x189   : > { %v1204_v43 = vadd.f32 %v1203_v32, %v1190_v37  ;;  %v4760_v37 = vld [vmem:[#allocation6 + $0x348] sm:$0xf] }
 0x18b   : > { %v1265_v50 = vmax.f32 %v1204_v43, 0.0  ;;  %v5080_v43 = vld [vmem:[#allocation6 + $0x5c8] sm:$0xf] }
 0x18c   : > { %v1219_v30 = vpop.f32.mrf.mxu3 }
 0x18d   : > { %v1220_v38 = vadd.f32 %v1219_v30, %v826_v19  ;;  %v4936_v19 = vld [vmem:[#allocation6 + $0x4a8] sm:$0xf]  ;;  %v6064_v30 = vld [vmem:[#allocation6 + $0x214] sm:$0xf0] }
 0x18e   : > { %v1175_v40 = vpop.f32.mrf.mxu2 }
 0x18f   : > { %v1176_v54 = vadd.f32 %v1175_v40, %v1162_v49  ;;  %v6076_v49 = vld [vmem:[#allocation6 + $0x274] sm:$0xf0] }
 0x190   : > { %v1205_v44 = vpop.f32.mrf.mxu1  ;;  %v4649_v63 = vor.u32 %v6076_v49, %v4648_v47  ;;  %v6086_v47 = vld [vmem:[#allocation6 + $0x2cc] sm:$0xf] }
 0x191   : > { %v1206_v45 = vadd.f32 %v1205_v44, %v1192_v42  ;;  %v1264_v4 = vmax.f32 %v1176_v54, 0.0  ;;  %v6104_v42 = vld [vmem:[#allocation6 + $0x354] sm:$0xf0]  ;;  %v4744_v54 = vld [vmem:[#allocation6 + $0x328] sm:$0xf] }
 0x192   : > { %v6184_v44 = vld [vmem:[#allocation6 + $0x5d4] sm:$0xf0]  ;;  %v4745_v6 = vor.u32 %v6100_v56, %v4744_v54  ;;  %v4794_v54 = vld [vmem:[#allocation6 + $0x398] sm:$0xf0] }
 0x193   : > { %v1269_v51 = vmax.f32 %v1206_v45, 0.0 }
 0x195   : > { %v6888_v55 = vpack.c.bf16 %v1269_v51, %v1265_v50  ;;  %v4968_v50 = vld [vmem:[#allocation6 + $0x4e8] sm:$0xf]  ;;  %v6156_v51 = vld [vmem:[#allocation6 + $0x4f4] sm:$0xf0] }
 0x196   : > { %v1177_v58 = vpop.f32.mrf.mxu2  ;;  %v4969_v0 = vor.u32 %v6156_v51, %v4968_v50  ;;  %v5000_v50 = vld [vmem:[#allocation6 + $0x528] sm:$0xf]  ;;  %v6164_v51 = vld [vmem:[#allocation6 + $0x534] sm:$0xf0] }
 0x197   : > { %v1178_v59 = vadd.f32 %v1177_v58, %v1164_v53  ;;  %2076 = vmatmul.bf16.vlgmr.msra.gmra.mxu2 %v6888_v55  ;;  %v5081_v53 = vor.u32 %v6184_v44, %v5080_v43  ;;  %v4904_v44 = vld [vmem:[#allocation6 + $0x468] sm:$0xf] }
 0x198   : > { %2180 = vmatpush.bf16.msra.mxu2 %v4841_v52  ;;  %v1259_v2 = vpop.f32.mrf.mxu1  ;;  %v4761_v52 = vor.u32 %v6104_v42, %v4760_v37  ;;  %v4601_v37 = vor.u32 %v6064_v30, %v4600_v29  ;;  %v4810_v42 = vld [vmem:[#allocation6 + $0x3b8] sm:$0xf0] }
 0x199   : > { %v1268_v5 = vmax.f32 %v1178_v59, 0.0  ;;  %v1260_v39 = vadd.f32 %v1259_v2, %v1246_v14  ;;  %v5064_v59 = vld [vmem:[#allocation6 + $0x5a8] sm:$0xf] }
 0x19a   : > { %v5065_v61 = vor.u32 %v6180_v60, %v5064_v59  ;;  %v5001_v59 = vor.u32 %v6164_v51, %v5000_v50  ;;  %v6082_v60 = vld [vmem:[#allocation6 + $0x2ac] sm:$0xf]  ;;  %v4618_v51 = vld [vmem:[#allocation6 + $0x238] sm:$0xf0] }
 0x19b   : > { %v6892_v8 = vpack.c.bf16 %v1268_v5, %v1264_v4  ;;  %v1267_v32 = vmax.f32 %v1260_v39, 0.0  ;;  %v4952_v4 = vld [vmem:[#allocation6 + $0x4c8] sm:$0xf]  ;;  %v6152_v5 = vld [vmem:[#allocation6 + $0x4d4] sm:$0xf0] }
 0x19c   : > { %2181 = vmatpush.bf16.msra.mxu2 %v4825_v3  ;;  %v6072_v3 = vld [vmem:[#allocation6 + $0x254] sm:$0xf0]  ;;  %v4953_v14 = vor.u32 %v6152_v5, %v4952_v4  ;;  %v6106_v4 = vld [vmem:[#allocation6 + $0x36c] sm:$0xf] }
 0x19d   : > { %2062 = vmatmul.bf16.vlgmr.msra.gmra.mxu3 %v6892_v8  ;;  %v6066_v50 = vld [vmem:[#allocation6 + $0x22c] sm:$0xf] }
 0x19e   : > { %2166 = vmatpush.bf16.msra.mxu3 %v4713_v7  ;;  %v1231_v17 = vpop.f32.mrf.mxu2  ;;  %v4728_v7 = vld [vmem:[#allocation6 + $0x308] sm:$0xf] }
 0x19f   : > { %v1232_v40 = vadd.f32 %v1231_v17, %v1218_v31  ;;  %v4616_v17 = vld [vmem:[#allocation6 + $0x228] sm:$0xf]  ;;  %v4729_v39 = vor.u32 %v6096_v9, %v4728_v7  ;;  %v6144_v31 = vld [vmem:[#allocation6 + $0x494] sm:$0xf0]  ;;  %v5098_v7 = vld [vmem:[#allocation6 + $0x5f8] sm:$0xf0] }
 0x1a0   : > { %2182 = vmatpush.bf16.msra.mxu2 %v4809_v13  ;;  %v1261_v23 = vpop.f32.mrf.mxu1  ;;  %v4633_v13 = vor.u32 %v6072_v3, %v4632_v1  ;;  %v4984_v1 = vld [vmem:[#allocation6 + $0x508] sm:$0xf]  ;;  %v6160_v3 = vld [vmem:[#allocation6 + $0x514] sm:$0xf0] }
 0x1a1   : > { %v1262_v26 = vadd.f32 %v1261_v23, %v1248_v20  ;;  %v1266_v57 = vmax.f32 %v1232_v40, 0.0  ;;  %v6148_v20 = vld [vmem:[#allocation6 + $0x4b4] sm:$0xf0]  ;;  %v5032_v23 = vld [vmem:[#allocation6 + $0x568] sm:$0xf] }
 0x1a2   : > { %2167 = vmatpush.bf16.msra.mxu3 %v4697_v18  ;;  %v6068_v18 = vld [vmem:[#allocation6 + $0x234] sm:$0xf0]  ;;  %v6114_v40 = vld [vmem:[#allocation6 + $0x3ac] sm:$0xf] }
 0x1a3   : > { %v1271_v33 = vmax.f32 %v1262_v26, 0.0  ;;  %v4617_v25 = vor.u32 %v6068_v18, %v4616_v17  ;;  %v4937_v26 = vor.u32 %v6148_v20, %v4936_v19  ;;  %v4813_v49 = vor.u32 %v6114_v40, %v4810_v42  ;;  %v6102_v18 = vld [vmem:[#allocation6 + $0x34c] sm:$0xf]  ;;  %v4762_v20 = vld [vmem:[#allocation6 + $0x358] sm:$0xf0] }
 0x1a4   : > { %2183 = vmatpush.bf16.msra.mxu2 %v4793_v24  ;;  %v6172_v24 = vld [vmem:[#allocation6 + $0x574] sm:$0xf0]  ;;  %v4873_v19 = vor.u32 %v6132_v11, %v4872_v10  ;;  %v4765_v29 = vor.u32 %v6102_v18, %v4762_v20  ;;  %v4954_v40 = vld [vmem:[#allocation6 + $0x4d8] sm:$0xf0]  ;;  %v5216_v10 = vld [vmem:[#allocation6 + $0x6e0] sm:$0xf] }
 0x1a5   : > { %v6896_v41 = vpack.c.bf16 %v1271_v33, %v1267_v32  ;;  %v5033_v32 = vor.u32 %v6172_v24, %v5032_v23  ;;  %v6090_v33 = vld [vmem:[#allocation6 + $0x2ec] sm:$0xf]  ;;  %v4856_v23 = vld [vmem:[#allocation6 + $0x408] sm:$0xf]  ;;  %v6128_v24 = vld [vmem:[#allocation6 + $0x414] sm:$0xf0] }
 0x1a6   : > { %2168 = vmatpush.bf16.msra.mxu3 %v4681_v12  ;;  %v1233_v45 = vpop.f32.mrf.mxu2  ;;  %v4920_v12 = vld [vmem:[#allocation6 + $0x488] sm:$0xf]  ;;  %v4717_v43 = vor.u32 %v6090_v33, %v4714_v34  ;;  %v6178_v33 = vld [vmem:[#allocation6 + $0x5ac] sm:$0xf]  ;;  %v5066_v34 = vld [vmem:[#allocation6 + $0x5b8] sm:$0xf0] }
 0x1a7   : > { %v1234_v48 = vadd.f32 %v1233_v45, %v1220_v38  ;;  %2104 = vmatmul.bf16.vlgmr.msra.gmra.mxu1 %v6896_v41  ;;  %2132 = vmatmul.bf16.vlgmr.msrb.gmra.mxu2 %v6888_v55  ;;  %v4921_v38 = vor.u32 %v6144_v31, %v4920_v12  ;;  %v6140_v45 = vld [vmem:[#allocation6 + $0x474] sm:$0xf0]  ;;  %v6098_v12 = vld [vmem:[#allocation6 + $0x32c] sm:$0xf]  ;;  %v4857_v31 = vor.u32 %v6128_v24, %v4856_v23  ;;  %v6219_v11 = vld [vmem:[#allocation6 + $0x6ec] sm:$0xf0] }
 0x1a8   : > { %2184 = vmatpush.bf16.msra.mxu2 %v4777_v35  ;;  %2208 = vmatpush.bf16.msra.mxu1 %v5097_v36  ;;  %v5016_v35 = vld [vmem:[#allocation6 + $0x548] sm:$0xf]  ;;  %v6168_v36 = vld [vmem:[#allocation6 + $0x554] sm:$0xf0]  ;;  %v5312_v18 = vld [vmem:[#allocation6 + $0x7a0] sm:$0xf] }
 0x1a9   : > { %v1270_v58 = vmax.f32 %v1234_v48, 0.0  ;;  %v4698_v48 = vld [vmem:[#allocation6 + $0x2d8] sm:$0xf0]  ;;  %v6138_v20 = vld [vmem:[#allocation6 + $0x46c] sm:$0xf] }
 0x1aa   : > { %2169 = vmatpush.bf16.msra.mxu3 %v4665_v46  ;;  %v5017_v46 = vor.u32 %v6168_v36, %v5016_v35  ;;  %v4701_v56 = vor.u32 %v6086_v47, %v4698_v48  ;;  %v4973_v35 = vor.u32 %v6154_v27, %v4970_v62  ;;  %v6070_v36 = vld [vmem:[#allocation6 + $0x24c] sm:$0xf]  ;;  %v5050_v47 = vld [vmem:[#allocation6 + $0x598] sm:$0xf0]  ;;  %v5200_v23 = vld [vmem:[#allocation6 + $0x6c0] sm:$0xf] }
 0x1ab   : > { %v6900_v2 = vpack.c.bf16 %v1270_v58, %v1266_v57  ;;  %v4888_v57 = vld [vmem:[#allocation6 + $0x448] sm:$0xf]  ;;  %v6136_v58 = vld [vmem:[#allocation6 + $0x454] sm:$0xf0]  ;;  %v6215_v24 = vld [vmem:[#allocation6 + $0x6cc] sm:$0xf0] }
 0x1ac   : > { %2185 = vmatpush.bf16.msra.mxu2 %v4761_v52  ;;  %2209 = vmatpush.bf16.msra.mxu1 %v5081_v53  ;;  %v4905_v52 = vor.u32 %v6140_v45, %v4904_v44  ;;  %v6110_v53 = vld [vmem:[#allocation6 + $0x38c] sm:$0xf]  ;;  %v4889_v5 = vor.u32 %v6136_v58, %v4888_v57  ;;  %v4730_v45 = vld [vmem:[#allocation6 + $0x318] sm:$0xf0]  ;;  %v5344_v57 = vld [vmem:[#allocation6 + $0x7e0] sm:$0xf] }
 0x1ad   : > { %2090 = vmatmul.bf16.vlgmr.msra.gmra.mxu0 %v6900_v2  ;;  %2118 = vmatmul.bf16.vlgmr.msrb.gmra.mxu3 %v6892_v8  ;;  %v6094_v44 = vld [vmem:[#allocation6 + $0x30c] sm:$0xf]  ;;  %v6251_v58 = vld [vmem:[#allocation6 + $0x7ec] sm:$0xf0] }
 0x1ae   : > { %2170 = vmatpush.bf16.msra.mxu3 %v4649_v63  ;;  %2194 = vmatpush.bf16.msra.mxu0 %v4969_v0  ;;  %v4682_v63 = vld [vmem:[#allocation6 + $0x2b8] sm:$0xf0]  ;;  %v4797_v0 = vor.u32 %v6110_v53, %v4794_v54  ;;  %v4733_v54 = vor.u32 %v6094_v44, %v4730_v45  ;;  %v6126_v44 = vld [vmem:[#allocation6 + $0x40c] sm:$0xf] }
 0x1af   : > { %v4685_v9 = vor.u32 %v6082_v60, %v4682_v63  ;;  %v4938_v53 = vld [vmem:[#allocation6 + $0x4b8] sm:$0xf0]  ;;  %v5345_v63 = vor.u32 %v6251_v58, %v5344_v57  ;;  %v5104_v57 = vld [vmem:[#allocation6 + $0x600] sm:$0xf]  ;;  %v6191_v58 = vld [vmem:[#allocation6 + $0x60c] sm:$0xf0] }
 0x1b0   : > { %2186 = vmatpush.bf16.msra.mxu2 %v4745_v6  ;;  %2210 = vmatpush.bf16.msra.mxu1 %v5065_v61  ;;  %v4778_v6 = vld [vmem:[#allocation6 + $0x378] sm:$0xf0]  ;;  %v6186_v61 = vld [vmem:[#allocation6 + $0x5ec] sm:$0xf] }
 0x1b1   : > { %v4781_v16 = vor.u32 %v6106_v4, %v4778_v6  ;;  %v5101_v17 = vor.u32 %v6186_v61, %v5098_v7  ;;  %v5034_v60 = vld [vmem:[#allocation6 + $0x578] sm:$0xf0]  ;;  %v5328_v4 = vld [vmem:[#allocation6 + $0x7c0] sm:$0xf]  ;;  %v6142_v61 = vld [vmem:[#allocation6 + $0x48c] sm:$0xf] }
 0x1b2   : > { %2171 = vmatpush.bf16.msra.mxu3 %v4633_v13  ;;  %2195 = vmatpush.bf16.msra.mxu0 %v4953_v14  ;;  %v4985_v13 = vor.u32 %v6160_v3, %v4984_v1  ;;  %v6078_v14 = vld [vmem:[#allocation6 + $0x28c] sm:$0xf]  ;;  %v4602_v6 = vld [vmem:[#allocation6 + $0x218] sm:$0xf0] }
 0x1b3   : > { %v6062_v3 = vld [vmem:[#allocation6 + $0x20c] sm:$0xf]  ;;  %v4922_v7 = vld [vmem:[#allocation6 + $0x498] sm:$0xf0] }
 0x1b4   : > { %2187 = vmatpush.bf16.msra.mxu2 %v4729_v39  ;;  %2211 = vmatpush.bf16.msra.mxu1 %v5049_v21  ;;  %v6182_v39 = vld [vmem:[#allocation6 + $0x5cc] sm:$0xf]  ;;  %v5082_v21 = vld [vmem:[#allocation6 + $0x5d8] sm:$0xf0] }
 0x1b5   : > { %v5085_v30 = vor.u32 %v6182_v39, %v5082_v21  ;;  %v4906_v39 = vld [vmem:[#allocation6 + $0x478] sm:$0xf0]  ;;  %v5217_v21 = vor.u32 %v6219_v11, %v5216_v10 }
 0x1b6   : > { %2172 = vmatpush.bf16.msra.mxu3 %v4617_v25  ;;  %2196 = vmatpush.bf16.msra.mxu0 %v4937_v26  ;;  %v6074_v25 = vld [vmem:[#allocation6 + $0x26c] sm:$0xf]  ;;  %v4650_v26 = vld [vmem:[#allocation6 + $0x278] sm:$0xf0]  ;;  %v4909_v62 = vor.u32 %v6138_v20, %v4906_v39 }
 0x1b7   : > { %2160 = vmatmul.bf16.vlgmr.msrb.gmra.mxu1 %v6896_v41  ;;  %2188 = vmatmul.bf16.vlgmr.msra.gmra.mxu2 %v6888_v55  ;;  %v4858_v45 = vld [vmem:[#allocation6 + $0x418] sm:$0xf0] }
 0x1b8   : > { %2236 = vmatpush.bf16.msrb.mxu2 %v4845_v22  ;;  %2212 = vmatpush.bf16.msra.mxu1 %v5033_v32  ;;  %v4669_v22 = vor.u32 %v6078_v14, %v4666_v15  ;;  %v4746_v32 = vld [vmem:[#allocation6 + $0x338] sm:$0xf0] }
 0x1b9   : > { %v4749_v42 = vor.u32 %v6098_v12, %v4746_v32  ;;  %v5018_v14 = vld [vmem:[#allocation6 + $0x558] sm:$0xf0]  ;;  %v5201_v12 = vor.u32 %v6215_v24, %v5200_v23  ;;  %v6211_v32 = vld [vmem:[#allocation6 + $0x6ac] sm:$0xf0]  ;;  %v5440_v23 = vld [vmem:[#allocation6 + $0x8a0] sm:$0xf] }
 0x1ba   : > { %2173 = vmatpush.bf16.msra.mxu3 %v4601_v37  ;;  %2197 = vmatpush.bf16.msra.mxu0 %v4921_v38  ;;  %v4634_v37 = vld [vmem:[#allocation6 + $0x258] sm:$0xf0]  ;;  %v6150_v38 = vld [vmem:[#allocation6 + $0x4cc] sm:$0xf] }
 0x1bb   : > { %v4637_v48 = vor.u32 %v6070_v36, %v4634_v37  ;;  %v4874_v36 = vld [vmem:[#allocation6 + $0x438] sm:$0xf0] }
 0x1bc   : > { %2237 = vmatpush.bf16.msrb.mxu2 %v4829_v28  ;;  %2213 = vmatpush.bf16.msra.mxu1 %v5017_v46  ;;  %v4653_v28 = vor.u32 %v6074_v25, %v4650_v26  ;;  %v6174_v46 = vld [vmem:[#allocation6 + $0x58c] sm:$0xf]  ;;  %v5002_v26 = vld [vmem:[#allocation6 + $0x538] sm:$0xf0] }
 0x1bd   : > { %2146 = vmatmul.bf16.vlgmr.msrb.gmra.mxu0 %v6900_v2  ;;  %2174 = vmatmul.bf16.vlgmr.msra.gmra.mxu3 %v6892_v8  ;;  %v6162_v25 = vld [vmem:[#allocation6 + $0x52c] sm:$0xf] }
 0x1be   : > { %2222 = vmatpush.bf16.msrb.mxu3 %v4717_v43  ;;  %2198 = vmatpush.bf16.msra.mxu0 %v4905_v52  ;;  %v5069_v43 = vor.u32 %v6178_v33, %v5066_v34  ;;  %v6146_v52 = vld [vmem:[#allocation6 + $0x4ac] sm:$0xf]  ;;  %v4986_v34 = vld [vmem:[#allocation6 + $0x518] sm:$0xf0] }
 0x1bf   : > { %v4941_v1 = vor.u32 %v6146_v52, %v4938_v53  ;;  %v6158_v33 = vld [vmem:[#allocation6 + $0x50c] sm:$0xf]  ;;  %v5120_v53 = vld [vmem:[#allocation6 + $0x620] sm:$0xf] }
 0x1c0   : > { %2238 = vmatpush.bf16.msrb.mxu2 %v4813_v49  ;;  %2214 = vmatpush.bf16.msra.mxu1 %v5001_v59  ;;  %v4957_v49 = vor.u32 %v6150_v38, %v4954_v40  ;;  %v6170_v59 = vld [vmem:[#allocation6 + $0x56c] sm:$0xf]  ;;  %v4989_v38 = vor.u32 %v6158_v33, %v4986_v34  ;;  %v5168_v40 = vld [vmem:[#allocation6 + $0x680] sm:$0xf]  ;;  %v6201_v33 = vld [vmem:[#allocation6 + $0x664] sm:$0xf] }
 0x1c1   : > { %v5154_v34 = vld [vmem:[#allocation6 + $0x670] sm:$0xf0] }
 0x1c2   : > { %2223 = vmatpush.bf16.msrb.mxu3 %v4701_v56  ;;  %2199 = vmatpush.bf16.msra.mxu0 %v4889_v5  ;;  %v5053_v56 = vor.u32 %v6174_v46, %v5050_v47  ;;  %v6247_v5 = vld [vmem:[#allocation6 + $0x7cc] sm:$0xf0] }
 0x1c3   : > { %v5329_v15 = vor.u32 %v6247_v5, %v5328_v4  ;;  %v6203_v47 = vld [vmem:[#allocation6 + $0x66c] sm:$0xf0]  ;;  %v5280_v4 = vld [vmem:[#allocation6 + $0x760] sm:$0xf] }
 0x1c4   : > { %2239 = vmatpush.bf16.msrb.mxu2 %v4797_v0  ;;  %2215 = vmatpush.bf16.msra.mxu1 %v4985_v13  ;;  %v4621_v0 = vor.u32 %v6066_v50, %v4618_v51  ;;  %v6166_v13 = vld [vmem:[#allocation6 + $0x54c] sm:$0xf]  ;;  %v5136_v50 = vld [vmem:[#allocation6 + $0x640] sm:$0xf]  ;;  %v6199_v51 = vld [vmem:[#allocation6 + $0x64c] sm:$0xf0] }
 0x1c5   : > { %v5137_v52 = vor.u32 %v6199_v51, %v5136_v50  ;;  %v6235_v5 = vld [vmem:[#allocation6 + $0x76c] sm:$0xf0] }
 0x1c6   : > { %2224 = vmatpush.bf16.msrb.mxu3 %v4685_v9  ;;  %2200 = vmatpush.bf16.msra.mxu0 %v4873_v19  ;;  %v5037_v9 = vor.u32 %v6170_v59, %v5034_v60  ;;  %v6243_v19 = vld [vmem:[#allocation6 + $0x7ac] sm:$0xf0]  ;;  %v5296_v59 = vld [vmem:[#allocation6 + $0x780] sm:$0xf]  ;;  %v5105_v60 = vor.u32 %v6191_v58, %v5104_v57  ;;  %v5314_v57 = vld [vmem:[#allocation6 + $0x7b0] sm:$0xf0] }
 0x1c7   : > { %2216 = vmatmul.bf16.vlgmr.msra.gmra.mxu1 %v6896_v41  ;;  %v5313_v27 = vor.u32 %v6243_v19, %v5312_v18  ;;  %v6209_v18 = vld [vmem:[#allocation6 + $0x6a4] sm:$0xf]  ;;  %v5186_v19 = vld [vmem:[#allocation6 + $0x6b0] sm:$0xf0]  ;;  %v6263_v50 = vld [vmem:[#allocation6 + $0x84c] sm:$0xf0] }
 0x1c8   : > { %2240 = vmatpush.bf16.msrb.mxu2 %v4781_v16  ;;  %2264 = vmatpush.bf16.msrb.mxu1 %v5101_v17  ;;  %v4605_v16 = vor.u32 %v6062_v3, %v4602_v6  ;;  %v4925_v17 = vor.u32 %v6142_v61, %v4922_v7  ;;  %v5472_v6 = vld [vmem:[#allocation6 + $0x8e0] sm:$0xf]  ;;  %v5281_v61 = vor.u32 %v6235_v5, %v5280_v4  ;;  %v6213_v7 = vld [vmem:[#allocation6 + $0x6c4] sm:$0xf]  ;;  %v5298_v4 = vld [vmem:[#allocation6 + $0x790] sm:$0xf0] }
 0x1c9   : > { %v5189_v39 = vor.u32 %v6209_v18, %v5186_v19  ;;  %v5584_v19 = vld [vmem:[#allocation6 + $0x9c0] sm:$0xf] }
 0x1ca   : > { %2225 = vmatpush.bf16.msrb.mxu3 %v4669_v22  ;;  %2201 = vmatpush.bf16.msra.mxu0 %v4857_v31  ;;  %v5021_v22 = vor.u32 %v6166_v13, %v5018_v14  ;;  %v5184_v31 = vld [vmem:[#allocation6 + $0x6a0] sm:$0xf]  ;;  %v6231_v14 = vld [vmem:[#allocation6 + $0x74c] sm:$0xf0] }
 0x1cb   : > { %v5185_v37 = vor.u32 %v6211_v32, %v5184_v31  ;;  %v5264_v13 = vld [vmem:[#allocation6 + $0x740] sm:$0xf]  ;;  %v6271_v32 = vld [vmem:[#allocation6 + $0x88c] sm:$0xf0] }
 0x1cc   : > { %2241 = vmatpush.bf16.msrb.mxu2 %v4765_v29  ;;  %2265 = vmatpush.bf16.msrb.mxu1 %v5085_v30  ;;  %v6134_v29 = vld [vmem:[#allocation6 + $0x44c] sm:$0xf]  ;;  %v4890_v30 = vld [vmem:[#allocation6 + $0x458] sm:$0xf0] }
 0x1cd   : > { %2202 = vmatmul.bf16.vlgmr.msra.gmra.mxu0 %v6900_v2 }
 0x1ce   : > { %2226 = vmatpush.bf16.msrb.mxu3 %v4653_v28  ;;  %2250 = vmatpush.bf16.msrb.mxu0 %v4973_v35  ;;  %v4893_v28 = vor.u32 %v6134_v29, %v4890_v30  ;;  %v6130_v35 = vld [vmem:[#allocation6 + $0x42c] sm:$0xf]  ;;  %v5232_v30 = vld [vmem:[#allocation6 + $0x700] sm:$0xf] }
 0x1d0   : > { %2242 = vmatpush.bf16.msrb.mxu2 %v4749_v42  ;;  %2266 = vmatpush.bf16.msrb.mxu1 %v5069_v43  ;;  %v6207_v42 = vld [vmem:[#allocation6 + $0x68c] sm:$0xf0]  ;;  %v4877_v43 = vor.u32 %v6130_v35, %v4874_v36  ;;  %v5157_v35 = vor.u32 %v6201_v33, %v5154_v34  ;;  %v6249_v36 = vld [vmem:[#allocation6 + $0x7e4] sm:$0xf] }
 0x1d1   : > { %v5169_v46 = vor.u32 %v6207_v42, %v5168_v40  ;;  %v5408_v40 = vld [vmem:[#allocation6 + $0x860] sm:$0xf]  ;;  %v6267_v42 = vld [vmem:[#allocation6 + $0x86c] sm:$0xf0]  ;;  %v6273_v33 = vld [vmem:[#allocation6 + $0x8a4] sm:$0xf] }
 0x1d2   : > { %2227 = vmatpush.bf16.msrb.mxu3 %v4637_v48  ;;  %2251 = vmatpush.bf16.msrb.mxu0 %v4957_v49  ;;  %v4861_v48 = vor.u32 %v6126_v44, %v4858_v45  ;;  %v6197_v44 = vld [vmem:[#allocation6 + $0x644] sm:$0xf]  ;;  %v5138_v45 = vld [vmem:[#allocation6 + $0x650] sm:$0xf0] }
 0x1d4   : > { %2243 = vmatpush.bf16.msrb.mxu2 %v4733_v54  ;;  %2267 = vmatpush.bf16.msrb.mxu1 %v5053_v56  ;;  %v6195_v54 = vld [vmem:[#allocation6 + $0x62c] sm:$0xf0] }
 0x1d5   : > { %v5121_v56 = vor.u32 %v6195_v54, %v5120_v53  ;;  %v5122_v53 = vld [vmem:[#allocation6 + $0x630] sm:$0xf0]  ;;  %v6241_v54 = vld [vmem:[#allocation6 + $0x7a4] sm:$0xf] }
 0x1d6   : > { %2228 = vmatpush.bf16.msrb.mxu3 %v4621_v0  ;;  %2252 = vmatpush.bf16.msrb.mxu0 %v4941_v1  ;;  %v5218_v0 = vld [vmem:[#allocation6 + $0x6f0] sm:$0xf0]  ;;  %v5317_v58 = vor.u32 %v6241_v54, %v5314_v57 }
 0x1d7   : > { %2244 = vmatmul.bf16.vlgmr.msrb.gmra.mxu2 %v6888_v55  ;;  %v5005_v55 = vor.u32 %v6162_v25, %v5002_v26  ;;  %v6275_v25 = vld [vmem:[#allocation6 + $0x8ac] sm:$0xf0]  ;;  %v6205_v26 = vld [vmem:[#allocation6 + $0x684] sm:$0xf]  ;;  %v5410_v57 = vld [vmem:[#allocation6 + $0x870] sm:$0xf0] }
 0x1d8   : > { %3082 = vmatpush.bf16.msra.mxu2 %v5345_v63  ;;  %2268 = vmatpush.bf16.msrb.mxu1 %v5037_v9  ;;  %v6239_v63 = vld [vmem:[#allocation6 + $0x78c] sm:$0xf0]  ;;  %v5202_v9 = vld [vmem:[#allocation6 + $0x6d0] sm:$0xf0] }
 0x1d9   : > { %v5297_v1 = vor.u32 %v6239_v63, %v5296_v59  ;;  %v5205_v11 = vor.u32 %v6213_v7, %v5202_v9  ;;  %v5376_v59 = vld [vmem:[#allocation6 + $0x820] sm:$0xf]  ;;  %v6315_v9 = vld [vmem:[#allocation6 + $0x9ec] sm:$0xf0] }
 0x1da   : > { %2229 = vmatpush.bf16.msrb.mxu3 %v4605_v16  ;;  %2253 = vmatpush.bf16.msrb.mxu0 %v4925_v17  ;;  %v5265_v16 = vor.u32 %v6231_v14, %v5264_v13  ;;  %v6279_v17 = vld [vmem:[#allocation6 + $0x8cc] sm:$0xf0] }
 0x1dc   : > { %3083 = vmatpush.bf16.msra.mxu2 %v5329_v15  ;;  %2269 = vmatpush.bf16.msrb.mxu1 %v5021_v22  ;;  %v5456_v15 = vld [vmem:[#allocation6 + $0x8c0] sm:$0xf]  ;;  %v6227_v22 = vld [vmem:[#allocation6 + $0x72c] sm:$0xf0] }
 0x1dd   : > { %2230 = vmatmul.bf16.vlgmr.msrb.gmra.mxu3 %v6892_v8  ;;  %v5152_v8 = vld [vmem:[#allocation6 + $0x660] sm:$0xf]  ;;  %v5457_v20 = vor.u32 %v6279_v17, %v5456_v15  ;;  %v6281_v15 = vld [vmem:[#allocation6 + $0x8e4] sm:$0xf] }
 0x1de   : > { %3068 = vmatpush.bf16.msra.mxu3 %v5217_v21  ;;  %2254 = vmatpush.bf16.msrb.mxu0 %v4909_v62  ;;  %v5153_v49 = vor.u32 %v6203_v47, %v5152_v8  ;;  %v5248_v21 = vld [vmem:[#allocation6 + $0x720] sm:$0xf]  ;;  %v5441_v62 = vor.u32 %v6275_v25, %v5440_v23  ;;  %v5141_v8 = vor.u32 %v6197_v44, %v5138_v45  ;;  %v5330_v47 = vld [vmem:[#allocation6 + $0x7d0] sm:$0xf0]  ;;  %v6277_v25 = vld [vmem:[#allocation6 + $0x8c4] sm:$0xf] }
 0x1df   : > { %v5249_v24 = vor.u32 %v6227_v22, %v5248_v21  ;;  %v6229_v22 = vld [vmem:[#allocation6 + $0x744] sm:$0xf]  ;;  %v5266_v23 = vld [vmem:[#allocation6 + $0x750] sm:$0xf0] }
 0x1e0   : > { %3084 = vmatpush.bf16.msra.mxu2 %v5313_v27  ;;  %2270 = vmatpush.bf16.msrb.mxu1 %v5005_v55  ;;  %v5170_v27 = vld [vmem:[#allocation6 + $0x690] sm:$0xf0]  ;;  %v5424_v55 = vld [vmem:[#allocation6 + $0x880] sm:$0xf]  ;;  %v6269_v45 = vld [vmem:[#allocation6 + $0x884] sm:$0xf] }
 0x1e1   : > { %v5173_v29 = vor.u32 %v6205_v26, %v5170_v27  ;;  %v5458_v26 = vld [vmem:[#allocation6 + $0x8d0] sm:$0xf0]  ;;  %v6914_v27 = vld [vmem:[#allocation9 + $0x6] sm:$0xf] }
 0x1e2   : > { %3069 = vmatpush.bf16.msra.mxu3 %v5201_v12  ;;  %2255 = vmatpush.bf16.msrb.mxu0 %v4893_v28  ;;  %v6223_v12 = vld [vmem:[#allocation6 + $0x70c] sm:$0xf0]  ;;  %v5425_v28 = vor.u32 %v6271_v32, %v5424_v55  ;;  %v5250_v32 = vld [vmem:[#allocation6 + $0x730] sm:$0xf0]  ;;  %v1406_v34 = vperm.slane %v6914_v27, 0 }
 0x1e3   : > { %v5233_v31 = vor.u32 %v6223_v12, %v5232_v30  ;;  %v6307_v30 = vld [vmem:[#allocation6 + $0x9ac] sm:$0xf0]  ;;  %v5234_v44 = vld [vmem:[#allocation6 + $0x710] sm:$0xf0] }
 0x1e4   : > { %2271 = vmatpush.bf16.msrb.mxu1 %v4989_v38  ;;  %3085 = vmatpush.bf16.msra.mxu2 %v5297_v1  ;;  %v6237_v1 = vld [vmem:[#allocation6 + $0x784] sm:$0xf] }
 0x1e5   : > { %v5301_v5 = vor.u32 %v6237_v1, %v5298_v4  ;;  %v6261_v4 = vld [vmem:[#allocation6 + $0x844] sm:$0xf] }
 0x1e6   : > { %3070 = vmatpush.bf16.msra.mxu3 %v5185_v37  ;;  %2256 = vmatpush.bf16.msrb.mxu0 %v4877_v43  ;;  %v5346_v37 = vld [vmem:[#allocation6 + $0x7f0] sm:$0xf0]  ;;  %v5409_v43 = vor.u32 %v6267_v42, %v5408_v40 }
 0x1e7   : > { %2272 = vmatmul.bf16.vlgmr.msrb.gmra.mxu1 %v6896_v41  ;;  %v6217_v41 = vld [vmem:[#allocation6 + $0x6e4] sm:$0xf]  ;;  %v5349_v38 = vor.u32 %v6249_v36, %v5346_v37  ;;  %v5552_v37 = vld [vmem:[#allocation6 + $0x980] sm:$0xf] }
 0x1e8   : > { %v5221_v3 = vor.u32 %v6217_v41, %v5218_v0  ;;  %3086 = vmatpush.bf16.msra.mxu2 %v5281_v61  ;;  %v6189_v41 = vld [vmem:[#allocation6 + $0x604] sm:$0xf]  ;;  %v5106_v0 = vld [vmem:[#allocation6 + $0x610] sm:$0xf0]  ;;  %v6255_v61 = vld [vmem:[#allocation6 + $0x80c] sm:$0xf0] }
 0x1ea   : > { %3071 = vmatpush.bf16.msra.mxu3 %v5169_v46  ;;  %2257 = vmatpush.bf16.msrb.mxu0 %v4861_v48  ;;  %v6245_v46 = vld [vmem:[#allocation6 + $0x7c4] sm:$0xf] }
 0x1eb   : > { %v5333_v48 = vor.u32 %v6245_v46, %v5330_v47 }
 0x1ec   : > { %3087 = vmatpush.bf16.msra.mxu2 %v5265_v16  ;;  %v5474_v16 = vld [vmem:[#allocation6 + $0x8f0] sm:$0xf0] }
 0x1ed   : > { %2258 = vmatmul.bf16.vlgmr.msrb.gmra.mxu0 %v6900_v2  ;;  %v6283_v2 = vld [vmem:[#allocation6 + $0x8ec] sm:$0xf0]  ;;  %v5477_v17 = vor.u32 %v6281_v15, %v5474_v16  ;;  %v6257_v15 = vld [vmem:[#allocation6 + $0x824] sm:$0xf]  ;;  %v5378_v16 = vld [vmem:[#allocation6 + $0x830] sm:$0xf0] }
 0x1ee   : > { %3072 = vmatpush.bf16.msra.mxu3 %v5153_v49  ;;  %v5473_v10 = vor.u32 %v6283_v2, %v5472_v6  ;;  %v5392_v49 = vld [vmem:[#allocation6 + $0x840] sm:$0xf] }
 0x1ef   : > { %v5393_v51 = vor.u32 %v6263_v50, %v5392_v49  ;;  %v5360_v6 = vld [vmem:[#allocation6 + $0x800] sm:$0xf] }
 0x1f0   : > { %3096 = vmatpush.bf16.msra.mxu0 %v5473_v10  ;;  %3088 = vmatpush.bf16.msra.mxu2 %v5249_v24  ;;  %v5600_v2 = vld [vmem:[#allocation6 + $0x9e0] sm:$0xf]  ;;  %v5361_v7 = vor.u32 %v6255_v61, %v5360_v6  ;;  %v6233_v10 = vld [vmem:[#allocation6 + $0x764] sm:$0xf]  ;;  %v5269_v24 = vor.u32 %v6229_v22, %v5266_v23 }
 0x1f1   : > { %v5601_v13 = vor.u32 %v6315_v9, %v5600_v2 }
 0x1f2   : > { %3073 = vmatpush.bf16.msra.mxu3 %v5137_v52  ;;  %v6193_v52 = vld [vmem:[#allocation6 + $0x624] sm:$0xf] }
 0x1f3   : > { %3110 = vmatpush.bf16.msra.mxu1 %v5601_v13  ;;  %v6291_v13 = vld [vmem:[#allocation6 + $0x92c] sm:$0xf0] }
 0x1f4   : > { %3097 = vmatpush.bf16.msra.mxu0 %v5457_v20  ;;  %3089 = vmatpush.bf16.msra.mxu2 %v5233_v31  ;;  %v6311_v20 = vld [vmem:[#allocation6 + $0x9cc] sm:$0xf0]  ;;  %v6225_v31 = vld [vmem:[#allocation6 + $0x724] sm:$0xf] }
 0x1f5   : > { %v5585_v21 = vor.u32 %v6311_v20, %v5584_v19  ;;  %v5224_v19 = vld [vmem:[#allocation6 + $0x6e8] sm:$0xf]  ;;  %v6220_v20 = vld [vmem:[#allocation6 + $0x6f4] sm:$0xf0] }
 0x1f6   : > { %3074 = vmatpush.bf16.msra.mxu3 %v5121_v56  ;;  %v5125_v56 = vor.u32 %v6193_v52, %v5122_v53  ;;  %v6299_v52 = vld [vmem:[#allocation6 + $0x96c] sm:$0xf0] }
 0x1f7   : > { %3111 = vmatpush.bf16.msra.mxu1 %v5585_v21 }
 0x1f8   : > { %3098 = vmatpush.bf16.msra.mxu0 %v5441_v62  ;;  %3138 = vmatpush.bf16.msrb.mxu2 %v5349_v38  ;;  %v5461_v62 = vor.u32 %v6277_v25, %v5458_v26  ;;  %v6303_v38 = vld [vmem:[#allocation6 + $0x98c] sm:$0xf0] }
 0x1f9   : > { %v5553_v42 = vor.u32 %v6303_v38, %v5552_v37  ;;  %v6287_v25 = vld [vmem:[#allocation6 + $0x90c] sm:$0xf0] }
 0x1fa   : > { %3075 = vmatpush.bf16.msra.mxu3 %v5105_v60  ;;  %v6259_v60 = vld [vmem:[#allocation6 + $0x82c] sm:$0xf0] }
 0x1fb   : > { %v5377_v63 = vor.u32 %v6259_v60, %v5376_v59 }
 0x1fc   : > { %3099 = vmatpush.bf16.msra.mxu0 %v5425_v28  ;;  %3139 = vmatpush.bf16.msrb.mxu2 %v5333_v48  ;;  %v5253_v28 = vor.u32 %v6225_v31, %v5250_v32  ;;  %v5426_v48 = vld [vmem:[#allocation6 + $0x890] sm:$0xf0] }
 0x1fd   : > { %v5429_v50 = vor.u32 %v6269_v45, %v5426_v48  ;;  %v6212_v45 = vld [vmem:[#allocation6 + $0x6b4] sm:$0xf0] }
 0x1fe   : > { %3124 = vmatpush.bf16.msrb.mxu3 %v5221_v3  ;;  %v5109_v3 = vor.u32 %v6189_v41, %v5106_v0  ;;  %v5520_v41 = vld [vmem:[#allocation6 + $0x940] sm:$0xf]  ;;  %v6295_v0 = vld [vmem:[#allocation6 + $0x94c] sm:$0xf0] }
 0x200   : > { %3100 = vmatpush.bf16.msra.mxu0 %v5409_v43  ;;  %3140 = vmatpush.bf16.msrb.mxu2 %v5317_v58  ;;  %v6221_v43 = vld [vmem:[#allocation6 + $0x704] sm:$0xf] }
 0x201   : > { %v5237_v47 = vor.u32 %v6221_v43, %v5234_v44 }
 0x202   : > { %3125 = vmatpush.bf16.msrb.mxu3 %v5205_v11  ;;  %v5282_v11 = vld [vmem:[#allocation6 + $0x770] sm:$0xf0] }
 0x203   : > { %v5285_v14 = vor.u32 %v6233_v10, %v5282_v11  ;;  %v5504_v11 = vld [vmem:[#allocation6 + $0x920] sm:$0xf] }
 0x204   : > { %3101 = vmatpush.bf16.msra.mxu0 %v5393_v51  ;;  %3141 = vmatpush.bf16.msrb.mxu2 %v5301_v5  ;;  %v5536_v51 = vld [vmem:[#allocation6 + $0x960] sm:$0xf]  ;;  %v5394_v5 = vld [vmem:[#allocation6 + $0x850] sm:$0xf0] }
 0x205   : > { %v5537_v54 = vor.u32 %v6299_v52, %v5536_v51  ;;  %v5397_v61 = vor.u32 %v6261_v4, %v5394_v5  ;;  %v5176_v51 = vld [vmem:[#allocation6 + $0x688] sm:$0xf]  ;;  %v6252_v5 = vld [vmem:[#allocation6 + $0x7f4] sm:$0xf0] }
 0x206   : > { %3126 = vmatpush.bf16.msrb.mxu3 %v5189_v39 }
 0x208   : > { %3102 = vmatpush.bf16.msra.mxu0 %v5377_v63  ;;  %3142 = vmatpush.bf16.msrb.mxu2 %v5285_v14  ;;  %v5505_v14 = vor.u32 %v6291_v13, %v5504_v11 }
 0x20a   : > { %3127 = vmatpush.bf16.msrb.mxu3 %v5173_v29  ;;  %v5568_v29 = vld [vmem:[#allocation6 + $0x9a0] sm:$0xf] }
 0x20b   : > { %v5569_v55 = vor.u32 %v6307_v30, %v5568_v29  ;;  %v6253_v30 = vld [vmem:[#allocation6 + $0x804] sm:$0xf] }
 0x20c   : > { %3103 = vmatpush.bf16.msra.mxu0 %v5361_v7  ;;  %3143 = vmatpush.bf16.msrb.mxu2 %v5269_v24  ;;  %v5488_v24 = vld [vmem:[#allocation6 + $0x900] sm:$0xf] }
 0x20d   : > { %3112 = vmatpush.bf16.msra.mxu1 %v5569_v55  ;;  %v5489_v29 = vor.u32 %v6287_v25, %v5488_v24  ;;  %v6313_v55 = vld [vmem:[#allocation6 + $0x9e4] sm:$0xf] }
 0x20e   : > { %3128 = vmatpush.bf16.msrb.mxu3 %v5157_v35  ;;  %v5442_v35 = vld [vmem:[#allocation6 + $0x8b0] sm:$0xf0] }
 0x20f   : > { %v5445_v36 = vor.u32 %v6273_v33, %v5442_v35  ;;  %v5208_v33 = vld [vmem:[#allocation6 + $0x6c8] sm:$0xf]  ;;  %v5602_v35 = vld [vmem:[#allocation6 + $0x9f0] sm:$0xf0] }
 0x210   : > { %3152 = vmatpush.bf16.msrb.mxu0 %v5477_v17  ;;  %3144 = vmatpush.bf16.msrb.mxu2 %v5253_v28  ;;  %v1407_v17 = vperm.slane %v6914_v27, 1  ;;  %v5605_v37 = vor.u32 %v6313_v55, %v5602_v35  ;;  %v6244_v55 = vld [vmem:[#allocation6 + $0x7b4] sm:$0xf0] }
 0x211   : > { %3113 = vmatpush.bf16.msra.mxu1 %v5553_v42 }
 0x212   : > { %3129 = vmatpush.bf16.msrb.mxu3 %v5141_v8 }
 0x214   : > { %3153 = vmatpush.bf16.msrb.mxu0 %v5461_v62  ;;  %3145 = vmatpush.bf16.msrb.mxu2 %v5237_v47  ;;  %v5225_v62 = vor.u32 %v6220_v20, %v5224_v19  ;;  %v6248_v19 = vld [vmem:[#allocation6 + $0x7d4] sm:$0xf0]  ;;  %v6297_v20 = vld [vmem:[#allocation6 + $0x964] sm:$0xf] }
 0x215   : > { %3114 = vmatpush.bf16.msra.mxu1 %v5537_v54  ;;  %v6208_v54 = vld [vmem:[#allocation6 + $0x694] sm:$0xf0] }
 0x216   : > { %3130 = vmatpush.bf16.msrb.mxu3 %v5125_v56  ;;  %v6265_v56 = vld [vmem:[#allocation6 + $0x864] sm:$0xf] }
 0x217   : > { %v5413_v60 = vor.u32 %v6265_v56, %v5410_v57  ;;  %v6305_v56 = vld [vmem:[#allocation6 + $0x9a4] sm:$0xf]  ;;  %v5570_v57 = vld [vmem:[#allocation6 + $0x9b0] sm:$0xf0] }
 0x218   : > { %3154 = vmatpush.bf16.msrb.mxu0 %v5445_v36 }
 0x21a   : > { %3131 = vmatpush.bf16.msrb.mxu3 %v5109_v3  ;;  %v2077_v18 = vpop.f32.mrf.mxu2  ;;  %v5521_v3 = vor.u32 %v6295_v0, %v5520_v41  ;;  %v5177_v41 = vor.u32 %v6208_v54, %v5176_v51  ;;  %v5160_v0 = vld [vmem:[#allocation6 + $0x668] sm:$0xf] }
 0x21c   : > { %3155 = vmatpush.bf16.msrb.mxu0 %v5429_v50  ;;  %3115 = vmatpush.bf16.msra.mxu1 %v5521_v3  ;;  %v5352_v3 = vld [vmem:[#allocation6 + $0x7e8] sm:$0xf] }
 0x220   : > { %v2063_v39 = vpop.f32.mrf.mxu3  ;;  %3156 = vmatpush.bf16.msrb.mxu0 %v5413_v60  ;;  %3116 = vmatpush.bf16.msra.mxu1 %v5505_v14  ;;  %v5353_v14 = vor.u32 %v6252_v5, %v5352_v3  ;;  %v6284_v3 = vld [vmem:[#allocation6 + $0x8f4] sm:$0xf0]  ;;  %v5210_v5 = vld [vmem:[#allocation6 + $0x6d8] sm:$0xf0] }
 0x221   : > { %v2064_v46 = vadd.f32 %v2063_v39, %v1406_v34  ;;  %v5381_v39 = vor.u32 %v6257_v15, %v5378_v16  ;;  %v5144_v15 = vld [vmem:[#allocation6 + $0x648] sm:$0xf]  ;;  %v6200_v16 = vld [vmem:[#allocation6 + $0x654] sm:$0xf0] }
 0x222   : > { %v2079_v8 = vpop.f32.mrf.mxu2 }
 0x223   : > { %v2078_v59 = vadd.f32 %v2077_v18, %v2064_v46  ;;  %v6309_v46 = vld [vmem:[#allocation6 + $0x9c4] sm:$0xf] }
 0x224   : > { %v2105_v12 = vpop.f32.mrf.mxu1  ;;  %3157 = vmatpush.bf16.msrb.mxu0 %v5397_v61  ;;  %3117 = vmatpush.bf16.msra.mxu1 %v5489_v29  ;;  %v5554_v61 = vld [vmem:[#allocation6 + $0x990] sm:$0xf0]  ;;  %v5128_v29 = vld [vmem:[#allocation6 + $0x628] sm:$0xf] }
 0x228   : > { %v2065_v40 = vpop.f32.mrf.mxu3  ;;  %3158 = vmatpush.bf16.msrb.mxu0 %v5381_v39  ;;  %3166 = vmatpush.bf16.msrb.mxu1 %v5605_v37  ;;  %v5538_v39 = vld [vmem:[#allocation6 + $0x970] sm:$0xf0] }
 0x229   : > { %v2066_v58 = vadd.f32 %v2065_v40, %v1406_v34  ;;  %v6216_v34 = vld [vmem:[#allocation6 + $0x6d4] sm:$0xf0]  ;;  %v5192_v40 = vld [vmem:[#allocation6 + $0x6a8] sm:$0xf] }
 0x22a   : > { %v2091_v49 = vpop.f32.mrf.mxu0  ;;  %v2133_v9 = vpop.f32.mrf.mxu2  ;;  %v5209_v38 = vor.u32 %v6216_v34, %v5208_v33  ;;  %v5193_v50 = vor.u32 %v6212_v45, %v5192_v40  ;;  %v5522_v33 = vld [vmem:[#allocation6 + $0x950] sm:$0xf0]  ;;  %v5112_v40 = vld [vmem:[#allocation6 + $0x608] sm:$0xf]  ;;  %v6240_v45 = vld [vmem:[#allocation6 + $0x794] sm:$0xf0] }
 0x22b   : > { %v2092_v63 = vadd.f32 %v2091_v49, %v2078_v59  ;;  %v2080_v6 = vadd.f32 %v2079_v8, %v2066_v58  ;;  %v5586_v8 = vld [vmem:[#allocation6 + $0x9d0] sm:$0xf0]  ;;  %v5573_v59 = vor.u32 %v6305_v56, %v5570_v57  ;;  %v5288_v57 = vld [vmem:[#allocation6 + $0x768] sm:$0xf] }
 0x22c   : > { %v2107_v53 = vpop.f32.mrf.mxu1  ;;  %v5589_v47 = vor.u32 %v6309_v46, %v5586_v8  ;;  %v6289_v46 = vld [vmem:[#allocation6 + $0x924] sm:$0xf]  ;;  %v5506_v8 = vld [vmem:[#allocation6 + $0x930] sm:$0xf0] }
 0x22d   : > { %v2106_v7 = vadd.f32 %v2105_v12, %v2092_v63  ;;  %v5362_v12 = vld [vmem:[#allocation6 + $0x810] sm:$0xf0] }
 0x22e   : > { %v5365_v28 = vor.u32 %v6253_v30, %v5362_v12  ;;  %3167 = vmatpush.bf16.msrb.mxu1 %v5589_v47  ;;  %v6196_v30 = vld [vmem:[#allocation6 + $0x634] sm:$0xf0]  ;;  %v5320_v12 = vld [vmem:[#allocation6 + $0x7a8] sm:$0xf] }
 0x22f   : > { %v2278_v22 = vmax.f32 %v2106_v7, 0.0  ;;  %v5129_v37 = vor.u32 %v6196_v30, %v5128_v29  ;;  %v5178_v29 = vld [vmem:[#allocation6 + $0x698] sm:$0xf0]  ;;  %v1409_v30 = vperm.slane %v6914_v27, 3 }
 0x230   : > { %v2119_v1 = vpop.f32.mrf.mxu3  ;;  %3159 = vmatpush.bf16.msrb.mxu0 %v5365_v28 }
 0x231   : > { %v2120_v31 = vadd.f32 %v2119_v1, %v1407_v17  ;;  %v6204_v1 = vld [vmem:[#allocation6 + $0x674] sm:$0xf0] }
 0x232   : > { %v2093_v2 = vpop.f32.mrf.mxu0  ;;  %v2135_v42 = vpop.f32.mrf.mxu2  ;;  %3168 = vmatpush.bf16.msrb.mxu1 %v5573_v59  ;;  %v5161_v13 = vor.u32 %v6204_v1, %v5160_v0  ;;  %v5490_v0 = vld [vmem:[#allocation6 + $0x910] sm:$0xf0] }
 0x233   : > { %v2094_v10 = vadd.f32 %v2093_v2, %v2080_v6  ;;  %v2134_v44 = vadd.f32 %v2133_v9, %v2120_v31  ;;  %v6301_v6 = vld [vmem:[#allocation6 + $0x984] sm:$0xf]  ;;  %v1408_v2 = vperm.slane %v6914_v27, 2 }
 0x234   : > { %v2161_v21 = vpop.f32.mrf.mxu1  ;;  %v5557_v7 = vor.u32 %v6301_v6, %v5554_v61  ;;  %v6293_v31 = vld [vmem:[#allocation6 + $0x944] sm:$0xf] }
 0x235   : > { %v2108_v18 = vadd.f32 %v2107_v53, %v2094_v10  ;;  %v5525_v35 = vor.u32 %v6293_v31, %v5522_v33  ;;  %v5240_v33 = vld [vmem:[#allocation6 + $0x708] sm:$0xf] }
 0x236   : > { %3169 = vmatpush.bf16.msrb.mxu1 %v5557_v7 }
 0x237   : > { %v2282_v23 = vmax.f32 %v2108_v18, 0.0 }
 0x238   : > { %v2121_v26 = vpop.f32.mrf.mxu3 }
 0x239   : > { %v6918_v32 = vpack.c.bf16 %v2282_v23, %v2278_v22  ;;  %v2122_v43 = vadd.f32 %v2121_v26, %v1407_v17  ;;  %v5336_v17 = vld [vmem:[#allocation6 + $0x7c8] sm:$0xf]  ;;  %v5541_v23 = vor.u32 %v6297_v20, %v5538_v39  ;;  %v5145_v26 = vor.u32 %v6200_v16, %v5144_v15  ;;  %v6280_v16 = vld [vmem:[#allocation6 + $0x8d4] sm:$0xf0] }
 0x23a   : > { %v2147_v36 = vpop.f32.mrf.mxu0  ;;  %v2189_v10 = vpop.f32.mrf.mxu2 }
 0x23b   : > { %3076 = vmatmul.bf16.vlgmr.msra.gmra.mxu3 %v6918_v32  ;;  %v2148_v48 = vadd.f32 %v2147_v36, %v2134_v44  ;;  %v2136_v53 = vadd.f32 %v2135_v42, %v2122_v43  ;;  %3170 = vmatpush.bf16.msrb.mxu1 %v5541_v23  ;;  %v6192_v42 = vld [vmem:[#allocation6 + $0x614] sm:$0xf0]  ;;  %v5304_v43 = vld [vmem:[#allocation6 + $0x788] sm:$0xf] }
 0x23c   : > { %3180 = vmatpush.bf16.msra.mxu3 %v5225_v62  ;;  %v2163_v49 = vpop.f32.mrf.mxu1  ;;  %v5337_v62 = vor.u32 %v6248_v19, %v5336_v17  ;;  %v5305_v56 = vor.u32 %v6240_v45, %v5304_v43  ;;  %v6210_v17 = vld [vmem:[#allocation6 + $0x6ac] sm:$0xf]  ;;  %v5194_v19 = vld [vmem:[#allocation6 + $0x6b8] sm:$0xf0]  ;;  %v5256_v23 = vld [vmem:[#allocation6 + $0x728] sm:$0xf] }
 0x23d   : > { %v2162_v60 = vadd.f32 %v2161_v21, %v2148_v48  ;;  %v6218_v48 = vld [vmem:[#allocation6 + $0x6ec] sm:$0xf]  ;;  %v5416_v45 = vld [vmem:[#allocation6 + $0x868] sm:$0xf] }
 0x23f   : > { %v2279_v9 = vmax.f32 %v2162_v60, 0.0  ;;  %3171 = vmatpush.bf16.msrb.mxu1 %v5525_v35  ;;  %v6272_v35 = vld [vmem:[#allocation6 + $0x894] sm:$0xf0] }
 0x240   : > { %3181 = vmatpush.bf16.msra.mxu3 %v5209_v38  ;;  %v2175_v52 = vpop.f32.mrf.mxu3  ;;  %v5321_v38 = vor.u32 %v6244_v55, %v5320_v12 }
 0x241   : > { %v2176_v21 = vadd.f32 %v2175_v52, %v1408_v2  ;;  %v5113_v52 = vor.u32 %v6192_v42, %v5112_v40  ;;  %v6250_v40 = vld [vmem:[#allocation6 + $0x7ec] sm:$0xf]  ;;  %v5354_v42 = vld [vmem:[#allocation6 + $0x7f8] sm:$0xf0] }
 0x242   : > { %v2149_v58 = vpop.f32.mrf.mxu0  ;;  %v2191_v44 = vpop.f32.mrf.mxu2 }
 0x243   : > { %v2150_v63 = vadd.f32 %v2149_v58, %v2136_v53  ;;  %v2190_v28 = vadd.f32 %v2189_v10, %v2176_v21  ;;  %v6236_v58 = vld [vmem:[#allocation6 + $0x774] sm:$0xf0] }
 0x244   : > { %3182 = vmatpush.bf16.msra.mxu3 %v5193_v50  ;;  %v2217_v22 = vpop.f32.mrf.mxu1  ;;  %v5509_v50 = vor.u32 %v6289_v46, %v5506_v8  ;;  %v5289_v7 = vor.u32 %v6236_v58, %v5288_v57  ;;  %v5400_v58 = vld [vmem:[#allocation6 + $0x848] sm:$0xf] }
 0x245   : > { %v2164_v4 = vadd.f32 %v2163_v49, %v2150_v63  ;;  %v5226_v49 = vld [vmem:[#allocation6 + $0x6f8] sm:$0xf0]  ;;  %v5480_v63 = vld [vmem:[#allocation6 + $0x8e8] sm:$0xf] }
 0x246   : > { %v5229_v60 = vor.u32 %v6218_v48, %v5226_v49  ;;  %3172 = vmatpush.bf16.msrb.mxu1 %v5509_v50  ;;  %v6268_v48 = vld [vmem:[#allocation6 + $0x874] sm:$0xf0]  ;;  %v6198_v49 = vld [vmem:[#allocation6 + $0x64c] sm:$0xf]  ;;  %v5146_v50 = vld [vmem:[#allocation6 + $0x658] sm:$0xf0] }
 0x247   : > { %v2283_v11 = vmax.f32 %v2164_v4, 0.0  ;;  %v6214_v4 = vld [vmem:[#allocation6 + $0x6cc] sm:$0xf]  ;;  %v5149_v57 = vor.u32 %v6198_v49, %v5146_v50  ;;  %v5576_v49 = vld [vmem:[#allocation6 + $0x9a8] sm:$0xf] }
 0x248   : > { %3183 = vmatpush.bf16.msra.mxu3 %v5177_v41  ;;  %v2177_v24 = vpop.f32.mrf.mxu3  ;;  %v6285_v41 = vld [vmem:[#allocation6 + $0x904] sm:$0xf]  ;;  %v5213_v10 = vor.u32 %v6214_v4, %v5210_v5  ;;  %v5322_v4 = vld [vmem:[#allocation6 + $0x7b8] sm:$0xf0]  ;;  %v6308_v50 = vld [vmem:[#allocation6 + $0x9b4] sm:$0xf0] }
 0x249   : > { %v6922_v18 = vpack.c.bf16 %v2283_v11, %v2279_v9  ;;  %v2178_v34 = vadd.f32 %v2177_v24, %v1408_v2  ;;  %v5493_v6 = vor.u32 %v6285_v41, %v5490_v0  ;;  %v5481_v9 = vor.u32 %v6284_v3, %v5480_v63  ;;  %v5272_v11 = vld [vmem:[#allocation6 + $0x748] sm:$0xf]  ;;  %v6228_v24 = vld [vmem:[#allocation6 + $0x734] sm:$0xf0]  ;;  %v6194_v0 = vld [vmem:[#allocation6 + $0x62c] sm:$0xf] }
 0x24a   : > { %v2203_v25 = vpop.f32.mrf.mxu0  ;;  %v5257_v12 = vor.u32 %v6228_v24, %v5256_v23  ;;  %v6264_v41 = vld [vmem:[#allocation6 + $0x854] sm:$0xf0]  ;;  %v6242_v3 = vld [vmem:[#allocation6 + $0x7ac] sm:$0xf]  ;;  %v5368_v24 = vld [vmem:[#allocation6 + $0x808] sm:$0xf] }
 0x24b   : > { %3090 = vmatmul.bf16.vlgmr.msra.gmra.mxu2 %v6922_v18  ;;  %3132 = vmatmul.bf16.vlgmr.msrb.gmra.mxu3 %v6918_v32  ;;  %v2204_v36 = vadd.f32 %v2203_v25, %v2190_v28  ;;  %v2192_v47 = vadd.f32 %v2191_v44, %v2178_v34  ;;  %v5448_v25 = vld [vmem:[#allocation6 + $0x8a8] sm:$0xf]  ;;  %v6224_v34 = vld [vmem:[#allocation6 + $0x714] sm:$0xf0] }
 0x24c   : > { %3184 = vmatpush.bf16.msra.mxu3 %v5161_v13  ;;  %3194 = vmatpush.bf16.msra.mxu2 %v5353_v14  ;;  %v2219_v59 = vpop.f32.mrf.mxu1  ;;  %v6232_v13 = vld [vmem:[#allocation6 + $0x754] sm:$0xf0]  ;;  %v5464_v14 = vld [vmem:[#allocation6 + $0x8c8] sm:$0xf]  ;;  %v5241_v43 = vor.u32 %v6224_v34, %v5240_v33  ;;  %v5482_v33 = vld [vmem:[#allocation6 + $0x8f8] sm:$0xf0] }
 0x24d   : > { %v2218_v53 = vadd.f32 %v2217_v22, %v2204_v36  ;;  %3173 = vmatpush.bf16.msrb.mxu1 %v5493_v6  ;;  %v5273_v20 = vor.u32 %v6232_v13, %v5272_v11  ;;  %v5465_v21 = vor.u32 %v6280_v16, %v5464_v14  ;;  %v5197_v22 = vor.u32 %v6210_v17, %v5194_v19  ;;  %v5432_v28 = vld [vmem:[#allocation6 + $0x888] sm:$0xf]  ;;  %v6202_v36 = vld [vmem:[#allocation6 + $0x66c] sm:$0xf]  ;;  %v6260_v11 = vld [vmem:[#allocation6 + $0x834] sm:$0xf0] }
 0x24e   : > { %v5433_v27 = vor.u32 %v6272_v35, %v5432_v28  ;;  %v6190_v13 = vld [vmem:[#allocation6 + $0x60c] sm:$0xf]  ;;  %v5114_v14 = vld [vmem:[#allocation6 + $0x618] sm:$0xf0] }
 0x24f   : > { %v2280_v61 = vmax.f32 %v2218_v53, 0.0  ;;  %v6246_v53 = vld [vmem:[#allocation6 + $0x7cc] sm:$0xf]  ;;  %v5306_v19 = vld [vmem:[#allocation6 + $0x798] sm:$0xf0]  ;;  %v5117_v23 = vor.u32 %v6190_v13, %v5114_v14 }
 0x250   : > { %3185 = vmatpush.bf16.msra.mxu3 %v5145_v26  ;;  %3195 = vmatpush.bf16.msra.mxu2 %v5337_v62  ;;  %v6276_v26 = vld [vmem:[#allocation6 + $0x8b4] sm:$0xf0]  ;;  %v6206_v62 = vld [vmem:[#allocation6 + $0x68c] sm:$0xf]  ;;  %v5402_v14 = vld [vmem:[#allocation6 + $0x858] sm:$0xf0] }
 0x251   : > { %v5449_v55 = vor.u32 %v6276_v26, %v5448_v25  ;;  %v5181_v31 = vor.u32 %v6206_v62, %v5178_v29  ;;  %v6238_v17 = vld [vmem:[#allocation6 + $0x78c] sm:$0xf]  ;;  %v6256_v25 = vld [vmem:[#allocation6 + $0x814] sm:$0xf0]  ;;  %v5608_v29 = vld [vmem:[#allocation6 + $0x9e8] sm:$0xf] }
 0x252   : > { %v2205_v51 = vpop.f32.mrf.mxu0  ;;  %v5309_v62 = vor.u32 %v6238_v17, %v5306_v19  ;;  %v5369_v35 = vor.u32 %v6256_v25, %v5368_v24  ;;  %v6262_v13 = vld [vmem:[#allocation6 + $0x84c] sm:$0xf]  ;;  %v5512_v19 = vld [vmem:[#allocation6 + $0x928] sm:$0xf]  ;;  %v6288_v25 = vld [vmem:[#allocation6 + $0x914] sm:$0xf0] }
 0x253   : > { %v2206_v54 = vadd.f32 %v2205_v51, %v2192_v47  ;;  %v5357_v47 = vor.u32 %v6250_v40, %v5354_v42  ;;  %v5592_v42 = vld [vmem:[#allocation6 + $0x9c8] sm:$0xf]  ;;  %v5405_v17 = vor.u32 %v6262_v13, %v5402_v14  ;;  %v5624_v13 = vld [vmem:[#allocation8 + $0x1b0] sm:$0xf]  ;;  %v6320_v14 = vld [vmem:[#allocation8 + $0x1b4] sm:$0xf0] }
 0x254   : > { %3186 = vmatpush.bf16.msra.mxu3 %v5129_v37  ;;  %3196 = vmatpush.bf16.msra.mxu2 %v5321_v38  ;;  %v5162_v37 = vld [vmem:[#allocation6 + $0x678] sm:$0xf0]  ;;  %v5496_v24 = vld [vmem:[#allocation6 + $0x908] sm:$0xf] }
 0x255   : > { %v2220_v1 = vadd.f32 %v2219_v59, %v2206_v54  ;;  %v5165_v44 = vor.u32 %v6202_v36, %v5162_v37  ;;  %v5338_v54 = vld [vmem:[#allocation6 + $0x7d8] sm:$0xf0] }
 0x256   : > { %v5341_v63 = vor.u32 %v6246_v53, %v5338_v54  ;;  %v6274_v53 = vld [vmem:[#allocation6 + $0x8ac] sm:$0xf]  ;;  %v5450_v54 = vld [vmem:[#allocation6 + $0x8b8] sm:$0xf0] }
 0x257   : > { %v2284_v2 = vmax.f32 %v2220_v1, 0.0  ;;  %v5130_v1 = vld [vmem:[#allocation6 + $0x638] sm:$0xf0] }
 0x258   : > { %3187 = vmatpush.bf16.msra.mxu3 %v5113_v52  ;;  %3197 = vmatpush.bf16.msra.mxu2 %v5305_v56  ;;  %v5417_v56 = vor.u32 %v6268_v48, %v5416_v45  ;;  %v6278_v45 = vld [vmem:[#allocation6 + $0x8cc] sm:$0xf] }
 0x259   : > { %v6926_v15 = vpack.c.bf16 %v2284_v2, %v2280_v61  ;;  %v5401_v61 = vor.u32 %v6264_v41, %v5400_v58  ;;  %v5133_v2 = vor.u32 %v6194_v0, %v5130_v1  ;;  %v5560_v58 = vld [vmem:[#allocation6 + $0x988] sm:$0xf]  ;;  %v6270_v41 = vld [vmem:[#allocation6 + $0x88c] sm:$0xf]  ;;  %v5434_v0 = vld [vmem:[#allocation6 + $0x898] sm:$0xf0] }
 0x25a   : > { %v2245_v38 = vpop.f32.mrf.mxu2 }
 0x25b   : > { %3146 = vmatmul.bf16.vlgmr.msrb.gmra.mxu2 %v6922_v18  ;;  %3188 = vmatmul.bf16.vlgmr.msra.gmra.mxu3 %v6918_v32 }
 0x25c   : > { %3236 = vmatpush.bf16.msrb.mxu3 %v5229_v60  ;;  %3104 = vmatmul.bf16.vlgmr.msra.gmra.mxu0 %v6926_v15 }
 0x25d   : > { %3198 = vmatpush.bf16.msra.mxu2 %v5289_v7  ;;  %3208 = vmatpush.bf16.msra.mxu0 %v5481_v9  ;;  %v5384_v7 = vld [vmem:[#allocation6 + $0x828] sm:$0xf] }
 0x260   : > { %v2231_v39 = vpop.f32.mrf.mxu3  ;;  %3237 = vmatpush.bf16.msrb.mxu3 %v5213_v10  ;;  %v5325_v10 = vor.u32 %v6242_v3, %v5322_v4  ;;  %v5437_v4 = vor.u32 %v6270_v41, %v5434_v0  ;;  %v6326_v41 = vld [vmem:[#allocation8 + $0x1e4] sm:$0xf0] }
 0x261   : > { %3199 = vmatpush.bf16.msra.mxu2 %v5273_v20  ;;  %3209 = vmatpush.bf16.msra.mxu0 %v5465_v21  ;;  %v2232_v46 = vadd.f32 %v2231_v39, %v1409_v30 }
 0x262   : > { %v2247_v6 = vpop.f32.mrf.mxu2 }
 0x263   : > { %v2246_v60 = vadd.f32 %v2245_v38, %v2232_v46  ;;  %v5466_v46 = vld [vmem:[#allocation6 + $0x8d8] sm:$0xf0] }
 0x264   : > { %3238 = vmatpush.bf16.msrb.mxu3 %v5197_v22  ;;  %v2273_v8 = vpop.f32.mrf.mxu1  ;;  %v5385_v22 = vor.u32 %v6260_v11, %v5384_v7  ;;  %v5469_v48 = vor.u32 %v6278_v45, %v5466_v46  ;;  %v6296_v11 = vld [vmem:[#allocation6 + $0x954] sm:$0xf0]  ;;  %v6294_v45 = vld [vmem:[#allocation6 + $0x94c] sm:$0xf]  ;;  %v5530_v46 = vld [vmem:[#allocation6 + $0x958] sm:$0xf0] }
 0x265   : > { %3200 = vmatpush.bf16.msra.mxu2 %v5257_v12  ;;  %3210 = vmatpush.bf16.msra.mxu0 %v5449_v55  ;;  %v6234_v12 = vld [vmem:[#allocation6 + $0x76c] sm:$0xf]  ;;  %v5290_v55 = vld [vmem:[#allocation6 + $0x778] sm:$0xf0] }
 0x266   : > { %v5293_v38 = vor.u32 %v6234_v12, %v5290_v55  ;;  %v5497_v12 = vor.u32 %v6288_v25, %v5496_v24  ;;  %v6342_v24 = vld [vmem:[#allocation8 + $0x264] sm:$0xf0]  ;;  %v6331_v25 = vld [vmem:[#allocation8 + $0x214] sm:$0xf] }
 0x268   : > { %3239 = vmatpush.bf16.msrb.mxu3 %v5181_v31  ;;  %v2233_v51 = vpop.f32.mrf.mxu3  ;;  %v6282_v31 = vld [vmem:[#allocation6 + $0x8ec] sm:$0xf] }
 0x269   : > { %3201 = vmatpush.bf16.msra.mxu2 %v5241_v43  ;;  %3211 = vmatpush.bf16.msra.mxu0 %v5433_v27  ;;  %v2234_v59 = vadd.f32 %v2233_v51, %v1409_v30  ;;  %v6316_v30 = vld [vmem:[#allocation6 + $0x9f4] sm:$0xf0]  ;;  %v5485_v40 = vor.u32 %v6282_v31, %v5482_v33  ;;  %v6230_v27 = vld [vmem:[#allocation6 + $0x74c] sm:$0xf]  ;;  %v5594_v33 = vld [vmem:[#allocation6 + $0x9d8] sm:$0xf0] }
 0x26a   : > { %v2259_v52 = vpop.f32.mrf.mxu0  ;;  %v5609_v36 = vor.u32 %v6316_v30, %v5608_v29  ;;  %v6312_v43 = vld [vmem:[#allocation6 + $0x9d4] sm:$0xf0]  ;;  %v6226_v51 = vld [vmem:[#allocation6 + $0x72c] sm:$0xf]  ;;  %v5610_v30 = vld [vmem:[#allocation6 + $0x9f8] sm:$0xf0] }
 0x26b   : > { %v2260_v5 = vadd.f32 %v2259_v52, %v2246_v60  ;;  %v2248_v9 = vadd.f32 %v2247_v6, %v2234_v59  ;;  %v5258_v52 = vld [vmem:[#allocation6 + $0x738] sm:$0xf0]  ;;  %v6304_v59 = vld [vmem:[#allocation6 + $0x994] sm:$0xf0]  ;;  %v6222_v60 = vld [vmem:[#allocation6 + $0x70c] sm:$0xf] }
 0x26c   : > { %3240 = vmatpush.bf16.msrb.mxu3 %v5165_v44  ;;  %3202 = vmatmul.bf16.vlgmr.msra.gmra.mxu2 %v6922_v18  ;;  %v2275_v21 = vpop.f32.mrf.mxu1  ;;  %v5274_v44 = vld [vmem:[#allocation6 + $0x758] sm:$0xf0]  ;;  %v5561_v1 = vor.u32 %v6304_v59, %v5560_v58  ;;  %v6300_v6 = vld [vmem:[#allocation6 + $0x974] sm:$0xf0]  ;;  %v6314_v29 = vld [vmem:[#allocation6 + $0x9ec] sm:$0xf] }
 0x26d   : > { %3250 = vmatpush.bf16.msrb.mxu2 %v5357_v47  ;;  %3160 = vmatmul.bf16.vlgmr.msrb.gmra.mxu0 %v6926_v15  ;;  %v2274_v20 = vadd.f32 %v2273_v8, %v2260_v5  ;;  %v5593_v8 = vor.u32 %v6312_v43, %v5592_v42  ;;  %v5277_v47 = vor.u32 %v6230_v27, %v5274_v44  ;;  %v5544_v5 = vld [vmem:[#allocation6 + $0x968] sm:$0xf]  ;;  %v6310_v31 = vld [vmem:[#allocation6 + $0x9cc] sm:$0xf]  ;;  %v5546_v27 = vld [vmem:[#allocation6 + $0x978] sm:$0xf0] }
 0x26e   : > { %3212 = vmatpush.bf16.msra.mxu0 %v5417_v56  ;;  %v5577_v56 = vor.u32 %v6308_v50, %v5576_v49  ;;  %v5545_v7 = vor.u32 %v6300_v6, %v5544_v5  ;;  %v5613_v55 = vor.u32 %v6314_v29, %v5610_v30  ;;  %v6298_v43 = vld [vmem:[#allocation6 + $0x96c] sm:$0xf]  ;;  %v5656_v58 = vld [vmem:[#allocation8 + $0x1f0] sm:$0xf]  ;;  %v6328_v59 = vld [vmem:[#allocation8 + $0x1f4] sm:$0xf0] }
 0x26f   : > { %v2281_v34 = vmax.f32 %v2274_v20, 0.0  ;;  %v6292_v20 = vld [vmem:[#allocation6 + $0x934] sm:$0xf0]  ;;  %v5549_v44 = vor.u32 %v6298_v43, %v5546_v27  ;;  %v6286_v50 = vld [vmem:[#allocation6 + $0x90c] sm:$0xf] }
 0x270   : > { %3241 = vmatpush.bf16.msrb.mxu3 %v5149_v57  ;;  %v5453_v57 = vor.u32 %v6274_v53, %v5450_v54  ;;  %v6332_v53 = vld [vmem:[#allocation8 + $0x214] sm:$0xf0]  ;;  %v5704_v30 = vld [vmem:[#allocation8 + $0x250] sm:$0xf]  ;;  %v6362_v43 = vld [vmem:[#allocation8 + $0x304] sm:$0xf0] }
 0x271   : > { %3251 = vmatpush.bf16.msrb.mxu2 %v5341_v63  ;;  %v5242_v63 = vld [vmem:[#allocation6 + $0x718] sm:$0xf0]  ;;  %v6348_v5 = vld [vmem:[#allocation8 + $0x294] sm:$0xf0]  ;;  %v6327_v27 = vld [vmem:[#allocation8 + $0x1f4] sm:$0xf] }
 0x272   : > { %v2261_v16 = vpop.f32.mrf.mxu0  ;;  %3213 = vmatpush.bf16.msra.mxu0 %v5401_v61  ;;  %v5245_v3 = vor.u32 %v6222_v60, %v5242_v63  ;;  %v6266_v61 = vld [vmem:[#allocation6 + $0x86c] sm:$0xf]  ;;  %v5657_v60 = vor.u32 %v6328_v59, %v5656_v58  ;;  %v5648_v63 = vld [vmem:[#allocation8 + $0x1e0] sm:$0xf]  ;;  %v6358_v59 = vld [vmem:[#allocation8 + $0x2e4] sm:$0xf0] }
 0x273   : > { %v2262_v39 = vadd.f32 %v2261_v16, %v2248_v9  ;;  %v5649_v0 = vor.u32 %v6326_v41, %v5648_v63  ;;  %v5642_v63 = vld [vmem:[#allocation8 + $0x1d8] sm:$0xf0] }
 0x274   : > { %3242 = vmatpush.bf16.msrb.mxu3 %v5133_v2  ;;  %v5418_v2 = vld [vmem:[#allocation6 + $0x878] sm:$0xf0] }
 0x275   : > { %v2276_v26 = vadd.f32 %v2275_v21, %v2262_v39  ;;  %3252 = vmatpush.bf16.msrb.mxu2 %v5325_v10  ;;  %v5421_v9 = vor.u32 %v6266_v61, %v5418_v2  ;;  %v5528_v10 = vld [vmem:[#allocation6 + $0x948] sm:$0xf]  ;;  %v6258_v39 = vld [vmem:[#allocation6 + $0x82c] sm:$0xf]  ;;  %v5386_v21 = vld [vmem:[#allocation6 + $0x838] sm:$0xf0] }
 0x276   : > { %3214 = vmatpush.bf16.msra.mxu0 %v5385_v22  ;;  %v5529_v16 = vor.u32 %v6296_v11, %v5528_v10  ;;  %v5513_v22 = vor.u32 %v6292_v20, %v5512_v19  ;;  %v5632_v61 = vld [vmem:[#allocation8 + $0x1c0] sm:$0xf]  ;;  %v6322_v2 = vld [vmem:[#allocation8 + $0x1c4] sm:$0xf0]  ;;  %v6344_v19 = vld [vmem:[#allocation8 + $0x274] sm:$0xf0] }
 0x277   : > { %v2285_v28 = vmax.f32 %v2276_v26, 0.0  ;;  %v6254_v26 = vld [vmem:[#allocation6 + $0x80c] sm:$0xf]  ;;  %v6346_v10 = vld [vmem:[#allocation8 + $0x284] sm:$0xf0] }
 0x278   : > { %3243 = vmatpush.bf16.msrb.mxu3 %v5117_v23  ;;  %v5389_v23 = vor.u32 %v6258_v39, %v5386_v21  ;;  %v5616_v39 = vld [vmem:[#allocation8 + $0x1a0] sm:$0xf]  ;;  %v6318_v21 = vld [vmem:[#allocation8 + $0x1a4] sm:$0xf0] }
 0x279   : > { %v6934_v37 = vpack.c.bf16 %v2285_v28, %v2281_v34  ;;  %3253 = vmatpush.bf16.msrb.mxu2 %v5309_v62  ;;  %v5370_v62 = vld [vmem:[#allocation6 + $0x818] sm:$0xf0]  ;;  %v5597_v34 = vor.u32 %v6310_v31, %v5594_v33  ;;  %v6306_v28 = vld [vmem:[#allocation6 + $0x9ac] sm:$0xf]  ;;  %v6364_v31 = vld [vmem:[#allocation8 + $0x314] sm:$0xf0] }
 0x27a   : > { %3215 = vmatpush.bf16.msra.mxu0 %v5369_v35  ;;  %v5578_v35 = vld [vmem:[#allocation6 + $0x9b8] sm:$0xf0]  ;;  %v6329_v33 = vld [vmem:[#allocation8 + $0x204] sm:$0xf] }
 0x27b   : > { %3118 = vmatmul.bf16.vlgmr.msra.gmra.mxu1 %v6934_v37  ;;  %3244 = vmatmul.bf16.vlgmr.msrb.gmra.mxu3 %v6918_v32  ;;  %v5261_v32 = vor.u32 %v6226_v51, %v5258_v52  ;;  %v5672_v52 = vld [vmem:[#allocation8 + $0x210] sm:$0xf] }
 0x27c   : > { %3222 = vmatpush.bf16.msra.mxu1 %v5609_v36  ;;  %v5581_v36 = vor.u32 %v6306_v28, %v5578_v35  ;;  %v5673_v54 = vor.u32 %v6332_v53, %v5672_v52 }
 0x27d   : > { %3254 = vmatpush.bf16.msrb.mxu2 %v5293_v38  ;;  %3216 = vmatmul.bf16.vlgmr.msra.gmra.mxu0 %v6926_v15  ;;  %v6302_v38 = vld [vmem:[#allocation6 + $0x98c] sm:$0xf] }
 0x27e   : > { %3264 = vmatpush.bf16.msrb.mxu0 %v5485_v40  ;;  %v5562_v40 = vld [vmem:[#allocation6 + $0x998] sm:$0xf0]  ;;  %3694 = vmatpush.bf16.msra.mxu3 %v5673_v54  ;;  %v5680_v54 = vld [vmem:[#allocation8 + $0x220] sm:$0xf] }
 0x27f   : > { %v5565_v42 = vor.u32 %v6302_v38, %v5562_v40  ;;  %v6338_v38 = vld [vmem:[#allocation8 + $0x244] sm:$0xf0] }
 0x280   : > { %3223 = vmatpush.bf16.msra.mxu1 %v5593_v8  ;;  %v5533_v8 = vor.u32 %v6294_v45, %v5530_v46  ;;  %v5658_v45 = vld [vmem:[#allocation8 + $0x1f8] sm:$0xf0] }
 0x281   : > { %3255 = vmatpush.bf16.msrb.mxu2 %v5277_v47  ;;  %v6290_v47 = vld [vmem:[#allocation6 + $0x92c] sm:$0xf]  ;;  %v5661_v46 = vor.u32 %v6327_v27, %v5658_v45  ;;  %v6380_v27 = vld [vmem:[#allocation8 + $0x394] sm:$0xf0]  ;;  %v5706_v45 = vld [vmem:[#allocation8 + $0x258] sm:$0xf0] }
 0x282   : > { %3265 = vmatpush.bf16.msrb.mxu0 %v5469_v48  ;;  %v5514_v48 = vld [vmem:[#allocation6 + $0x938] sm:$0xf0] }
 0x283   : > { %v5517_v49 = vor.u32 %v6290_v47, %v5514_v48  ;;  %v6336_v47 = vld [vmem:[#allocation8 + $0x234] sm:$0xf0]  ;;  %v5784_v48 = vld [vmem:[#allocation8 + $0x2f0] sm:$0xf] }
 0x284   : > { %3224 = vmatpush.bf16.msra.mxu1 %v5577_v56  ;;  %v5664_v56 = vld [vmem:[#allocation8 + $0x200] sm:$0xf] }
 0x285   : > { %3256 = vmatpush.bf16.msrb.mxu2 %v5261_v32  ;;  %v6330_v32 = vld [vmem:[#allocation8 + $0x204] sm:$0xf0] }
 0x286   : > { %3266 = vmatpush.bf16.msrb.mxu0 %v5453_v57  ;;  %v5665_v57 = vor.u32 %v6330_v32, %v5664_v56  ;;  %v6334_v56 = vld [vmem:[#allocation8 + $0x224] sm:$0xf0]  ;;  %v5776_v32 = vld [vmem:[#allocation8 + $0x2e0] sm:$0xf] }
 0x287   : > { %v5681_v58 = vor.u32 %v6334_v56, %v5680_v54  ;;  %v5777_v41 = vor.u32 %v6358_v59, %v5776_v32  ;;  %v6337_v56 = vld [vmem:[#allocation8 + $0x244] sm:$0xf]  ;;  %v5698_v32 = vld [vmem:[#allocation8 + $0x248] sm:$0xf0] }
 0x288   : > { %3225 = vmatpush.bf16.msra.mxu1 %v5561_v1  ;;  %3695 = vmatpush.bf16.msra.mxu3 %v5665_v57  ;;  %v5640_v1 = vld [vmem:[#allocation8 + $0x1d0] sm:$0xf] }
 0x289   : > { %3257 = vmatpush.bf16.msrb.mxu2 %v5245_v3  ;;  %v6324_v3 = vld [vmem:[#allocation8 + $0x1d4] sm:$0xf0] }
 0x28a   : > { %3267 = vmatpush.bf16.msrb.mxu0 %v5437_v4  ;;  %v5736_v4 = vld [vmem:[#allocation8 + $0x290] sm:$0xf] }
 0x28b   : > { %3174 = vmatmul.bf16.vlgmr.msrb.gmra.mxu1 %v6934_v37  ;;  %v5737_v6 = vor.u32 %v6348_v5, %v5736_v4  ;;  %v5768_v5 = vld [vmem:[#allocation8 + $0x2d0] sm:$0xf] }
 0x28c   : > { %3226 = vmatpush.bf16.msra.mxu1 %v5545_v7  ;;  %3258 = vmatmul.bf16.vlgmr.msrb.gmra.mxu2 %v6922_v18  ;;  %v5373_v18 = vor.u32 %v6254_v26, %v5370_v62  ;;  %v5728_v7 = vld [vmem:[#allocation8 + $0x280] sm:$0xf]  ;;  %v5674_v26 = vld [vmem:[#allocation8 + $0x218] sm:$0xf0] }
 0x28d   : > { %3696 = vmatpush.bf16.msra.mxu3 %v5657_v60  ;;  %3708 = vmatpush.bf16.msra.mxu2 %v5737_v6  ;;  %v5729_v11 = vor.u32 %v6346_v10, %v5728_v7  ;;  %v5677_v29 = vor.u32 %v6331_v25, %v5674_v26  ;;  %v6323_v60 = vld [vmem:[#allocation8 + $0x1d4] sm:$0xf]  ;;  %v6356_v6 = vld [vmem:[#allocation8 + $0x2d4] sm:$0xf0]  ;;  %v6321_v7 = vld [vmem:[#allocation8 + $0x1c4] sm:$0xf] }
 0x28e   : > { %3268 = vmatpush.bf16.msrb.mxu0 %v5421_v9  ;;  %v5633_v9 = vor.u32 %v6322_v2, %v5632_v61  ;;  %v5769_v2 = vor.u32 %v6356_v6, %v5768_v5  ;;  %v6345_v10 = vld [vmem:[#allocation8 + $0x284] sm:$0xf]  ;;  %v6950_v26 = vld [vmem:[#allocation9 + $0xa] sm:$0xf] }
 0x290   : > { %3227 = vmatpush.bf16.msra.mxu1 %v5529_v16  ;;  %v5720_v16 = vld [vmem:[#allocation8 + $0x270] sm:$0xf] }
 0x291   : > { %3697 = vmatpush.bf16.msra.mxu3 %v5649_v0  ;;  %3709 = vmatpush.bf16.msra.mxu2 %v5729_v11  ;;  %v5721_v20 = vor.u32 %v6344_v19, %v5720_v16  ;;  %v5645_v0 = vor.u32 %v6323_v60, %v5642_v63  ;;  %v5760_v16 = vld [vmem:[#allocation8 + $0x2c0] sm:$0xf]  ;;  %v5701_v63 = vor.u32 %v6337_v56, %v5698_v32 }
 0x292   : > { %3269 = vmatpush.bf16.msrb.mxu0 %v5405_v17  ;;  %v5625_v17 = vor.u32 %v6320_v14, %v5624_v13  ;;  %v5730_v13 = vld [vmem:[#allocation8 + $0x288] sm:$0xf0] }
 0x293   : > { %v5733_v14 = vor.u32 %v6345_v10, %v5730_v13  ;;  %v6359_v10 = vld [vmem:[#allocation8 + $0x2f4] sm:$0xf] }
 0x294   : > { %3228 = vmatpush.bf16.msra.mxu1 %v5513_v22  ;;  %v5712_v22 = vld [vmem:[#allocation8 + $0x260] sm:$0xf] }
 0x295   : > { %3710 = vmatpush.bf16.msra.mxu2 %v5721_v20  ;;  %v5713_v62 = vor.u32 %v6342_v24, %v5712_v22  ;;  %v6319_v20 = vld [vmem:[#allocation8 + $0x1b4] sm:$0xf] }
 0x296   : > { %3270 = vmatpush.bf16.msrb.mxu0 %v5389_v23  ;;  %v5617_v23 = vor.u32 %v6318_v21, %v5616_v39  ;;  %v5626_v39 = vld [vmem:[#allocation8 + $0x1b8] sm:$0xf0]  ;;  %v6343_v21 = vld [vmem:[#allocation8 + $0x274] sm:$0xf] }
 0x297   : > { %v5629_v22 = vor.u32 %v6319_v20, %v5626_v39  ;;  %v5840_v20 = vld [vmem:[#allocation8 + $0x360] sm:$0xf]  ;;  %v6374_v39 = vld [vmem:[#allocation8 + $0x364] sm:$0xf0] }
 0x298   : > { %3229 = vmatpush.bf16.msra.mxu1 %v5497_v12  ;;  %v6340_v12 = vld [vmem:[#allocation8 + $0x254] sm:$0xf0] }
 0x299   : > { %3711 = vmatpush.bf16.msra.mxu2 %v5713_v62  ;;  %v5752_v62 = vld [vmem:[#allocation8 + $0x2b0] sm:$0xf] }
 0x29a   : > { %3271 = vmatpush.bf16.msrb.mxu0 %v5373_v18  ;;  %v5800_v18 = vld [vmem:[#allocation8 + $0x310] sm:$0xf] }
 0x29b   : > { %3230 = vmatmul.bf16.vlgmr.msra.gmra.mxu1 %v6934_v37  ;;  %v5801_v28 = vor.u32 %v6364_v31, %v5800_v18  ;;  %v6317_v18 = vld [vmem:[#allocation8 + $0x1a4] sm:$0xf] }
 0x29c   : > { %3278 = vmatpush.bf16.msrb.mxu1 %v5613_v55  ;;  %v5705_v55 = vor.u32 %v6340_v12, %v5704_v30  ;;  %v6341_v31 = vld [vmem:[#allocation8 + $0x264] sm:$0xf] }
 0x29d   : > { %3272 = vmatmul.bf16.vlgmr.msrb.gmra.mxu0 %v6926_v15  ;;  %v5498_v15 = vld [vmem:[#allocation6 + $0x918] sm:$0xf0] }
 0x29e   : > { %v5501_v51 = vor.u32 %v6286_v50, %v5498_v15  ;;  %3712 = vmatpush.bf16.msra.mxu2 %v5705_v55  ;;  %3722 = vmatpush.bf16.msra.mxu0 %v5801_v28  ;;  %v6360_v50 = vld [vmem:[#allocation8 + $0x2f4] sm:$0xf0]  ;;  %v6325_v15 = vld [vmem:[#allocation8 + $0x1e4] sm:$0xf]  ;;  %v5618_v55 = vld [vmem:[#allocation8 + $0x1a8] sm:$0xf0] }
 0x29f   : > { %v5785_v52 = vor.u32 %v6360_v50, %v5784_v48  ;;  %v2420_v28 = vperm.slane %v6950_v26, 0  ;;  %v5802_v48 = vld [vmem:[#allocation8 + $0x318] sm:$0xf0] }
 0x2a0   : > { %3279 = vmatpush.bf16.msrb.mxu1 %v5597_v34  ;;  %v5666_v34 = vld [vmem:[#allocation8 + $0x208] sm:$0xf0] }
 0x2a1   : > { %v5669_v35 = vor.u32 %v6329_v33, %v5666_v34  ;;  %v5621_v33 = vor.u32 %v6317_v18, %v5618_v55  ;;  %v5714_v34 = vld [vmem:[#allocation8 + $0x268] sm:$0xf0]  ;;  %v2421_v18 = vperm.slane %v6950_v26, 1 }
 0x2a4   : > { %3280 = vmatpush.bf16.msrb.mxu1 %v5581_v36  ;;  %v5696_v36 = vld [vmem:[#allocation8 + $0x240] sm:$0xf] }
 0x2a5   : > { %v5697_v40 = vor.u32 %v6338_v38, %v5696_v36  ;;  %v5717_v36 = vor.u32 %v6341_v31, %v5714_v34  ;;  %v5744_v38 = vld [vmem:[#allocation8 + $0x2a0] sm:$0xf]  ;;  %v5832_v31 = vld [vmem:[#allocation8 + $0x350] sm:$0xf] }
 0x2a7   : > { %3713 = vmatpush.bf16.msra.mxu2 %v5697_v40  ;;  %v6350_v40 = vld [vmem:[#allocation8 + $0x2a4] sm:$0xf0] }
 0x2a8   : > { %3281 = vmatpush.bf16.msrb.mxu1 %v5565_v42  ;;  %v5792_v42 = vld [vmem:[#allocation8 + $0x300] sm:$0xf] }
 0x2ac   : > { %3282 = vmatpush.bf16.msrb.mxu1 %v5549_v44  ;;  %v5793_v44 = vor.u32 %v6362_v43, %v5792_v42  ;;  %v5864_v42 = vld [vmem:[#allocation8 + $0x390] sm:$0xf]  ;;  %v5745_v43 = vor.u32 %v6350_v40, %v5744_v38  ;;  %v5824_v40 = vld [vmem:[#allocation8 + $0x340] sm:$0xf] }
 0x2ae   : > { %3723 = vmatpush.bf16.msra.mxu0 %v5793_v44  ;;  %v6339_v44 = vld [vmem:[#allocation8 + $0x254] sm:$0xf] }
 0x2b0   : > { %3283 = vmatpush.bf16.msrb.mxu1 %v5533_v8  ;;  %v5688_v8 = vld [vmem:[#allocation8 + $0x230] sm:$0xf] }
 0x2b2   : > { %3724 = vmatpush.bf16.msra.mxu0 %v5785_v52  ;;  %v6378_v52 = vld [vmem:[#allocation8 + $0x384] sm:$0xf0] }
 0x2b4   : > { %3284 = vmatpush.bf16.msrb.mxu1 %v5517_v49  ;;  %v5689_v49 = vor.u32 %v6336_v47, %v5688_v8  ;;  %v5709_v8 = vor.u32 %v6339_v44, %v5706_v45  ;;  %v6363_v47 = vld [vmem:[#allocation8 + $0x314] sm:$0xf]  ;;  %v5762_v45 = vld [vmem:[#allocation8 + $0x2c8] sm:$0xf0] }
 0x2b5   : > { %v5805_v50 = vor.u32 %v6363_v47, %v5802_v48  ;;  %v5816_v48 = vld [vmem:[#allocation8 + $0x330] sm:$0xf] }
 0x2b6   : > { %3714 = vmatpush.bf16.msra.mxu2 %v5689_v49  ;;  %3725 = vmatpush.bf16.msra.mxu0 %v5777_v41  ;;  %v5794_v41 = vld [vmem:[#allocation8 + $0x308] sm:$0xf0] }
 0x2b8   : > { %3285 = vmatpush.bf16.msrb.mxu1 %v5501_v51  ;;  %v5650_v51 = vld [vmem:[#allocation8 + $0x1e8] sm:$0xf0] }
 0x2b9   : > { %v5653_v53 = vor.u32 %v6325_v15, %v5650_v51  ;;  %v5856_v51 = vld [vmem:[#allocation8 + $0x380] sm:$0xf] }
 0x2ba   : > { %3715 = vmatpush.bf16.msra.mxu2 %v5681_v58  ;;  %3726 = vmatpush.bf16.msra.mxu0 %v5769_v2  ;;  %v5857_v54 = vor.u32 %v6378_v52, %v5856_v51  ;;  %v6361_v58 = vld [vmem:[#allocation8 + $0x304] sm:$0xf]  ;;  %v6351_v51 = vld [vmem:[#allocation8 + $0x2b4] sm:$0xf]  ;;  %v5754_v52 = vld [vmem:[#allocation8 + $0x2b8] sm:$0xf0] }
 0x2bb   : > { %3286 = vmatmul.bf16.vlgmr.msrb.gmra.mxu1 %v6934_v37  ;;  %v5641_v37 = vor.u32 %v6324_v3, %v5640_v1  ;;  %v6347_v1 = vld [vmem:[#allocation8 + $0x294] sm:$0xf]  ;;  %v5738_v3 = vld [vmem:[#allocation8 + $0x298] sm:$0xf0] }
 0x2bd   : > { %3698 = vmatpush.bf16.msra.mxu3 %v5641_v37  ;;  %v5741_v37 = vor.u32 %v6347_v1, %v5738_v3  ;;  %v6376_v3 = vld [vmem:[#allocation8 + $0x374] sm:$0xf0] }
 0x2be   : > { %v6944_v57 = vpop.f32.mrf.mxu3 }
 0x2bf   : > { %3764 = vmatpush.bf16.msrb.mxu2 %v5741_v37  ;;  %v3078_v15 = vadd.f32 %v6944_v57, %v2420_v28  ;;  %v5797_v57 = vor.u32 %v6361_v58, %v5794_v41 }
 0x2c1   : > { %3699 = vmatpush.bf16.msra.mxu3 %v5633_v9  ;;  %v5634_v9 = vld [vmem:[#allocation8 + $0x1c8] sm:$0xf0] }
 0x2c2   : > { %v5637_v11 = vor.u32 %v6321_v7, %v5634_v9  ;;  %v6335_v7 = vld [vmem:[#allocation8 + $0x234] sm:$0xf]  ;;  %v5690_v9 = vld [vmem:[#allocation8 + $0x238] sm:$0xf0] }
 0x2c3   : > { %3765 = vmatpush.bf16.msrb.mxu2 %v5733_v14  ;;  %v5786_v14 = vld [vmem:[#allocation8 + $0x2f8] sm:$0xf0] }
 0x2c5   : > { %3700 = vmatpush.bf16.msra.mxu3 %v5625_v17  ;;  %v6354_v17 = vld [vmem:[#allocation8 + $0x2c4] sm:$0xf0] }
 0x2c6   : > { %v5761_v19 = vor.u32 %v6354_v17, %v5760_v16  ;;  %v3079_v24 = vpop.f32.mrf.mxu3  ;;  %v5789_v17 = vor.u32 %v6359_v10, %v5786_v14 }
 0x2c7   : > { %v3080_v59 = vadd.f32 %v3079_v24, %v2420_v28 }
 0x2c8   : > { %3727 = vmatpush.bf16.msra.mxu0 %v5761_v19 }
 0x2c9   : > { %3701 = vmatpush.bf16.msra.mxu3 %v5617_v23  ;;  %v5722_v23 = vld [vmem:[#allocation8 + $0x278] sm:$0xf0] }
 0x2ca   : > { %v5725_v25 = vor.u32 %v6343_v21, %v5722_v23  ;;  %v6333_v21 = vld [vmem:[#allocation8 + $0x224] sm:$0xf] }
 0x2cb   : > { %v6357_v23 = vld [vmem:[#allocation8 + $0x2e4] sm:$0xf] }
 0x2cc   : > { %3766 = vmatpush.bf16.msrb.mxu2 %v5725_v25 }
 0x2cd   : > { %3750 = vmatpush.bf16.msrb.mxu3 %v5677_v29  ;;  %v6352_v29 = vld [vmem:[#allocation8 + $0x2b4] sm:$0xf0] }
 0x2ce   : > { %v6946_v4 = vpop.f32.mrf.mxu2  ;;  %v5753_v12 = vor.u32 %v6352_v29, %v5752_v62  ;;  %v5778_v29 = vld [vmem:[#allocation8 + $0x2e8] sm:$0xf0] }
 0x2cf   : > { %v3092_v60 = vadd.f32 %v6946_v4, %v3078_v15  ;;  %v5693_v4 = vor.u32 %v6335_v7, %v5690_v9  ;;  %v6379_v7 = vld [vmem:[#allocation8 + $0x394] sm:$0xf] }
 0x2d0   : > { %3728 = vmatpush.bf16.msra.mxu0 %v5753_v12  ;;  %3767 = vmatpush.bf16.msrb.mxu2 %v5717_v36  ;;  %v5781_v12 = vor.u32 %v6357_v23, %v5778_v29  ;;  %v5770_v36 = vld [vmem:[#allocation8 + $0x2d8] sm:$0xf0] }
 0x2d1   : > { %3751 = vmatpush.bf16.msrb.mxu3 %v5669_v35  ;;  %v5850_v23 = vld [vmem:[#allocation8 + $0x378] sm:$0xf0] }
 0x2d4   : > { %3729 = vmatpush.bf16.msra.mxu0 %v5745_v43  ;;  %3768 = vmatpush.bf16.msrb.mxu2 %v5709_v8  ;;  %v6353_v43 = vld [vmem:[#allocation8 + $0x2c4] sm:$0xf] }
 0x2d5   : > { %3752 = vmatpush.bf16.msrb.mxu3 %v5661_v46  ;;  %v5865_v46 = vor.u32 %v6380_v27, %v5864_v42  ;;  %v6370_v42 = vld [vmem:[#allocation8 + $0x344] sm:$0xf0]  ;;  %v5765_v47 = vor.u32 %v6353_v43, %v5762_v45 }
 0x2d6   : > { %v3093_v30 = vpop.f32.mrf.mxu2  ;;  %v5825_v8 = vor.u32 %v6370_v42, %v5824_v40 }
 0x2d7   : > { %3736 = vmatpush.bf16.msra.mxu1 %v5865_v46  ;;  %v3094_v37 = vadd.f32 %v3093_v30, %v3080_v59  ;;  %v5757_v59 = vor.u32 %v6351_v51, %v5754_v52 }
 0x2d8   : > { %3778 = vmatpush.bf16.msrb.mxu0 %v5805_v50  ;;  %3769 = vmatpush.bf16.msrb.mxu2 %v5701_v63  ;;  %v6366_v63 = vld [vmem:[#allocation8 + $0x324] sm:$0xf0] }
 0x2d9   : > { %3753 = vmatpush.bf16.msrb.mxu3 %v5653_v53  ;;  %v6948_v61 = vpop.f32.mrf.mxu0  ;;  %v6954_v53 = vpop.f32.mrf.mxu3 }
 0x2da   : > { %v3106_v5 = vadd.f32 %v6948_v61, %v3092_v60  ;;  %v5841_v61 = vor.u32 %v6374_v39, %v5840_v20  ;;  %v3134_v46 = vadd.f32 %v6954_v53, %v2421_v18  ;;  %v5808_v60 = vld [vmem:[#allocation8 + $0x320] sm:$0xf] }
 0x2db   : > { %3737 = vmatpush.bf16.msra.mxu1 %v5857_v54 }
 0x2dc   : > { %3779 = vmatpush.bf16.msrb.mxu0 %v5797_v57  ;;  %3770 = vmatpush.bf16.msrb.mxu2 %v5693_v4  ;;  %v2422_v4 = vperm.slane %v6950_v26, 2 }
 0x2dd   : > { %3754 = vmatpush.bf16.msrb.mxu3 %v5645_v0  ;;  %v5848_v0 = vld [vmem:[#allocation8 + $0x370] sm:$0xf] }
 0x2de   : > { %v3147_v1 = vpop.f32.mrf.mxu2  ;;  %v5849_v6 = vor.u32 %v6376_v3, %v5848_v0 }
 0x2df   : > { %v3148_v15 = vadd.f32 %v3147_v1, %v3134_v46  ;;  %v6349_v1 = vld [vmem:[#allocation8 + $0x2a4] sm:$0xf] }
 0x2e0   : > { %3738 = vmatpush.bf16.msra.mxu1 %v5849_v6  ;;  %3780 = vmatpush.bf16.msrb.mxu0 %v5789_v17  ;;  %v5746_v6 = vld [vmem:[#allocation8 + $0x2a8] sm:$0xf0] }
 0x2e1   : > { %3755 = vmatpush.bf16.msrb.mxu3 %v5637_v11  ;;  %v3107_v35 = vpop.f32.mrf.mxu0  ;;  %v3135_v30 = vpop.f32.mrf.mxu3  ;;  %v5749_v10 = vor.u32 %v6349_v1, %v5746_v6  ;;  %v5858_v17 = vld [vmem:[#allocation8 + $0x388] sm:$0xf0] }
 0x2e2   : > { %v3108_v11 = vadd.f32 %v3107_v35, %v3094_v37  ;;  %v6355_v35 = vld [vmem:[#allocation8 + $0x2d4] sm:$0xf]  ;;  %v3136_v50 = vadd.f32 %v3135_v30, %v2421_v18  ;;  %v5809_v37 = vor.u32 %v6366_v63, %v5808_v60  ;;  %v6373_v18 = vld [vmem:[#allocation8 + $0x364] sm:$0xf] }
 0x2e3   : > { %v5773_v38 = vor.u32 %v6355_v35, %v5770_v36  ;;  %v6371_v36 = vld [vmem:[#allocation8 + $0x354] sm:$0xf] }
 0x2e4   : > { %3739 = vmatpush.bf16.msra.mxu1 %v5841_v61  ;;  %3781 = vmatpush.bf16.msrb.mxu0 %v5781_v12 }
 0x2e5   : > { %3756 = vmatpush.bf16.msrb.mxu3 %v5629_v22  ;;  %v5682_v22 = vld [vmem:[#allocation8 + $0x228] sm:$0xf0] }
 0x2e6   : > { %v5685_v62 = vor.u32 %v6333_v21, %v5682_v22  ;;  %v3149_v34 = vpop.f32.mrf.mxu2  ;;  %v6375_v22 = vld [vmem:[#allocation8 + $0x374] sm:$0xf] }
 0x2e7   : > { %v3150_v54 = vadd.f32 %v3149_v34, %v3136_v50  ;;  %v6365_v50 = vld [vmem:[#allocation8 + $0x324] sm:$0xf] }
 0x2e8   : > { %3771 = vmatpush.bf16.msrb.mxu2 %v5685_v62  ;;  %3782 = vmatpush.bf16.msrb.mxu0 %v5773_v38  ;;  %v5853_v62 = vor.u32 %v6375_v22, %v5850_v23  ;;  %v5834_v38 = vld [vmem:[#allocation8 + $0x358] sm:$0xf0]  ;;  %v5932_v22 = vld [vmem:[#allocation8 + $0x490] sm:$0xf] }
 0x2e9   : > { %3757 = vmatpush.bf16.msrb.mxu3 %v5621_v33  ;;  %v6372_v33 = vld [vmem:[#allocation8 + $0x354] sm:$0xf0]  ;;  %v3189_v58 = vpop.f32.mrf.mxu3  ;;  %v5837_v43 = vor.u32 %v6371_v36, %v5834_v38  ;;  %v5872_v38 = vld [vmem:[#allocation8 + $0x3a0] sm:$0xf] }
 0x2ea   : > { %v3161_v2 = vpop.f32.mrf.mxu0  ;;  %v5833_v28 = vor.u32 %v6372_v33, %v5832_v31  ;;  %v3190_v61 = vadd.f32 %v3189_v58, %v2422_v4  ;;  %v5842_v31 = vld [vmem:[#allocation8 + $0x368] sm:$0xf0] }
 0x2eb   : > { %v3162_v56 = vadd.f32 %v3161_v2, %v3148_v15  ;;  %v5810_v15 = vld [vmem:[#allocation8 + $0x328] sm:$0xf0] }
 0x2ec   : > { %3740 = vmatpush.bf16.msra.mxu1 %v5833_v28  ;;  %3783 = vmatpush.bf16.msrb.mxu0 %v5765_v47  ;;  %v5818_v47 = vld [vmem:[#allocation8 + $0x338] sm:$0xf0]  ;;  %v5813_v52 = vor.u32 %v6365_v50, %v5810_v15 }
 0x2ef   : > { %v3203_v0 = vpop.f32.mrf.mxu2 }
 0x2f0   : > { %3741 = vmatpush.bf16.msra.mxu1 %v5825_v8  ;;  %3784 = vmatpush.bf16.msrb.mxu0 %v5757_v59  ;;  %v6367_v8 = vld [vmem:[#allocation8 + $0x334] sm:$0xf] }
 0x2f1   : > { %v3191_v20 = vpop.f32.mrf.mxu3 }
 0x2f2   : > { %v3163_v27 = vpop.f32.mrf.mxu0 }
 0x2f3   : > { %v3164_v53 = vadd.f32 %v3163_v27, %v3150_v54  ;;  %v6369_v27 = vld [vmem:[#allocation8 + $0x344] sm:$0xf] }
 0x2f4   : > { %3785 = vmatpush.bf16.msrb.mxu0 %v5749_v10 }
 0x2f7   : > { %v3205_v21 = vpop.f32.mrf.mxu2 }
 0x2f8   : > { %v3119_v49 = vpop.f32.mrf.mxu1 }
 0x2f9   : > { %v3120_v13 = vadd.f32 %v3119_v49, %v3106_v5  ;;  %v6368_v49 = vld [vmem:[#allocation8 + $0x334] sm:$0xf0] }
 0x2fa   : > { %v5817_v32 = vor.u32 %v6368_v49, %v5816_v48  ;;  %v3217_v5 = vpop.f32.mrf.mxu0  ;;  %v5821_v48 = vor.u32 %v6367_v8, %v5818_v47  ;;  %v5912_v47 = vld [vmem:[#allocation8 + $0x440] sm:$0xf] }
 0x2fb   : > { %v3292_v24 = vmax.f32 %v3120_v13, 0.0 }
 0x2fc   : > { %3742 = vmatpush.bf16.msra.mxu1 %v5817_v32 }
 0x2fe   : > { %v3245_v49 = vpop.f32.mrf.mxu3 }
 0x300   : > { %v3121_v16 = vpop.f32.mrf.mxu1  ;;  %3743 = vmatpush.bf16.msra.mxu1 %v5809_v37 }
 0x301   : > { %v3122_v19 = vadd.f32 %v3121_v16, %v3108_v11  ;;  %v5866_v11 = vld [vmem:[#allocation8 + $0x398] sm:$0xf0]  ;;  %v6377_v16 = vld [vmem:[#allocation8 + $0x384] sm:$0xf] }
 0x302   : > { %v5869_v13 = vor.u32 %v6379_v7, %v5866_v11  ;;  %v3219_v29 = vpop.f32.mrf.mxu0  ;;  %v5896_v11 = vld [vmem:[#allocation8 + $0x400] sm:$0xf] }
 0x303   : > { %v3296_v25 = vmax.f32 %v3122_v19, 0.0  ;;  %v5861_v19 = vor.u32 %v6377_v16, %v5858_v17  ;;  %v6386_v16 = vld [vmem:[#allocation8 + $0x3f4] sm:$0xf0] }
 0x304   : > { %3792 = vmatpush.bf16.msrb.mxu1 %v5869_v13  ;;  %v6387_v13 = vld [vmem:[#allocation8 + $0x404] sm:$0xf0] }
 0x305   : > { %v3300_v55 = vpack.c.bf16 %v3296_v25, %v3292_v24  ;;  %v3192_v24 = vadd.f32 %v3191_v20, %v2422_v4  ;;  %v3204_v25 = vadd.f32 %v3203_v0, %v3190_v61  ;;  %v5897_v4 = vor.u32 %v6387_v13, %v5896_v11  ;;  %v6385_v20 = vld [vmem:[#allocation8 + $0x3e4] sm:$0xf0]  ;;  %v5884_v61 = vld [vmem:[#allocation8 + $0x3d0] sm:$0xf] }
 0x306   : > { %v3247_v32 = vpop.f32.mrf.mxu3 }
 0x307   : > { %3702 = vmatmul.bf16.vlgmr.msra.gmra.mxu3 %v3300_v55  ;;  %v3206_v30 = vadd.f32 %v3205_v21, %v3192_v24  ;;  %v3218_v12 = vadd.f32 %v3217_v5, %v3204_v25  ;;  %v6384_v21 = vld [vmem:[#allocation8 + $0x3d4] sm:$0xf0] }
 0x308   : > { %v3175_v44 = vpop.f32.mrf.mxu1  ;;  %3793 = vmatpush.bf16.msrb.mxu1 %v5861_v19  ;;  %v5888_v19 = vld [vmem:[#allocation8 + $0x3e0] sm:$0xf]  ;;  %v5885_v23 = vor.u32 %v6384_v21, %v5884_v61  ;;  %v6396_v24 = vld [vmem:[#allocation8 + $0x494] sm:$0xf0] }
 0x309   : > { %v3176_v41 = vadd.f32 %v3175_v44, %v3162_v56  ;;  %v3220_v33 = vadd.f32 %v3219_v29, %v3206_v30  ;;  %v5826_v44 = vld [vmem:[#allocation8 + $0x348] sm:$0xf0]  ;;  %v2423_v56 = vperm.slane %v6950_v26, 3  ;;  %v5900_v26 = vld [vmem:[#allocation8 + $0x410] sm:$0xf]  ;;  %v5933_v25 = vor.u32 %v6396_v24, %v5932_v22 }
 0x30a   : > { %v5829_v46 = vor.u32 %v6369_v27, %v5826_v44  ;;  %v6383_v29 = vld [vmem:[#allocation8 + $0x3c4] sm:$0xf0]  ;;  %v5928_v30 = vld [vmem:[#allocation8 + $0x480] sm:$0xf] }
 0x30b   : > { %v3293_v2 = vmax.f32 %v3176_v41, 0.0  ;;  %v3246_v59 = vadd.f32 %v3245_v49, %v2423_v56  ;;  %v3248_v63 = vadd.f32 %v3247_v32, %v2423_v56  ;;  %v6393_v27 = vld [vmem:[#allocation8 + $0x464] sm:$0xf0]  ;;  %v5904_v32 = vld [vmem:[#allocation8 + $0x420] sm:$0xf] }
 0x30c   : > { %3794 = vmatpush.bf16.msrb.mxu1 %v5853_v62  ;;  %v5880_v62 = vld [vmem:[#allocation8 + $0x3c0] sm:$0xf] }
 0x30f   : > { %v3259_v51 = vpop.f32.mrf.mxu2 }
 0x310   : > { %v3177_v57 = vpop.f32.mrf.mxu1 }
 0x311   : > { %v3178_v3 = vadd.f32 %v3177_v57, %v3164_v53  ;;  %v3260_v53 = vadd.f32 %v3259_v51, %v3246_v59  ;;  %v5908_v51 = vld [vmem:[#allocation8 + $0x430] sm:$0xf]  ;;  %v3368_v59 = vld [vmem:[#allocation9 + $0xe] sm:$0x3] }
 0x313   : > { %v3297_v9 = vmax.f32 %v3178_v3, 0.0 }
 0x315   : > { %v3301_v14 = vpack.c.bf16 %v3297_v9, %v3293_v2  ;;  %v6388_v9 = vld [vmem:[#allocation8 + $0x414] sm:$0xf0] }
 0x316   : > { %v5901_v10 = vor.u32 %v6388_v9, %v5900_v26 }
 0x317   : > { %3716 = vmatmul.bf16.vlgmr.msra.gmra.mxu2 %v3301_v14  ;;  %3758 = vmatmul.bf16.vlgmr.msrb.gmra.mxu3 %v3300_v55  ;;  %v5845_v55 = vor.u32 %v6373_v18, %v5842_v31  ;;  %v3261_v60 = vpop.f32.mrf.mxu2  ;;  %v6395_v18 = vld [vmem:[#allocation8 + $0x484] sm:$0xf0] }
 0x318   : > { %v3231_v39 = vpop.f32.mrf.mxu1  ;;  %v3262_v0 = vadd.f32 %v3261_v60, %v3248_v63  ;;  %3944 = vmatpush.bf16.msra.mxu3 %v5901_v10  ;;  %3958 = vmatpush.bf16.msra.mxu2 %v5933_v25  ;;  %v5929_v31 = vor.u32 %v6395_v18, %v5928_v30 }
 0x319   : > { %v3232_v34 = vadd.f32 %v3231_v39, %v3218_v12  ;;  %3795 = vmatpush.bf16.msrb.mxu1 %v5845_v55  ;;  %v5889_v39 = vor.u32 %v6385_v20, %v5888_v19  ;;  %v5881_v12 = vor.u32 %v6383_v29, %v5880_v62  ;;  %v5924_v55 = vld [vmem:[#allocation8 + $0x470] sm:$0xf] }
 0x31a   : > { %v3273_v54 = vpop.f32.mrf.mxu0 }
 0x31b   : > { %v3294_v40 = vmax.f32 %v3232_v34, 0.0  ;;  %v3274_v57 = vadd.f32 %v3273_v54, %v3260_v53  ;;  %v6382_v34 = vld [vmem:[#allocation8 + $0x3b4] sm:$0xf0]  ;;  %v3370_v53 = vperm.slane %v3368_v59, 0 }
 0x31c   : > { %3945 = vmatpush.bf16.msra.mxu3 %v5897_v4  ;;  %3959 = vmatpush.bf16.msra.mxu2 %v5929_v31 }
 0x31d   : > { %3796 = vmatpush.bf16.msrb.mxu1 %v5837_v43 }
 0x320   : > { %v3233_v28 = vpop.f32.mrf.mxu1 }
 0x321   : > { %v3234_v35 = vadd.f32 %v3233_v28, %v3220_v33  ;;  %3797 = vmatpush.bf16.msrb.mxu1 %v5829_v46  ;;  %v5876_v33 = vld [vmem:[#allocation8 + $0x3b0] sm:$0xf]  ;;  %v6392_v46 = vld [vmem:[#allocation8 + $0x454] sm:$0xf0] }
 0x322   : > { %v3275_v41 = vpop.f32.mrf.mxu0  ;;  %v5877_v28 = vor.u32 %v6382_v34, %v5876_v33 }
 0x323   : > { %v3298_v42 = vmax.f32 %v3234_v35, 0.0  ;;  %v3276_v3 = vadd.f32 %v3275_v41, %v3262_v0  ;;  %v6394_v35 = vld [vmem:[#allocation8 + $0x474] sm:$0xf0] }
 0x324   : > { %v5925_v36 = vor.u32 %v6394_v35, %v5924_v55  ;;  %v6484_v55 = vld [vmem:[#allocation9 + $0x10] ss:$0 sm:$0xff] }
 0x325   : > { %v3302_v45 = vpack.c.bf16 %v3298_v42, %v3294_v40  ;;  %3798 = vmatpush.bf16.msrb.mxu1 %v5821_v48  ;;  %v6381_v40 = vld [vmem:[#allocation8 + $0x3a4] sm:$0xf0]  ;;  %v5920_v42 = vld [vmem:[#allocation8 + $0x460] sm:$0xf] }
 0x326   : > { %3960 = vmatpush.bf16.msra.mxu2 %v5925_v36  ;;  %v5873_v43 = vor.u32 %v6381_v40, %v5872_v38  ;;  %v5921_v44 = vor.u32 %v6393_v27, %v5920_v42  ;;  %v6391_v48 = vld [vmem:[#allocation8 + $0x444] sm:$0xf0] }
 0x327   : > { %3730 = vmatmul.bf16.vlgmr.msra.gmra.mxu0 %v3302_v45  ;;  %3772 = vmatmul.bf16.vlgmr.msrb.gmra.mxu2 %v3301_v14  ;;  %v5892_v14 = vld [vmem:[#allocation8 + $0x3f0] sm:$0xf]  ;;  %v5913_v50 = vor.u32 %v6391_v48, %v5912_v47 }
 0x328   : > { %v5893_v17 = vor.u32 %v6386_v16, %v5892_v14  ;;  %v3371_v16 = vperm.slane %v3368_v59, 1 }
 0x329   : > { %3799 = vmatpush.bf16.msrb.mxu1 %v5813_v52  ;;  %v6390_v52 = vld [vmem:[#allocation8 + $0x434] sm:$0xf0] }
 0x32a   : > { %3946 = vmatpush.bf16.msra.mxu3 %v5893_v17  ;;  %3961 = vmatpush.bf16.msra.mxu2 %v5921_v44  ;;  %v5909_v56 = vor.u32 %v6390_v52, %v5908_v51 }
 0x32e   : > { %3947 = vmatpush.bf16.msra.mxu3 %v5889_v39 }
 0x332   : > { %3948 = vmatpush.bf16.msra.mxu3 %v5885_v23 }
 0x336   : > { %3949 = vmatpush.bf16.msra.mxu3 %v5881_v12 }
 0x337   : > { %3786 = vmatmul.bf16.vlgmr.msrb.gmra.mxu0 %v3302_v45  ;;  %v5916_v45 = vld [vmem:[#allocation8 + $0x450] sm:$0xf] }
 0x338   : > { %v3287_v58 = vpop.f32.mrf.mxu1  ;;  %v5917_v8 = vor.u32 %v6392_v46, %v5916_v45 }
 0x339   : > { %v3288_v37 = vadd.f32 %v3287_v58, %v3274_v57  ;;  %v6389_v58 = vld [vmem:[#allocation8 + $0x424] sm:$0xf0] }
 0x33a   : > { %3950 = vmatpush.bf16.msra.mxu3 %v5877_v28  ;;  %3962 = vmatpush.bf16.msra.mxu2 %v5917_v8  ;;  %v5905_v60 = vor.u32 %v6389_v58, %v5904_v32 }
 0x33b   : > { %v3295_v6 = vmax.f32 %v3288_v37, 0.0 }
 0x33e   : > { %3951 = vmatpush.bf16.msra.mxu3 %v5873_v43  ;;  %3963 = vmatpush.bf16.msra.mxu2 %v5913_v50 }
 0x340   : > { %v3289_v5 = vpop.f32.mrf.mxu1 }
 0x341   : > { %v3290_v1 = vadd.f32 %v3289_v5, %v3276_v3 }
 0x342   : > { %3964 = vmatpush.bf16.msra.mxu2 %v5909_v56 }
 0x343   : > { %v3299_v7 = vmax.f32 %v3290_v1, 0.0 }
 0x345   : > { %v3303_v2 = vpack.c.bf16 %v3299_v7, %v3295_v6 }
 0x346   : > { %3965 = vmatpush.bf16.msra.mxu2 %v5905_v60 }
 0x347   : > { %3744 = vmatmul.bf16.vlgmr.msra.gmra.mxu1 %v3303_v2 }
 0x357   : > { %3800 = vmatmul.bf16.vlgmr.msrb.gmra.mxu1 %v3303_v2 }
 0x38a   : > { %v3703_v49 = vpop.f32.mrf.mxu3 }
 0x38b   : > { %v3704_v3 = vadd.f32 %v3703_v49, %v3370_v53 }
 0x392   : > { %v3705_v63 = vpop.f32.mrf.mxu3 }
 0x393   : > { %v3706_v37 = vadd.f32 %v3705_v63, %v3370_v53 }
 0x39a   : > { %v3717_v15 = vpop.f32.mrf.mxu2  ;;  %v3759_v7 = vpop.f32.mrf.mxu3 }
 0x39b   : > { %v3718_v5 = vadd.f32 %v3717_v15, %v3704_v3  ;;  %v3760_v39 = vadd.f32 %v3759_v7, %v3371_v16 }
 0x3a2   : > { %v3719_v41 = vpop.f32.mrf.mxu2  ;;  %v3761_v19 = vpop.f32.mrf.mxu3 }
 0x3a3   : > { %v3720_v1 = vadd.f32 %v3719_v41, %v3706_v37  ;;  %v3762_v21 = vadd.f32 %v3761_v19, %v3371_v16 }
 0x3a4   : > { %v3731_v54 = vpop.f32.mrf.mxu0 }
 0x3a5   : > { %v3732_v6 = vadd.f32 %v3731_v54, %v3718_v5 }
 0x3aa   : > { %v3773_v9 = vpop.f32.mrf.mxu2 }
 0x3ab   : > { %v3774_v22 = vadd.f32 %v3773_v9, %v3760_v39 }
 0x3ac   : > { %v3733_v0 = vpop.f32.mrf.mxu0 }
 0x3ad   : > { %v3734_v2 = vadd.f32 %v3733_v0, %v3720_v1 }
 0x3b2   : > { %v3775_v61 = vpop.f32.mrf.mxu2 }
 0x3b3   : > { %v3776_v24 = vadd.f32 %v3775_v61, %v3762_v21 }
 0x3b4   : > { %v3787_v13 = vpop.f32.mrf.mxu0 }
 0x3b5   : > { %v3788_v25 = vadd.f32 %v3787_v13, %v3774_v22 }
 0x3bc   : > { %v3789_v23 = vpop.f32.mrf.mxu0 }
 0x3bd   : > { %v3790_v62 = vadd.f32 %v3789_v23, %v3776_v24 }
 0x3c4   : > { %v3745_v57 = vpop.f32.mrf.mxu1 }
 0x3c5   : > { %v3746_v26 = vadd.f32 %v3745_v57, %v3732_v6 }
 0x3c7   : > { %v3806_v4 = vmax.f32 %v3746_v26, 0.0 }
 0x3cc   : > { %v3747_v10 = vpop.f32.mrf.mxu1 }
 0x3cd   : > { %v3748_v11 = vadd.f32 %v3747_v10, %v3734_v2 }
 0x3cf   : > { %v3808_v14 = vmax.f32 %v3748_v11, 0.0 }
 0x3d1   : > { %v3810_v17 = vpack.c.bf16 %v3808_v14, %v3806_v4 }
 0x3d3   : > { %3952 = vmatmul.bf16.vlgmr.msra.gmra.mxu3 %v3810_v17 }
 0x3d4   : > { %v3801_v20 = vpop.f32.mrf.mxu1 }
 0x3d5   : > { %v3802_v29 = vadd.f32 %v3801_v20, %v3788_v25 }
 0x3d7   : > { %v3807_v18 = vmax.f32 %v3802_v29, 0.0 }
 0x3dc   : > { %v3803_v30 = vpop.f32.mrf.mxu1 }
 0x3dd   : > { %v3804_v12 = vadd.f32 %v3803_v30, %v3790_v62 }
 0x3df   : > { %v3809_v31 = vmax.f32 %v3804_v12, 0.0 }
 0x3e1   : > { %v3811_v33 = vpack.c.bf16 %v3809_v31, %v3807_v18 }
 0x3e3   : > { %3966 = vmatmul.bf16.vlgmr.msra.gmra.mxu2 %v3811_v33 }
 0x456   : > { %v3953_v34 = vpop.f32.mrf.mxu3 }
 0x457   : > { %v3954_v28 = vadd.f32 %v6484_v55, %v3953_v34 }
 0x45e   : > { %v3955_v38 = vpop.f32.mrf.mxu3 }
 0x45f   : > { %v3956_v40 = vadd.f32 %v6484_v55, %v3955_v38 }
 0x466   : > { %v3967_v35 = vpop.f32.mrf.mxu2 }
 0x467   : > { %v3968_v36 = vadd.f32 %v3967_v35, %v3954_v28 }
 0x469   : > { %3972 = vst [vmem:[%s266_s20] sm:$0xff] %v3968_v36 }
 0x46e   : > { %v3969_v42 = vpop.f32.mrf.mxu2 }
 0x46f   : > { %v3970_v43 = vadd.f32 %v3969_v42, %v3956_v40 }
 0x471   : > { %3973 = vst [vmem:[%s266_s20 + $0x8] sm:$0xff] %v3970_v43 }
 0x472   : > { %6632 = shalt.err (!%p6629_p10)
}
 0x473   : > { %s6691_s10 = smov 128   ;;  %s6692_s24 = smov 8  }
 0x474   : > { %6412 = dma.vmem_to_hbm [thread:$0]  (%p6801_p7), %s3988_s27, 256, %s3990_s28, %s3975_s6, %s6691_s10, %s6691_s10, %s6692_s24  }
 0x475 PF: > { %s4004_s21 = sand.u32 1, %s6667_s15   ;;  %p7009_p12 = scmp.ge.s32.totalorder %s6679_s18, 2 }
 0x476   : > { %s4005_s26 = scalar_lea.sflag [#allocation5], %s4004_s21 }
 0x477   : > { %p6429_p13 = pnand %p7009_p12, %p6753_p6 }
 0x479   : > { %p6430_p0 = pneg %p6429_p13 }
 0x47b   : > { %6662 = dma.done.wait (%p6430_p0), %s4005_s26, 256  }
 0x47c   : > { %6664 = vsyncadd (%p6430_p0), %s4005_s26, 4294967040  ;;  %p19_p3 = scmp.ge.s32.totalorder %s6787_s25, 4   ;;  %s7010_s15 = smov %s6671_s16 }
 0x47d   : > { %s7011_s16 = smov %s6675_s17  ;;  %s7012_s17 = smov %s6797_s30 }
 0x47e   : > { %s7013_s18 = smov %s6787_s25  ;;  %21 = sbr.rel (!%p19_p3) target bundleno = 7 (0x7), region = 93 }
 0x483   :  { %4011 = vsyncpa [#allocation4], 1 }
 0x484   :  { %4013 = vsyncpa [#allocation4 + $0x1], 1 }
 0x485   :  { %4014 = vsyncpa [#allocation7], 1 }
 0x486   :  { %4015 = vsyncpa [#allocation10], 1 }
 0x487   :  { %4016 = vsyncpa [#allocation5], 1 }
 0x488   :  { %4018 = vsyncpa [#allocation5 + $0x1], 1 }

</bundles_post_ra>
